<compile_context>
chip_gen: v6e
topology: v6e:2x2x1
jax: 0.10.0
libtpu: 0.0.40
codegen_flags: <defaults>
</compile_context>

<pallas_src>
import functools

import jax
import jax.numpy as jnp
import numpy as np
from jax.experimental import pallas as pl
from jax.experimental.pallas import tpu as pltpu

KSIZE = 3     # kernel_size=3 -> padding = kernel_size // 2 = 1
LANE = 128    # TPU lane width


def _round_up(x, m):
    return (x + m - 1) // m * m


def _vmem_limit_bytes():
    """Generation-aware VMEM budget (~48 MiB on v7x, up to 96 MiB on v5e/v6e)."""
    cap = 64 * 1024 * 1024  # conservative default = v7x per-TensorCore VMEM
    try:
        cap = int(pltpu.get_tpu_info().vmem_capacity_bytes)
    except Exception:
        pass
    return min(int(cap * 3 // 4), 96 * 1024 * 1024)


def _fused_conv_relu_kernel(x_ref, w_ref, b_ref, o_ref, act_ref, patch_ref, *,
                            times, cin, cout, cs, H, W, kreal, kpad, cdtype):
    """times x [3x3 'SAME' conv + bias + ReLU], fused in VMEM, im2col matmuls.

    x_ref:     (1, H, W, cin)        one batch element, NHWC
    w_ref:     (times, kpad, cpad)   per-layer im2col weights (row = t*cs + c)
    b_ref:     (times, 1, cpad)      per-layer bias (f32)
    o_ref:     (1, H, W, cout)       output tile (only real channels stored)
    act_ref:   (H+2, W+2, cs)        zero-halo activation scratch (cdtype)
    patch_ref: (H*W, kpad)           im2col staging buffer (cdtype)
    """
    # ---- per-step scratch init (megacore-safe: no pl.when(pid==0) init) ----
    # Only the 1-pixel halo border is zeroed; the interior is overwritten.
    act_ref[0:1, :, :] = jnp.zeros((1, W + 2, cs), cdtype)
    act_ref[H + 1:H + 2, :, :] = jnp.zeros((1, W + 2, cs), cdtype)
    act_ref[1:H + 1, 0:1, :] = jnp.zeros((H, 1, cs), cdtype)
    act_ref[1:H + 1, W + 1:W + 2, :] = jnp.zeros((H, 1, cs), cdtype)
    # Layer-0 input: real channels, plus zeroed lane-pad channels [cin:cs]
    # (must be re-zeroed per step so the previous element's intermediate
    # activation cannot leak into the padded channels).
    act_ref[1:H + 1, 1:W + 1, :cin] = x_ref[0].astype(cdtype)
    if cin < cs:
        act_ref[1:H + 1, 1:W + 1, cin:] = jnp.zeros((H, W, cs - cin), cdtype)
    # im2col K-padding columns must be zero (weight rows there are zero, but
    # NaN scratch garbage * 0 would still poison the matmul).
    if kreal < kpad:
        patch_ref[:, kreal:] = jnp.zeros((H * W, kpad - kreal), cdtype)

    for l in range(times):                    # `times` is static -> unrolled
        # Gather the 9 shifted taps once per layer into the contiguous
        # im2col staging buffer (columns t*cs .. t*cs + cs).
        for t in range(KSIZE * KSIZE):
            ky, kx = divmod(t, KSIZE)
            patch_ref[:, t * cs:(t + 1) * cs] = (
                act_ref[ky:ky + H, kx:kx + W, :].reshape(H * W, cs))
        # ONE MXU matmul per layer; accumulate in registers/MRB, not through
        # a VMEM accumulator.
        y = jnp.dot(patch_ref[...], w_ref[l],
                    preferred_element_type=jnp.float32)
        y = jnp.maximum(y + b_ref[l], 0.0)    # bias + ReLU
        if l + 1 < times:
            # Intermediate stays in VMEM. Channels [cout:cpad] of y are
            # exactly 0 (zero weight columns + zero bias -> ReLU(0)), so
            # writing :cs keeps the next layer's unused channels zero.
            act_ref[1:H + 1, 1:W + 1, :] = (
                y[:, :cs].reshape(H, W, cs).astype(cdtype))
        else:
            # Store only the real output channels (no cpad writeback).
            o_ref[0] = y[:, :cout].reshape(H, W, cout).astype(o_ref.dtype)


def pack_conv_params(weights, biases, cs, compute_dtype):
    """Pack HWIO conv weights/biases into the kernel's im2col layout (once).

    weights[l]: (3, 3, cin_l, cout). Packed row index = t*cs + c
    (tap t = ky*3 + kx, input channel c); column index = output channel.
    """
    times = len(weights)
    cout = weights[0].shape[-1]
    kreal = KSIZE * KSIZE * cs
    kpad = _round_up(kreal, LANE)
    cpad = _round_up(cs, LANE)
    w_all = np.zeros((times, kpad, cpad), np.float32)
    b_all = np.zeros((times, 1, cpad), np.float32)
    for l, (w, b) in enumerate(zip(weights, biases)):
        w = np.asarray(w, np.float32)
        cin_l = w.shape[2]
        wl = np.zeros((KSIZE * KSIZE, cs, cout), np.float32)
        wl[:, :cin_l, :] = w.reshape(KSIZE * KSIZE, cin_l, cout)
        w_all[l, :kreal, :cout] = wl.reshape(kreal, cout)
        b_all[l, 0, :cout] = np.asarray(b, np.float32)
    return jnp.asarray(w_all, compute_dtype), jnp.asarray(b_all, jnp.float32)


def conv_bn_activation_forward(x_nchw, w_all, b_all, *, cout, times,
                               compute_dtype=jnp.bfloat16):
    """times x [Conv2d(3x3, pad=1) + bias -> ReLU], fused into one pallas_call.

    x_nchw: (N, Cin, H, W); w_all/b_all from pack_conv_params.
    Returns (N, cout, H, W) in x's dtype.
    """
    N, cin, H, W = x_nchw.shape
    cs = max(cin, cout)
    kreal = KSIZE * KSIZE * cs
    kpad = int(w_all.shape[1])
    cpad = int(w_all.shape[2])
    out_dtype = x_nchw.dtype
    cd_bytes = jnp.dtype(compute_dtype).itemsize

    # NCHW -> NHWC (channels on the lane axis) + operand-dtype cast
    # (bf16 operands by default; accumulation stays f32 inside the kernel).
    x = jnp.transpose(x_nchw, (0, 2, 3, 1)).astype(compute_dtype)

    kernel = functools.partial(
        _fused_conv_relu_kernel, times=times, cin=cin, cout=cout, cs=cs,
        H=H, W=W, kreal=kreal, kpad=kpad, cdtype=compute_dtype)

    flops = 2 * N * times * H * W * kpad * cpad          # physical (padded) work
    bytes_accessed = (x.size * cd_bytes
                      + w_all.size * jnp.dtype(w_all.dtype).itemsize
                      + b_all.size * 4
                      + N * H * W * cout * jnp.dtype(out_dtype).itemsize)

    # TODO(synk): for large spatial sizes add an H row-strip grid axis (with a
    # `times`-deep halo) plus an in-kernel M-strip loop over im2col rows so the
    # act/patch scratch stay inside v7x's 64 MiB VMEM; at the sizes exercised
    # here a whole image per grid step is far under budget.
    # TODO(synk): a VPU formulation (spatial on the lane axis, unrolled taps)
    # would avoid the remaining lane padding on v5e for very small channels.
    y = pl.pallas_call(
        kernel,
        out_shape=jax.ShapeDtypeStruct((N, H, W, cout), out_dtype),
        grid_spec=pltpu.PrefetchScalarGridSpec(
            num_scalar_prefetch=0,
            grid=(N,),   # N >= 2 keeps both v7x TensorCores busy
            in_specs=[
                pl.BlockSpec((1, H, W, cin), lambda n: (n, 0, 0, 0)),
                # Grid-invariant (small) weight/bias blocks.
                # TODO(synk): single-buffer these via pipeline_mode=pl.Buffered(1)
                # once exercised; skipped to keep the hot path on well-trodden
                # lowering.
                pl.BlockSpec((times, kpad, cpad), lambda n: (0, 0, 0)),
                pl.BlockSpec((times, 1, cpad), lambda n: (0, 0, 0)),
            ],
            out_specs=pl.BlockSpec((1, H, W, cout), lambda n: (n, 0, 0, 0)),
            scratch_shapes=[
                pltpu.VMEM((H + 2, W + 2, cs), compute_dtype),  # zero-halo act
                pltpu.VMEM((H * W, kpad), compute_dtype),       # im2col patch
            ]),
        compiler_params=pltpu.CompilerParams(
            dimension_semantics=("parallel",),
            vmem_limit_bytes=_vmem_limit_bytes()),
        cost_estimate=pl.CostEstimate(flops=flops, transcendentals=0,
                                      bytes_accessed=bytes_accessed),
    )(x, w_all, b_all)

    # NHWC -> PyTorch's NCHW convention (only real channels were stored).
    return jnp.transpose(y, (0, 3, 1, 2))


class ConvBnActivationPallas:
    """times x [Conv2d(k=3, pad=1) -> ReLU]  (is_bn=False, is_spe_norm=False)."""

    def __init__(self, in_channels, out_channels, times=1,
                 compute_dtype=jnp.bfloat16, key=None):
        if key is None:
            key = jax.random.PRNGKey(0)
        self.weights, self.biases = [], []
        for i in range(times):
            cin = in_channels if i == 0 else out_channels
            key, kw, kb = jax.random.split(key, 3)
            # Deterministic PyTorch-like (kaiming-uniform-ish) init.
            fan_in = cin * KSIZE * KSIZE
            bound = 1.0 / np.sqrt(fan_in)
            w = jax.random.uniform(kw, (KSIZE, KSIZE, cin, out_channels),
                                   jnp.float32, -bound, bound)
            b = jax.random.uniform(kb, (out_channels,), jnp.float32,
                                   -bound, bound)
            self.weights.append(w)
            self.biases.append(b)
        # Pack (pad + stack) the conv parameters ONCE, outside the jitted
        # forward, in the kernel's im2col layout.
        cs = max(in_channels, out_channels)
        self._w_all, self._b_all = pack_conv_params(
            self.weights, self.biases, cs, compute_dtype)
        # TODO(synk): BatchNorm (is_bn=True), lrelu/prelu activations,
        # spectral_norm and dimension=3 are module options not exercised by
        # the defaults and are not implemented here.
        self._fwd = jax.jit(functools.partial(
            conv_bn_activation_forward, cout=out_channels, times=times,
            compute_dtype=compute_dtype))

    def __call__(self, x_nchw):
        return self._fwd(x_nchw, self._w_all, self._b_all)


def _reference(x_nchw, weights, biases):
    """Pure-JAX reference (lax conv) for correctness check."""
    x = x_nchw
    for w, b in zip(weights, biases):
        w_oihw = jnp.transpose(w, (3, 2, 0, 1))
        x = jax.lax.conv_general_dilated(
            x, w_oihw, window_strides=(1, 1), padding="SAME",
            dimension_numbers=("NCHW", "OIHW", "NCHW"))
        x = jnp.maximum(x + b.reshape(1, -1, 1, 1), 0.0)
    return x


if __name__ == "__main__":
    key = jax.random.PRNGKey(0)
    k_x, k_p = jax.random.split(key)

    N, Cin, H, W = 2, 4, 16, 16
    Cout = 8
    times = 2   # exercises the fused Sequential repetition (Cin->Cout, Cout->Cout)

    x = jax.random.normal(k_x, (N, Cin, H, W), dtype=jnp.float32)

    # f32 operand path: tight check against the lax reference.
    mod_f32 = ConvBnActivationPallas(Cin, Cout, times=times,
                                     compute_dtype=jnp.float32, key=k_p)
    out_f32 = jax.block_until_ready(mod_f32(x))
    ref = _reference(x, mod_f32.weights, mod_f32.biases)
    np.testing.assert_allclose(np.asarray(out_f32), np.asarray(ref),
                               rtol=1e-4, atol=1e-4)

    # bf16 operand / f32-accumulate path (the default, recommended on v6e/v7x):
    # loose check (intermediate activations between fused layers are bf16).
    mod_bf16 = ConvBnActivationPallas(Cin, Cout, times=times, key=k_p)
    out_bf16 = jax.block_until_ready(mod_bf16(x))
    np.testing.assert_allclose(np.asarray(out_bf16), np.asarray(ref),
                               rtol=3e-2, atol=3e-2)

    print("KERNEL_OK")
</pallas_src>

<mosaic_0001>
module attributes {stable_mosaic.version = 11 : i64} {
  func.func @_fused_conv_relu_kernel(%arg0: i32, %arg1: memref<1x16x16x4xf32, #tpu.memory_space<vmem>>, %arg2: memref<2x128x128xf32, #tpu.memory_space<vmem>>, %arg3: memref<2x1x128xf32, #tpu.memory_space<vmem>>, %arg4: memref<1x16x16x8xf32, #tpu.memory_space<vmem>>, %arg5: memref<18x18x8xf32, #tpu.memory_space<vmem>>, %arg6: memref<256x128xf32, #tpu.memory_space<vmem>>) attributes {dimension_semantics = [#tpu.dimension_semantics<parallel>], iteration_bounds = array<i64: 2>, scalar_prefetch = 0 : i64, scratch_operands = 2 : i64, tpu.core_type = #tpu.core_type<tc>, window_params = [{transform_indices = @transform_0, window_bounds = array<i64: 1, 16, 16, 4>}, {pipeline_mode = #tpu.pipeline_mode<synchronous>, transform_indices = @transform_1, window_bounds = array<i64: 2, 128, 128>}, {pipeline_mode = #tpu.pipeline_mode<synchronous>, transform_indices = @transform_2, window_bounds = array<i64: 2, 1, 128>}, {transform_indices = @transform_3, window_bounds = array<i64: 1, 16, 16, 8>}]} {
    %cst = arith.constant 0.000000e+00 : f32
    %0 = vector.broadcast %cst : f32 to vector<1x18x8xf32>
    %c0 = arith.constant 0 : index
    %c0_0 = arith.constant 0 : index
    %c0_1 = arith.constant 0 : index
    %1 = vector.load %arg5[%c0, %c0_0, %c0_1] : memref<18x18x8xf32, #tpu.memory_space<vmem>>, vector<1x18x8xf32>
    tpu.vector_store %arg5[%c0, %c0_0, %c0_1], %0 {strides = array<i32>} : memref<18x18x8xf32, #tpu.memory_space<vmem>>, vector<1x18x8xf32>,
    %cst_2 = arith.constant 0.000000e+00 : f32
    %2 = vector.broadcast %cst_2 : f32 to vector<1x18x8xf32>
    %c17 = arith.constant 17 : index
    %c0_3 = arith.constant 0 : index
    %c0_4 = arith.constant 0 : index
    %3 = vector.load %arg5[%c17, %c0_3, %c0_4] : memref<18x18x8xf32, #tpu.memory_space<vmem>>, vector<1x18x8xf32>
    tpu.vector_store %arg5[%c17, %c0_3, %c0_4], %2 {strides = array<i32>} : memref<18x18x8xf32, #tpu.memory_space<vmem>>, vector<1x18x8xf32>,
    %cst_5 = arith.constant 0.000000e+00 : f32
    %4 = vector.broadcast %cst_5 : f32 to vector<16x1x8xf32>
    %c1 = arith.constant 1 : index
    %c0_6 = arith.constant 0 : index
    %c0_7 = arith.constant 0 : index
    %5 = vector.load %arg5[%c1, %c0_6, %c0_7] : memref<18x18x8xf32, #tpu.memory_space<vmem>>, vector<16x1x8xf32>
    tpu.vector_store %arg5[%c1, %c0_6, %c0_7], %4 {strides = array<i32>} : memref<18x18x8xf32, #tpu.memory_space<vmem>>, vector<16x1x8xf32>,
    %cst_8 = arith.constant 0.000000e+00 : f32
    %6 = vector.broadcast %cst_8 : f32 to vector<16x1x8xf32>
    %c1_9 = arith.constant 1 : index
    %c17_10 = arith.constant 17 : index
    %c0_11 = arith.constant 0 : index
    %7 = vector.load %arg5[%c1_9, %c17_10, %c0_11] : memref<18x18x8xf32, #tpu.memory_space<vmem>>, vector<16x1x8xf32>
    tpu.vector_store %arg5[%c1_9, %c17_10, %c0_11], %6 {strides = array<i32>} : memref<18x18x8xf32, #tpu.memory_space<vmem>>, vector<16x1x8xf32>,
    %c0_12 = arith.constant 0 : index
    %c0_13 = arith.constant 0 : index
    %c0_14 = arith.constant 0 : index
    %c0_15 = arith.constant 0 : index
    %8 = vector.load %arg1[%c0_12, %c0_13, %c0_14, %c0_15] : memref<1x16x16x4xf32, #tpu.memory_space<vmem>>, vector<1x16x16x4xf32>
    %9 = vector.shape_cast %8 : vector<1x16x16x4xf32> to vector<16x16x4xf32>
    %c1_16 = arith.constant 1 : index
    %c1_17 = arith.constant 1 : index
    %c0_18 = arith.constant 0 : index
    %10 = vector.load %arg5[%c1_16, %c1_17, %c0_18] : memref<18x18x8xf32, #tpu.memory_space<vmem>>, vector<16x16x4xf32>
    tpu.vector_store %arg5[%c1_16, %c1_17, %c0_18], %9 {strides = array<i32>} : memref<18x18x8xf32, #tpu.memory_space<vmem>>, vector<16x16x4xf32>,
    %cst_19 = arith.constant 0.000000e+00 : f32
    %11 = vector.broadcast %cst_19 : f32 to vector<16x16x4xf32>
    %c1_20 = arith.constant 1 : index
    %c1_21 = arith.constant 1 : index
    %c4 = arith.constant 4 : index
    %12 = vector.load %arg5[%c1_20, %c1_21, %c4] : memref<18x18x8xf32, #tpu.memory_space<vmem>>, vector<16x16x4xf32>
    tpu.vector_store %arg5[%c1_20, %c1_21, %c4], %11 {strides = array<i32>} : memref<18x18x8xf32, #tpu.memory_space<vmem>>, vector<16x16x4xf32>,
    %cst_22 = arith.constant 0.000000e+00 : f32
    %13 = vector.broadcast %cst_22 : f32 to vector<256x56xf32>
    %c0_23 = arith.constant 0 : index
    %c72 = arith.constant 72 : index
    %14 = vector.load %arg6[%c0_23, %c72] : memref<256x128xf32, #tpu.memory_space<vmem>>, vector<256x56xf32>
    tpu.vector_store %arg6[%c0_23, %c72], %13 {strides = array<i32>} : memref<256x128xf32, #tpu.memory_space<vmem>>, vector<256x56xf32>,
    %c0_24 = arith.constant 0 : index
    %c0_25 = arith.constant 0 : index
    %c0_26 = arith.constant 0 : index
    %15 = vector.load %arg5[%c0_24, %c0_25, %c0_26] : memref<18x18x8xf32, #tpu.memory_space<vmem>>, vector<16x16x8xf32>
    %16 = vector.shape_cast %15 : vector<16x16x8xf32> to vector<256x8xf32>
    %c0_27 = arith.constant 0 : index
    %c0_28 = arith.constant 0 : index
    %17 = vector.load %arg6[%c0_27, %c0_28] : memref<256x128xf32, #tpu.memory_space<vmem>>, vector<256x8xf32>
    tpu.vector_store %arg6[%c0_27, %c0_28], %16 {strides = array<i32>} : memref<256x128xf32, #tpu.memory_space<vmem>>, vector<256x8xf32>,
    %c0_29 = arith.constant 0 : index
    %c1_30 = arith.constant 1 : index
    %c0_31 = arith.constant 0 : index
    %18 = vector.load %arg5[%c0_29, %c1_30, %c0_31] : memref<18x18x8xf32, #tpu.memory_space<vmem>>, vector<16x16x8xf32>
    %19 = vector.shape_cast %18 : vector<16x16x8xf32> to vector<256x8xf32>
    %c0_32 = arith.constant 0 : index
    %c8 = arith.constant 8 : index
    %20 = vector.load %arg6[%c0_32, %c8] : memref<256x128xf32, #tpu.memory_space<vmem>>, vector<256x8xf32>
    tpu.vector_store %arg6[%c0_32, %c8], %19 {strides = array<i32>} : memref<256x128xf32, #tpu.memory_space<vmem>>, vector<256x8xf32>,
    %c0_33 = arith.constant 0 : index
    %c2 = arith.constant 2 : index
    %c0_34 = arith.constant 0 : index
    %21 = vector.load %arg5[%c0_33, %c2, %c0_34] : memref<18x18x8xf32, #tpu.memory_space<vmem>>, vector<16x16x8xf32>
    %22 = vector.shape_cast %21 : vector<16x16x8xf32> to vector<256x8xf32>
    %c0_35 = arith.constant 0 : index
    %c16 = arith.constant 16 : index
    %23 = vector.load %arg6[%c0_35, %c16] : memref<256x128xf32, #tpu.memory_space<vmem>>, vector<256x8xf32>
    tpu.vector_store %arg6[%c0_35, %c16], %22 {strides = array<i32>} : memref<256x128xf32, #tpu.memory_space<vmem>>, vector<256x8xf32>,
    %c1_36 = arith.constant 1 : index
    %c0_37 = arith.constant 0 : index
    %c0_38 = arith.constant 0 : index
    %24 = vector.load %arg5[%c1_36, %c0_37, %c0_38] : memref<18x18x8xf32, #tpu.memory_space<vmem>>, vector<16x16x8xf32>
    %25 = vector.shape_cast %24 : vector<16x16x8xf32> to vector<256x8xf32>
    %c0_39 = arith.constant 0 : index
    %c24 = arith.constant 24 : index
    %26 = vector.load %arg6[%c0_39, %c24] : memref<256x128xf32, #tpu.memory_space<vmem>>, vector<256x8xf32>
    tpu.vector_store %arg6[%c0_39, %c24], %25 {strides = array<i32>} : memref<256x128xf32, #tpu.memory_space<vmem>>, vector<256x8xf32>,
    %c1_40 = arith.constant 1 : index
    %c1_41 = arith.constant 1 : index
    %c0_42 = arith.constant 0 : index
    %27 = vector.load %arg5[%c1_40, %c1_41, %c0_42] : memref<18x18x8xf32, #tpu.memory_space<vmem>>, vector<16x16x8xf32>
    %28 = vector.shape_cast %27 : vector<16x16x8xf32> to vector<256x8xf32>
    %c0_43 = arith.constant 0 : index
    %c32 = arith.constant 32 : index
    %29 = vector.load %arg6[%c0_43, %c32] : memref<256x128xf32, #tpu.memory_space<vmem>>, vector<256x8xf32>
    tpu.vector_store %arg6[%c0_43, %c32], %28 {strides = array<i32>} : memref<256x128xf32, #tpu.memory_space<vmem>>, vector<256x8xf32>,
    %c1_44 = arith.constant 1 : index
    %c2_45 = arith.constant 2 : index
    %c0_46 = arith.constant 0 : index
    %30 = vector.load %arg5[%c1_44, %c2_45, %c0_46] : memref<18x18x8xf32, #tpu.memory_space<vmem>>, vector<16x16x8xf32>
    %31 = vector.shape_cast %30 : vector<16x16x8xf32> to vector<256x8xf32>
    %c0_47 = arith.constant 0 : index
    %c40 = arith.constant 40 : index
    %32 = vector.load %arg6[%c0_47, %c40] : memref<256x128xf32, #tpu.memory_space<vmem>>, vector<256x8xf32>
    tpu.vector_store %arg6[%c0_47, %c40], %31 {strides = array<i32>} : memref<256x128xf32, #tpu.memory_space<vmem>>, vector<256x8xf32>,
    %c2_48 = arith.constant 2 : index
    %c0_49 = arith.constant 0 : index
    %c0_50 = arith.constant 0 : index
    %33 = vector.load %arg5[%c2_48, %c0_49, %c0_50] : memref<18x18x8xf32, #tpu.memory_space<vmem>>, vector<16x16x8xf32>
    %34 = vector.shape_cast %33 : vector<16x16x8xf32> to vector<256x8xf32>
    %c0_51 = arith.constant 0 : index
    %c48 = arith.constant 48 : index
    %35 = vector.load %arg6[%c0_51, %c48] : memref<256x128xf32, #tpu.memory_space<vmem>>, vector<256x8xf32>
    tpu.vector_store %arg6[%c0_51, %c48], %34 {strides = array<i32>} : memref<256x128xf32, #tpu.memory_space<vmem>>, vector<256x8xf32>,
    %c2_52 = arith.constant 2 : index
    %c1_53 = arith.constant 1 : index
    %c0_54 = arith.constant 0 : index
    %36 = vector.load %arg5[%c2_52, %c1_53, %c0_54] : memref<18x18x8xf32, #tpu.memory_space<vmem>>, vector<16x16x8xf32>
    %37 = vector.shape_cast %36 : vector<16x16x8xf32> to vector<256x8xf32>
    %c0_55 = arith.constant 0 : index
    %c56 = arith.constant 56 : index
    %38 = vector.load %arg6[%c0_55, %c56] : memref<256x128xf32, #tpu.memory_space<vmem>>, vector<256x8xf32>
    tpu.vector_store %arg6[%c0_55, %c56], %37 {strides = array<i32>} : memref<256x128xf32, #tpu.memory_space<vmem>>, vector<256x8xf32>,
    %c2_56 = arith.constant 2 : index
    %c2_57 = arith.constant 2 : index
    %c0_58 = arith.constant 0 : index
    %39 = vector.load %arg5[%c2_56, %c2_57, %c0_58] : memref<18x18x8xf32, #tpu.memory_space<vmem>>, vector<16x16x8xf32>
    %40 = vector.shape_cast %39 : vector<16x16x8xf32> to vector<256x8xf32>
    %c0_59 = arith.constant 0 : index
    %c64 = arith.constant 64 : index
    %41 = vector.load %arg6[%c0_59, %c64] : memref<256x128xf32, #tpu.memory_space<vmem>>, vector<256x8xf32>
    tpu.vector_store %arg6[%c0_59, %c64], %40 {strides = array<i32>} : memref<256x128xf32, #tpu.memory_space<vmem>>, vector<256x8xf32>,
    %c0_60 = arith.constant 0 : index
    %c0_61 = arith.constant 0 : index
    %42 = vector.load %arg6[%c0_60, %c0_61] : memref<256x128xf32, #tpu.memory_space<vmem>>, vector<256x128xf32>
    %c0_62 = arith.constant 0 : index
    %c0_63 = arith.constant 0 : index
    %c0_64 = arith.constant 0 : index
    %43 = vector.load %arg2[%c0_62, %c0_63, %c0_64] : memref<2x128x128xf32, #tpu.memory_space<vmem>>, vector<1x128x128xf32>
    %44 = vector.shape_cast %43 : vector<1x128x128xf32> to vector<128x128xf32>
    %cst_65 = arith.constant dense<0.000000e+00> : vector<256x128xf32>
    %45 = tpu.matmul %42, %44, %cst_65 {dimension_numbers = #tpu.dot_dimension_numbers<[1], [0], [0], [1], [0, 0, 1, 1], [], []>} : vector<256x128xf32>, vector<128x128xf32>, vector<256x128xf32> -> vector<256x128xf32>
    %c0_66 = arith.constant 0 : index
    %c0_67 = arith.constant 0 : index
    %c0_68 = arith.constant 0 : index
    %46 = vector.load %arg3[%c0_66, %c0_67, %c0_68] : memref<2x1x128xf32, #tpu.memory_space<vmem>>, vector<1x1x128xf32>
    %47 = vector.shape_cast %46 : vector<1x1x128xf32> to vector<1x128xf32>
    %48 = vector.broadcast %47 : vector<1x128xf32> to vector<256x128xf32>
    %49 = arith.addf %45, %48 : vector<256x128xf32>
    %cst_69 = arith.constant 0.000000e+00 : f32
    %50 = vector.broadcast %cst_69 : f32 to vector<256x128xf32>
    %51 = arith.maximumf %49, %50 : vector<256x128xf32>
    %52 = vector.extract_strided_slice %51 {offsets = [0, 0], sizes = [256, 8], strides = [1, 1]} : vector<256x128xf32> to vector<256x8xf32>
    %53 = vector.shape_cast %52 : vector<256x8xf32> to vector<16x16x8xf32>
    %c1_70 = arith.constant 1 : index
    %c1_71 = arith.constant 1 : index
    %c0_72 = arith.constant 0 : index
    %54 = vector.load %arg5[%c1_70, %c1_71, %c0_72] : memref<18x18x8xf32, #tpu.memory_space<vmem>>, vector<16x16x8xf32>
    tpu.vector_store %arg5[%c1_70, %c1_71, %c0_72], %53 {strides = array<i32>} : memref<18x18x8xf32, #tpu.memory_space<vmem>>, vector<16x16x8xf32>,
    %c0_73 = arith.constant 0 : index
    %c0_74 = arith.constant 0 : index
    %c0_75 = arith.constant 0 : index
    %55 = vector.load %arg5[%c0_73, %c0_74, %c0_75] : memref<18x18x8xf32, #tpu.memory_space<vmem>>, vector<16x16x8xf32>
    %56 = vector.shape_cast %55 : vector<16x16x8xf32> to vector<256x8xf32>
    %c0_76 = arith.constant 0 : index
    %c0_77 = arith.constant 0 : index
    %57 = vector.load %arg6[%c0_76, %c0_77] : memref<256x128xf32, #tpu.memory_space<vmem>>, vector<256x8xf32>
    tpu.vector_store %arg6[%c0_76, %c0_77], %56 {strides = array<i32>} : memref<256x128xf32, #tpu.memory_space<vmem>>, vector<256x8xf32>,
    %c0_78 = arith.constant 0 : index
    %c1_79 = arith.constant 1 : index
    %c0_80 = arith.constant 0 : index
    %58 = vector.load %arg5[%c0_78, %c1_79, %c0_80] : memref<18x18x8xf32, #tpu.memory_space<vmem>>, vector<16x16x8xf32>
    %59 = vector.shape_cast %58 : vector<16x16x8xf32> to vector<256x8xf32>
    %c0_81 = arith.constant 0 : index
    %c8_82 = arith.constant 8 : index
    %60 = vector.load %arg6[%c0_81, %c8_82] : memref<256x128xf32, #tpu.memory_space<vmem>>, vector<256x8xf32>
    tpu.vector_store %arg6[%c0_81, %c8_82], %59 {strides = array<i32>} : memref<256x128xf32, #tpu.memory_space<vmem>>, vector<256x8xf32>,
    %c0_83 = arith.constant 0 : index
    %c2_84 = arith.constant 2 : index
    %c0_85 = arith.constant 0 : index
    %61 = vector.load %arg5[%c0_83, %c2_84, %c0_85] : memref<18x18x8xf32, #tpu.memory_space<vmem>>, vector<16x16x8xf32>
    %62 = vector.shape_cast %61 : vector<16x16x8xf32> to vector<256x8xf32>
    %c0_86 = arith.constant 0 : index
    %c16_87 = arith.constant 16 : index
    %63 = vector.load %arg6[%c0_86, %c16_87] : memref<256x128xf32, #tpu.memory_space<vmem>>, vector<256x8xf32>
    tpu.vector_store %arg6[%c0_86, %c16_87], %62 {strides = array<i32>} : memref<256x128xf32, #tpu.memory_space<vmem>>, vector<256x8xf32>,
    %c1_88 = arith.constant 1 : index
    %c0_89 = arith.constant 0 : index
    %c0_90 = arith.constant 0 : index
    %64 = vector.load %arg5[%c1_88, %c0_89, %c0_90] : memref<18x18x8xf32, #tpu.memory_space<vmem>>, vector<16x16x8xf32>
    %65 = vector.shape_cast %64 : vector<16x16x8xf32> to vector<256x8xf32>
    %c0_91 = arith.constant 0 : index
    %c24_92 = arith.constant 24 : index
    %66 = vector.load %arg6[%c0_91, %c24_92] : memref<256x128xf32, #tpu.memory_space<vmem>>, vector<256x8xf32>
    tpu.vector_store %arg6[%c0_91, %c24_92], %65 {strides = array<i32>} : memref<256x128xf32, #tpu.memory_space<vmem>>, vector<256x8xf32>,
    %c1_93 = arith.constant 1 : index
    %c1_94 = arith.constant 1 : index
    %c0_95 = arith.constant 0 : index
    %67 = vector.load %arg5[%c1_93, %c1_94, %c0_95] : memref<18x18x8xf32, #tpu.memory_space<vmem>>, vector<16x16x8xf32>
    %68 = vector.shape_cast %67 : vector<16x16x8xf32> to vector<256x8xf32>
    %c0_96 = arith.constant 0 : index
    %c32_97 = arith.constant 32 : index
    %69 = vector.load %arg6[%c0_96, %c32_97] : memref<256x128xf32, #tpu.memory_space<vmem>>, vector<256x8xf32>
    tpu.vector_store %arg6[%c0_96, %c32_97], %68 {strides = array<i32>} : memref<256x128xf32, #tpu.memory_space<vmem>>, vector<256x8xf32>,
    %c1_98 = arith.constant 1 : index
    %c2_99 = arith.constant 2 : index
    %c0_100 = arith.constant 0 : index
    %70 = vector.load %arg5[%c1_98, %c2_99, %c0_100] : memref<18x18x8xf32, #tpu.memory_space<vmem>>, vector<16x16x8xf32>
    %71 = vector.shape_cast %70 : vector<16x16x8xf32> to vector<256x8xf32>
    %c0_101 = arith.constant 0 : index
    %c40_102 = arith.constant 40 : index
    %72 = vector.load %arg6[%c0_101, %c40_102] : memref<256x128xf32, #tpu.memory_space<vmem>>, vector<256x8xf32>
    tpu.vector_store %arg6[%c0_101, %c40_102], %71 {strides = array<i32>} : memref<256x128xf32, #tpu.memory_space<vmem>>, vector<256x8xf32>,
    %c2_103 = arith.constant 2 : index
    %c0_104 = arith.constant 0 : index
    %c0_105 = arith.constant 0 : index
    %73 = vector.load %arg5[%c2_103, %c0_104, %c0_105] : memref<18x18x8xf32, #tpu.memory_space<vmem>>, vector<16x16x8xf32>
    %74 = vector.shape_cast %73 : vector<16x16x8xf32> to vector<256x8xf32>
    %c0_106 = arith.constant 0 : index
    %c48_107 = arith.constant 48 : index
    %75 = vector.load %arg6[%c0_106, %c48_107] : memref<256x128xf32, #tpu.memory_space<vmem>>, vector<256x8xf32>
    tpu.vector_store %arg6[%c0_106, %c48_107], %74 {strides = array<i32>} : memref<256x128xf32, #tpu.memory_space<vmem>>, vector<256x8xf32>,
    %c2_108 = arith.constant 2 : index
    %c1_109 = arith.constant 1 : index
    %c0_110 = arith.constant 0 : index
    %76 = vector.load %arg5[%c2_108, %c1_109, %c0_110] : memref<18x18x8xf32, #tpu.memory_space<vmem>>, vector<16x16x8xf32>
    %77 = vector.shape_cast %76 : vector<16x16x8xf32> to vector<256x8xf32>
    %c0_111 = arith.constant 0 : index
    %c56_112 = arith.constant 56 : index
    %78 = vector.load %arg6[%c0_111, %c56_112] : memref<256x128xf32, #tpu.memory_space<vmem>>, vector<256x8xf32>
    tpu.vector_store %arg6[%c0_111, %c56_112], %77 {strides = array<i32>} : memref<256x128xf32, #tpu.memory_space<vmem>>, vector<256x8xf32>,
    %c2_113 = arith.constant 2 : index
    %c2_114 = arith.constant 2 : index
    %c0_115 = arith.constant 0 : index
    %79 = vector.load %arg5[%c2_113, %c2_114, %c0_115] : memref<18x18x8xf32, #tpu.memory_space<vmem>>, vector<16x16x8xf32>
    %80 = vector.shape_cast %79 : vector<16x16x8xf32> to vector<256x8xf32>
    %c0_116 = arith.constant 0 : index
    %c64_117 = arith.constant 64 : index
    %81 = vector.load %arg6[%c0_116, %c64_117] : memref<256x128xf32, #tpu.memory_space<vmem>>, vector<256x8xf32>
    tpu.vector_store %arg6[%c0_116, %c64_117], %80 {strides = array<i32>} : memref<256x128xf32, #tpu.memory_space<vmem>>, vector<256x8xf32>,
    %c0_118 = arith.constant 0 : index
    %c0_119 = arith.constant 0 : index
    %82 = vector.load %arg6[%c0_118, %c0_119] : memref<256x128xf32, #tpu.memory_space<vmem>>, vector<256x128xf32>
    %c1_120 = arith.constant 1 : index
    %c0_121 = arith.constant 0 : index
    %c0_122 = arith.constant 0 : index
    %83 = vector.load %arg2[%c1_120, %c0_121, %c0_122] : memref<2x128x128xf32, #tpu.memory_space<vmem>>, vector<1x128x128xf32>
    %84 = vector.shape_cast %83 : vector<1x128x128xf32> to vector<128x128xf32>
    %cst_123 = arith.constant dense<0.000000e+00> : vector<256x128xf32>
    %85 = tpu.matmul %82, %84, %cst_123 {dimension_numbers = #tpu.dot_dimension_numbers<[1], [0], [0], [1], [0, 0, 1, 1], [], []>} : vector<256x128xf32>, vector<128x128xf32>, vector<256x128xf32> -> vector<256x128xf32>
    %c1_124 = arith.constant 1 : index
    %c0_125 = arith.constant 0 : index
    %c0_126 = arith.constant 0 : index
    %86 = vector.load %arg3[%c1_124, %c0_125, %c0_126] : memref<2x1x128xf32, #tpu.memory_space<vmem>>, vector<1x1x128xf32>
    %87 = vector.shape_cast %86 : vector<1x1x128xf32> to vector<1x128xf32>
    %88 = vector.broadcast %87 : vector<1x128xf32> to vector<256x128xf32>
    %89 = arith.addf %85, %88 : vector<256x128xf32>
    %cst_127 = arith.constant 0.000000e+00 : f32
    %90 = vector.broadcast %cst_127 : f32 to vector<256x128xf32>
    %91 = arith.maximumf %89, %90 : vector<256x128xf32>
    %92 = vector.extract_strided_slice %91 {offsets = [0, 0], sizes = [256, 8], strides = [1, 1]} : vector<256x128xf32> to vector<256x8xf32>
    %93 = vector.shape_cast %92 : vector<256x8xf32> to vector<16x16x8xf32>
    %c0_128 = arith.constant 0 : index
    %c0_129 = arith.constant 0 : index
    %c0_130 = arith.constant 0 : index
    %c0_131 = arith.constant 0 : index
    %94 = vector.load %arg4[%c0_128, %c0_129, %c0_130, %c0_131] : memref<1x16x16x8xf32, #tpu.memory_space<vmem>>, vector<1x16x16x8xf32>
    %95 = vector.shape_cast %94 : vector<1x16x16x8xf32> to vector<16x16x8xf32>
    %96 = vector.shape_cast %93 : vector<16x16x8xf32> to vector<1x16x16x8xf32>
    tpu.vector_store %arg4[%c0_128, %c0_129, %c0_130, %c0_131], %96 {strides = array<i32>} : memref<1x16x16x8xf32, #tpu.memory_space<vmem>>, vector<1x16x16x8xf32>,
    return
  }
  func.func @transform_0(%arg0: i32) -> (i32, i32, i32, i32) {
    %c0_i32 = arith.constant 0 : i32
    %c0_i32_0 = arith.constant 0 : i32
    %c0_i32_1 = arith.constant 0 : i32
    %c0_i32_2 = arith.constant 0 : i32
    return %arg0, %c0_i32, %c0_i32_0, %c0_i32_1 : i32, i32, i32, i32
  }
  func.func @transform_1(%arg0: i32) -> (i32, i32, i32) {
    %c0_i32 = arith.constant 0 : i32
    %c0_i32_0 = arith.constant 0 : i32
    %c0_i32_1 = arith.constant 0 : i32
    %c0_i32_2 = arith.constant 0 : i32
    return %c0_i32, %c0_i32_0, %c0_i32_1 : i32, i32, i32
  }
  func.func @transform_2(%arg0: i32) -> (i32, i32, i32) {
    %c0_i32 = arith.constant 0 : i32
    %c0_i32_0 = arith.constant 0 : i32
    %c0_i32_1 = arith.constant 0 : i32
    %c0_i32_2 = arith.constant 0 : i32
    return %c0_i32, %c0_i32_0, %c0_i32_1 : i32, i32, i32
  }
  func.func @transform_3(%arg0: i32) -> (i32, i32, i32, i32) {
    %c0_i32 = arith.constant 0 : i32
    %c0_i32_0 = arith.constant 0 : i32
    %c0_i32_1 = arith.constant 0 : i32
    %c0_i32_2 = arith.constant 0 : i32
    return %arg0, %c0_i32, %c0_i32_0, %c0_i32_1 : i32, i32, i32, i32
  }
}

</mosaic_0001>

<bundles_post_ra>
// kernel: conv_bn_activation_forward.1
= control target key start
LH: loop header
LB: loop body
LE: loop exit
PB: predicated region body
PF: predicated region fallthrough
CT: control target
= control target key end

     0   :  { %s4641_s12 = smov 0   ;;  %s6941_s0 = inlined_call_operand.vmem [shape: f32[2,16,16,4], index: 0, kind: input, shape index: {}]   ;;  %s6942_s1 = inlined_call_operand.vmem [shape: f32[2,128,128], index: 1, kind: input, shape index: {}]   ;;  %s6943_s2 = inlined_call_operand.vmem [shape: f32[2,1,128], index: 2, kind: input, shape index: {}]   ;;  %s6944_s3 = inlined_call_operand.vmem [shape: f32[2,16,16,8], index: 3, kind: output, shape index: {}]  }
   0x1 LB: > { %s4299_s13 = sadd.s32 4294967295, %s4610_s12   ;;  %p4303_p0 = scmp.ge.s32.totalorder %s4610_s12, 1  ;;  %s4610_s12 = sphi %s4641_s12, %s13_s12  }
   0x2   : > { %p137_p1 = scmp.lt.s32.totalorder %s4610_s12, 3 }
   0x4   : > { %p138_p2 = pnand %p4303_p0, %p137_p1 }
   0x6   : > { %141 = sbr.rel (%p138_p2) target bundleno = 1659 (0x67b), region = 32 }
   0xb   : > { %vm171_vm0 = vcmask 64512   ;;  %p161_p3 = scmp.lt.s32.totalorder %s4299_s13, 1  ;;  %v4612_v0 = vmov 0.0   ;;  %vm174_vm1 = vcmask 58368   ;;  %vm181_vm2 = vcmask 57344   ;;  %s4613_s18 = smov 8  }
   0xc   : > { %172 = vst.msk [vmem:[#allocation2] sm:$0xff] %vm171_vm0, %v4612_v0  ;;  %173 = vst.msk [vmem:[#allocation2 + $0x8] sm:$0xff] %vm171_vm0, %v4612_v0  ;;  %vm312_vm3 = vcmask 1048128   ;;  %vm246_vm4 = vcmask 31744   ;;  %vm279_vm5 = vcmask 64544   ;;  %s4614_s19 = smov 16  }
   0xd   : > { %177 = vst.msk [vmem:[#allocation2 + $0x198] sm:$0xff] %vm171_vm0, %v4612_v0  ;;  %178 = vst.msk [vmem:[#allocation2 + $0x1a0] sm:$0xff] %vm171_vm0, %v4612_v0  ;;  %s7036_s13 = smov (!%p161_p3, %s4299_s13), 1  ;;  %vm569_vm6 = vcmask 130112   ;;  %s4615_s20 = smov 24   ;;  %vm762_vm7 = vcmask 195712  }
   0xe   : > { %175 = vst.msk [vmem:[#allocation2 + $0x10] sm:$0x3] %vm174_vm1, %v4612_v0  ;;  %179 = vst.msk [vmem:[#allocation2 + $0x1a8] sm:$0x3] %vm174_vm1, %v4612_v0  ;;  %s4329_s14 = sshll.u32 %s7036_s13, 8  ;;  %s4616_s21 = smov 32  }
   0xf   : > { %198 = vst.msk [vmem:[#allocation2 + $0x29] sm:$0x1] %vm181_vm2, %v4612_v0  ;;  %182 = vst.msk [vmem:[#allocation2 + $0x18] sm:$0x1] %vm181_vm2, %v4612_v0  ;;  %s4795_s17 = scalar_lea.vmem %s6941_s0, %s4329_s14  ;;  %vm955_vm8 = vcmask 261312   ;;  %s4617_s22 = smov 40  }
  0x10   : > { %183 = vst.msk [vmem:[#allocation2 + $0x30] sm:$0x1] %vm181_vm2, %v4612_v0  ;;  %184 = vst.msk [vmem:[#allocation2 + $0x48] sm:$0x1] %vm181_vm2, %v4612_v0  ;;  %v214_v1 = vld [vmem:[%s4795_s17] sm:$0xff]  ;;  %v215_v2 = vld [vmem:[%s4795_s17 + $0x8] sm:$0xff] }
  0x11   : > { %185 = vst.msk [vmem:[#allocation2 + $0x60] sm:$0x1] %vm181_vm2, %v4612_v0  ;;  %186 = vst.msk [vmem:[#allocation2 + $0x78] sm:$0x1] %vm181_vm2, %v4612_v0  ;;  %v216_v3 = vld [vmem:[%s4795_s17 + $0x10] sm:$0xff]  ;;  %v217_v4 = vld [vmem:[%s4795_s17 + $0x18] sm:$0xff] }
  0x12   : > { %187 = vst.msk [vmem:[#allocation2 + $0x90] sm:$0x1] %vm181_vm2, %v4612_v0  ;;  %188 = vst.msk [vmem:[#allocation2 + $0xa8] sm:$0x1] %vm181_vm2, %v4612_v0  ;;  %v218_v5 = vld [vmem:[%s4795_s17 + $0x20] sm:$0xff]  ;;  %v219_v6 = vld [vmem:[%s4795_s17 + $0x28] sm:$0xff] }
  0x13   : > { %189 = vst.msk [vmem:[#allocation2 + $0xc0] sm:$0x1] %vm181_vm2, %v4612_v0  ;;  %190 = vst.msk [vmem:[#allocation2 + $0xd8] sm:$0x1] %vm181_vm2, %v4612_v0  ;;  %v409_v7 = vld [vmem:[#allocation2 + $0x1] sm:$0xff]  ;;  %v220_v8 = vld [vmem:[%s4795_s17 + $0x30] sm:$0xff] }
  0x14   : > { %191 = vst.msk [vmem:[#allocation2 + $0xf0] sm:$0x1] %vm181_vm2, %v4612_v0  ;;  %192 = vst.msk [vmem:[#allocation2 + $0x108] sm:$0x1] %vm181_vm2, %v4612_v0  ;;  %v221_v9 = vld [vmem:[%s4795_s17 + $0x38] sm:$0xff]  ;;  %473 = vrot.lane.b32.xlu0 %v409_v7, %s4613_s18  ;;  %v222_v11 = vld [vmem:[%s4795_s17 + $0x40] sm:$0xff] }
  0x15   : > { %193 = vst.msk [vmem:[#allocation2 + $0x120] sm:$0x1] %vm181_vm2, %v4612_v0  ;;  %194 = vst.msk [vmem:[#allocation2 + $0x138] sm:$0x1] %vm181_vm2, %v4612_v0  ;;  %v410_v10 = vld [vmem:[#allocation2 + $0x9] sm:$0xff]  ;;  %v225_v14 = vld [vmem:[%s4795_s17 + $0x58] sm:$0xff] }
  0x16   : > { %195 = vst.msk [vmem:[#allocation2 + $0x150] sm:$0x1] %vm181_vm2, %v4612_v0  ;;  %196 = vst.msk [vmem:[#allocation2 + $0x168] sm:$0x1] %vm181_vm2, %v4612_v0  ;;  %v223_v12 = vld [vmem:[%s4795_s17 + $0x48] sm:$0xff]  ;;  %v224_v13 = vld [vmem:[%s4795_s17 + $0x50] sm:$0xff] }
  0x17   : > { %197 = vst.msk [vmem:[#allocation2 + $0x180] sm:$0x1] %vm181_vm2, %v4612_v0  ;;  %199 = vst.msk [vmem:[#allocation2 + $0x41] sm:$0x1] %vm181_vm2, %v4612_v0  ;;  %v226_v15 = vld [vmem:[%s4795_s17 + $0x60] sm:$0xff]  ;;  %v227_v16 = vld [vmem:[%s4795_s17 + $0x68] sm:$0xff] }
  0x18   : > { %200 = vst.msk [vmem:[#allocation2 + $0x59] sm:$0x1] %vm181_vm2, %v4612_v0  ;;  %201 = vst.msk [vmem:[#allocation2 + $0x71] sm:$0x1] %vm181_vm2, %v4612_v0  ;;  %v228_v17 = vld [vmem:[%s4795_s17 + $0x70] sm:$0xff]  ;;  %v229_v18 = vld [vmem:[%s4795_s17 + $0x78] sm:$0xff]  ;;  %475 = vrot.lane.b32.xlu0 %v410_v10, %s4613_s18 }
  0x19   : > { %202 = vst.msk [vmem:[#allocation2 + $0x89] sm:$0x1] %vm181_vm2, %v4612_v0  ;;  %203 = vst.msk [vmem:[#allocation2 + $0xa1] sm:$0x1] %vm181_vm2, %v4612_v0  ;;  %v230_v19 = vld [vmem:[%s4795_s17 + $0x80] sm:$0xff]  ;;  %v231_v20 = vld [vmem:[%s4795_s17 + $0x88] sm:$0xff] }
  0x1a   : > { %204 = vst.msk [vmem:[#allocation2 + $0xb9] sm:$0x1] %vm181_vm2, %v4612_v0  ;;  %205 = vst.msk [vmem:[#allocation2 + $0xd1] sm:$0x1] %vm181_vm2, %v4612_v0  ;;  %v232_v21 = vld [vmem:[%s4795_s17 + $0x90] sm:$0xff]  ;;  %v233_v22 = vld [vmem:[%s4795_s17 + $0x98] sm:$0xff] }
  0x1b   : > { %206 = vst.msk [vmem:[#allocation2 + $0xe9] sm:$0x1] %vm181_vm2, %v4612_v0  ;;  %207 = vst.msk [vmem:[#allocation2 + $0x101] sm:$0x1] %vm181_vm2, %v4612_v0  ;;  %v234_v23 = vld [vmem:[%s4795_s17 + $0xa0] sm:$0xff]  ;;  %v235_v24 = vld [vmem:[%s4795_s17 + $0xa8] sm:$0xff] }
  0x1c   : > { %208 = vst.msk [vmem:[#allocation2 + $0x119] sm:$0x1] %vm181_vm2, %v4612_v0  ;;  %209 = vst.msk [vmem:[#allocation2 + $0x131] sm:$0x1] %vm181_vm2, %v4612_v0  ;;  %v236_v25 = vld [vmem:[%s4795_s17 + $0xb0] sm:$0xff]  ;;  %v237_v26 = vld [vmem:[%s4795_s17 + $0xb8] sm:$0xff] }
  0x1d   : > { %210 = vst.msk [vmem:[#allocation2 + $0x149] sm:$0x1] %vm181_vm2, %v4612_v0  ;;  %211 = vst.msk [vmem:[#allocation2 + $0x161] sm:$0x1] %vm181_vm2, %v4612_v0  ;;  %v238_v27 = vld [vmem:[%s4795_s17 + $0xc0] sm:$0xff]  ;;  %v239_v31 = vld [vmem:[%s4795_s17 + $0xc8] sm:$0xff] }
  0x1e   : > { %212 = vst.msk [vmem:[#allocation2 + $0x179] sm:$0x1] %vm181_vm2, %v4612_v0  ;;  %213 = vst.msk [vmem:[#allocation2 + $0x191] sm:$0x1] %vm181_vm2, %v4612_v0  ;;  %v240_v33 = vld [vmem:[%s4795_s17 + $0xd0] sm:$0xff]  ;;  %v241_v36 = vld [vmem:[%s4795_s17 + $0xd8] sm:$0xff] }
  0x1f   : > { %313 = vst.msk [vmem:[#allocation3] sm:$0xff] %vm312_vm3, %v4612_v0  ;;  %314 = vst.msk [vmem:[#allocation3 + $0x8] sm:$0xff] %vm312_vm3, %v4612_v0  ;;  %v242_v37 = vld [vmem:[%s4795_s17 + $0xe0] sm:$0xff]  ;;  %v243_v38 = vld [vmem:[%s4795_s17 + $0xe8] sm:$0xff]  ;;  %vm1148_vm9 = vcmask 326912   ;;  %s4618_s23 = smov 48  }
  0x20   : > { %315 = vst.msk [vmem:[#allocation3 + $0x10] sm:$0xff] %vm312_vm3, %v4612_v0  ;;  %316 = vst.msk [vmem:[#allocation3 + $0x18] sm:$0xff] %vm312_vm3, %v4612_v0  ;;  %v345_v45 = vld [vmem:[#allocation2] sm:$0xff]  ;;  %v346_v47 = vld [vmem:[#allocation2 + $0x8] sm:$0xff]  ;;  %vm1341_vm10 = vcmask 392512   ;;  %s4619_s24 = smov 56  }
  0x21   : > { %317 = vst.msk [vmem:[#allocation3 + $0x20] sm:$0xff] %vm312_vm3, %v4612_v0  ;;  %318 = vst.msk [vmem:[#allocation3 + $0x28] sm:$0xff] %vm312_vm3, %v4612_v0  ;;  %s4620_s16 = smov 64   ;;  %vm1535_vm11 = vcmask 458112   ;;  %vm1728_vm12 = vcmask 523712   ;;  %vm1921_vm13 = vcmask 589312  }
  0x22   : > { %319 = vst.msk [vmem:[#allocation3 + $0x30] sm:$0xff] %vm312_vm3, %v4612_v0  ;;  %320 = vst.msk [vmem:[#allocation3 + $0x38] sm:$0xff] %vm312_vm3, %v4612_v0 }
  0x23   : > { %321 = vst.msk [vmem:[#allocation3 + $0x40] sm:$0xff] %vm312_vm3, %v4612_v0  ;;  %322 = vst.msk [vmem:[#allocation3 + $0x48] sm:$0xff] %vm312_vm3, %v4612_v0 }
  0x24   : > { %323 = vst.msk [vmem:[#allocation3 + $0x50] sm:$0xff] %vm312_vm3, %v4612_v0  ;;  %324 = vst.msk [vmem:[#allocation3 + $0x58] sm:$0xff] %vm312_vm3, %v4612_v0 }
  0x25   : > { %325 = vst.msk [vmem:[#allocation3 + $0x60] sm:$0xff] %vm312_vm3, %v4612_v0  ;;  %326 = vst.msk [vmem:[#allocation3 + $0x68] sm:$0xff] %vm312_vm3, %v4612_v0 }
  0x26   : > { %327 = vst.msk [vmem:[#allocation3 + $0x70] sm:$0xff] %vm312_vm3, %v4612_v0  ;;  %328 = vst.msk [vmem:[#allocation3 + $0x78] sm:$0xff] %vm312_vm3, %v4612_v0 }
  0x27   : > { %329 = vst.msk [vmem:[#allocation3 + $0x80] sm:$0xff] %vm312_vm3, %v4612_v0  ;;  %330 = vst.msk [vmem:[#allocation3 + $0x88] sm:$0xff] %vm312_vm3, %v4612_v0 }
  0x28   : > { %331 = vst.msk [vmem:[#allocation3 + $0x90] sm:$0xff] %vm312_vm3, %v4612_v0  ;;  %332 = vst.msk [vmem:[#allocation3 + $0x98] sm:$0xff] %vm312_vm3, %v4612_v0 }
  0x29   : > { %333 = vst.msk [vmem:[#allocation3 + $0xa0] sm:$0xff] %vm312_vm3, %v4612_v0  ;;  %334 = vst.msk [vmem:[#allocation3 + $0xa8] sm:$0xff] %vm312_vm3, %v4612_v0 }
  0x2a   : > { %335 = vst.msk [vmem:[#allocation3 + $0xb0] sm:$0xff] %vm312_vm3, %v4612_v0  ;;  %336 = vst.msk [vmem:[#allocation3 + $0xb8] sm:$0xff] %vm312_vm3, %v4612_v0 }
  0x2b   : > { %337 = vst.msk [vmem:[#allocation3 + $0xc0] sm:$0xff] %vm312_vm3, %v4612_v0  ;;  %338 = vst.msk [vmem:[#allocation3 + $0xc8] sm:$0xff] %vm312_vm3, %v4612_v0 }
  0x2c   : > { %339 = vst.msk [vmem:[#allocation3 + $0xd0] sm:$0xff] %vm312_vm3, %v4612_v0  ;;  %340 = vst.msk [vmem:[#allocation3 + $0xd8] sm:$0xff] %vm312_vm3, %v4612_v0 }
  0x2d   : > { %341 = vst.msk [vmem:[#allocation3 + $0xe0] sm:$0xff] %vm312_vm3, %v4612_v0  ;;  %342 = vst.msk [vmem:[#allocation3 + $0xe8] sm:$0xff] %vm312_vm3, %v4612_v0 }
  0x2e   : > { %343 = vst.msk [vmem:[#allocation3 + $0xf0] sm:$0xff] %vm312_vm3, %v4612_v0  ;;  %344 = vst.msk [vmem:[#allocation3 + $0xf8] sm:$0xff] %vm312_vm3, %v4612_v0 }
  0x2f   : > { %247 = vst.msk [vmem:[#allocation2 + $0x19] sm:$0xff] %vm246_vm4, %v214_v1  ;;  %248 = vst.msk [vmem:[#allocation2 + $0x21] sm:$0xff] %vm246_vm4, %v215_v2 }
  0x30   : > { %249 = vst.msk [vmem:[#allocation2 + $0x31] sm:$0xff] %vm246_vm4, %v216_v3  ;;  %250 = vst.msk [vmem:[#allocation2 + $0x39] sm:$0xff] %vm246_vm4, %v217_v4 }
  0x31   : > { %280 = vst.msk [vmem:[#allocation2 + $0x19] sm:$0xff] %vm279_vm5, %v4612_v0  ;;  %281 = vst.msk [vmem:[#allocation2 + $0x21] sm:$0xff] %vm279_vm5, %v4612_v0 }
  0x32   : > { %282 = vst.msk [vmem:[#allocation2 + $0x31] sm:$0xff] %vm279_vm5, %v4612_v0  ;;  %283 = vst.msk [vmem:[#allocation2 + $0x39] sm:$0xff] %vm279_vm5, %v4612_v0 }
  0x33   : > { %251 = vst.msk [vmem:[#allocation2 + $0x49] sm:$0xff] %vm246_vm4, %v218_v5  ;;  %252 = vst.msk [vmem:[#allocation2 + $0x51] sm:$0xff] %vm246_vm4, %v219_v6 }
  0x34   : > { %284 = vst.msk [vmem:[#allocation2 + $0x49] sm:$0xff] %vm279_vm5, %v4612_v0  ;;  %285 = vst.msk [vmem:[#allocation2 + $0x51] sm:$0xff] %vm279_vm5, %v4612_v0 }
  0x35   : > { %253 = vst.msk [vmem:[#allocation2 + $0x61] sm:$0xff] %vm246_vm4, %v220_v8  ;;  %254 = vst.msk [vmem:[#allocation2 + $0x69] sm:$0xff] %vm246_vm4, %v221_v9 }
  0x36   : > { %286 = vst.msk [vmem:[#allocation2 + $0x61] sm:$0xff] %vm279_vm5, %v4612_v0  ;;  %287 = vst.msk [vmem:[#allocation2 + $0x69] sm:$0xff] %vm279_vm5, %v4612_v0 }
  0x37   : > { %255 = vst.msk [vmem:[#allocation2 + $0x79] sm:$0xff] %vm246_vm4, %v222_v11  ;;  %256 = vst.msk [vmem:[#allocation2 + $0x81] sm:$0xff] %vm246_vm4, %v223_v12 }
  0x38   : > { %288 = vst.msk [vmem:[#allocation2 + $0x79] sm:$0xff] %vm279_vm5, %v4612_v0  ;;  %289 = vst.msk [vmem:[#allocation2 + $0x81] sm:$0xff] %vm279_vm5, %v4612_v0  ;;  %v4884_v28 = vld [vmem:[#allocation2 + $0x19] sm:$0xff]  ;;  %v4905_v30 = vld [vmem:[#allocation2 + $0x21] sm:$0xff] }
  0x39   : > { %257 = vst.msk [vmem:[#allocation2 + $0x91] sm:$0xff] %vm246_vm4, %v224_v13  ;;  %258 = vst.msk [vmem:[#allocation2 + $0x99] sm:$0xff] %vm246_vm4, %v225_v14  ;;  %v4886_v29 = vld [vmem:[#allocation2 + $0x31] sm:$0xff]  ;;  %477 = vrot.lane.b32.xlu1 %v4884_v28, %s4613_s18  ;;  %v4921_v34 = vld [vmem:[#allocation2 + $0x39] sm:$0xff] }
  0x3a   : > { %259 = vst.msk [vmem:[#allocation2 + $0xa9] sm:$0xff] %vm246_vm4, %v226_v15  ;;  %260 = vst.msk [vmem:[#allocation2 + $0xb1] sm:$0xff] %vm246_vm4, %v227_v16  ;;  %481 = vrot.lane.b32.xlu0 %v4886_v29, %s4613_s18  ;;  %v4966_v46 = vld [vmem:[#allocation2 + $0x18] sm:$0xff]  ;;  %v4975_v49 = vld [vmem:[#allocation2 + $0x20] sm:$0xff] }
  0x3b   : > { %290 = vst.msk [vmem:[#allocation2 + $0x91] sm:$0xff] %vm279_vm5, %v4612_v0  ;;  %291 = vst.msk [vmem:[#allocation2 + $0x99] sm:$0xff] %vm279_vm5, %v4612_v0  ;;  %v4910_v32 = vld [vmem:[#allocation2 + $0x49] sm:$0xff]  ;;  %v4932_v39 = vld [vmem:[#allocation2 + $0x51] sm:$0xff] }
  0x3c   : > { %292 = vst.msk [vmem:[#allocation2 + $0xa9] sm:$0xff] %vm279_vm5, %v4612_v0  ;;  %293 = vst.msk [vmem:[#allocation2 + $0xb1] sm:$0xff] %vm279_vm5, %v4612_v0  ;;  %v4977_v50 = vld [vmem:[#allocation2 + $0x30] sm:$0xff]  ;;  %v4985_v52 = vld [vmem:[#allocation2 + $0x38] sm:$0xff] }
  0x3d   : > { %261 = vst.msk [vmem:[#allocation2 + $0xc1] sm:$0xff] %vm246_vm4, %v228_v17  ;;  %262 = vst.msk [vmem:[#allocation2 + $0xc9] sm:$0xff] %vm246_vm4, %v229_v18  ;;  %479 = vrot.lane.b32.xlu1 %v4905_v30, %s4613_s18  ;;  %v4925_v35 = vld [vmem:[#allocation2 + $0x61] sm:$0xff]  ;;  %v4949_v41 = vld [vmem:[#allocation2 + $0x69] sm:$0xff] }
  0x3e   : > { %294 = vst.msk [vmem:[#allocation2 + $0xc1] sm:$0xff] %vm279_vm5, %v4612_v0  ;;  %295 = vst.msk [vmem:[#allocation2 + $0xc9] sm:$0xff] %vm279_vm5, %v4612_v0  ;;  %485 = vrot.lane.b32.xlu0 %v4910_v32, %s4613_s18  ;;  %v4991_v54 = vld [vmem:[#allocation2 + $0x48] sm:$0xff]  ;;  %v4993_v55 = vld [vmem:[#allocation2 + $0x50] sm:$0xff] }
  0x3f   : > { %263 = vst.msk [vmem:[#allocation2 + $0xd9] sm:$0xff] %vm246_vm4, %v230_v19  ;;  %264 = vst.msk [vmem:[#allocation2 + $0xe1] sm:$0xff] %vm246_vm4, %v231_v20  ;;  %v4939_v40 = vld [vmem:[#allocation2 + $0x79] sm:$0xff]  ;;  %v4957_v43 = vld [vmem:[#allocation2 + $0x81] sm:$0xff] }
  0x40   : > { %265 = vst.msk [vmem:[#allocation2 + $0xf1] sm:$0xff] %vm246_vm4, %v232_v21  ;;  %266 = vst.msk [vmem:[#allocation2 + $0xf9] sm:$0xff] %vm246_vm4, %v233_v22  ;;  %v5003_v57 = vld [vmem:[#allocation2 + $0x60] sm:$0xff]  ;;  %v5005_v58 = vld [vmem:[#allocation2 + $0x68] sm:$0xff] }
  0x41   : > { %296 = vst.msk [vmem:[#allocation2 + $0xd9] sm:$0xff] %vm279_vm5, %v4612_v0  ;;  %297 = vst.msk [vmem:[#allocation2 + $0xe1] sm:$0xff] %vm279_vm5, %v4612_v0  ;;  %483 = vrot.lane.b32.xlu1 %v4921_v34, %s4613_s18  ;;  %v5007_v59 = vld [vmem:[#allocation2 + $0x78] sm:$0xff]  ;;  %v5017_v60 = vld [vmem:[#allocation2 + $0x80] sm:$0xff] }
  0x42   : > { %298 = vst.msk [vmem:[#allocation2 + $0xf1] sm:$0xff] %vm279_vm5, %v4612_v0  ;;  %299 = vst.msk [vmem:[#allocation2 + $0xf9] sm:$0xff] %vm279_vm5, %v4612_v0  ;;  %489 = vrot.lane.b32.xlu0 %v4925_v35, %s4613_s18  ;;  %v4953_v42 = vld [vmem:[#allocation2 + $0x91] sm:$0xff]  ;;  %v4968_v48 = vld [vmem:[#allocation2 + $0x99] sm:$0xff] }
  0x43   : > { %267 = vst.msk [vmem:[#allocation2 + $0x109] sm:$0xff] %vm246_vm4, %v234_v23  ;;  %268 = vst.msk [vmem:[#allocation2 + $0x111] sm:$0xff] %vm246_vm4, %v235_v24  ;;  %v4961_v44 = vld [vmem:[#allocation2 + $0xa9] sm:$0xff]  ;;  %v4987_v53 = vld [vmem:[#allocation2 + $0xb1] sm:$0xff] }
  0x44   : > { %300 = vst.msk [vmem:[#allocation2 + $0x109] sm:$0xff] %vm279_vm5, %v4612_v0  ;;  %301 = vst.msk [vmem:[#allocation2 + $0x111] sm:$0xff] %vm279_vm5, %v4612_v0  ;;  %v5019_v61 = vld [vmem:[#allocation2 + $0x90] sm:$0xff]  ;;  %v5021_v62 = vld [vmem:[#allocation2 + $0x98] sm:$0xff] }
  0x45   : > { %269 = vst.msk [vmem:[#allocation2 + $0x121] sm:$0xff] %vm246_vm4, %v236_v25  ;;  %270 = vst.msk [vmem:[#allocation2 + $0x129] sm:$0xff] %vm246_vm4, %v237_v26  ;;  %487 = vrot.lane.b32.xlu1 %v4932_v39, %s4613_s18  ;;  %v4979_v51 = vld [vmem:[#allocation2 + $0xc1] sm:$0xff]  ;;  %v5031_v1 = vld [vmem:[#allocation2 + $0xb0] sm:$0xff] }
  0x46   : > { %271 = vst.msk [vmem:[#allocation2 + $0x139] sm:$0xff] %vm246_vm4, %v238_v27  ;;  %272 = vst.msk [vmem:[#allocation2 + $0x141] sm:$0xff] %vm246_vm4, %v239_v31  ;;  %493 = vrot.lane.b32.xlu0 %v4939_v40, %s4613_s18  ;;  %v5029_v63 = vld [vmem:[#allocation2 + $0xa8] sm:$0xff]  ;;  %v5033_v2 = vld [vmem:[#allocation2 + $0xc0] sm:$0xff] }
  0x47   : > { %302 = vst.msk [vmem:[#allocation2 + $0x121] sm:$0xff] %vm279_vm5, %v4612_v0  ;;  %303 = vst.msk [vmem:[#allocation2 + $0x129] sm:$0xff] %vm279_vm5, %v4612_v0  ;;  %v5041_v3 = vld [vmem:[#allocation2 + $0xc8] sm:$0xff]  ;;  %v244_v31 = vld [vmem:[%s4795_s17 + $0xf0] sm:$0xff] }
  0x48   : > { %304 = vst.msk [vmem:[#allocation2 + $0x139] sm:$0xff] %vm279_vm5, %v4612_v0  ;;  %305 = vst.msk [vmem:[#allocation2 + $0x141] sm:$0xff] %vm279_vm5, %v4612_v0  ;;  %v4997_v56 = vld [vmem:[#allocation2 + $0xd9] sm:$0xff]  ;;  %v5061_v9 = vld [vmem:[#allocation2 + $0xc9] sm:$0xff] }
  0x49   : > { %273 = vst.msk [vmem:[#allocation2 + $0x151] sm:$0xff] %vm246_vm4, %v240_v33  ;;  %274 = vst.msk [vmem:[#allocation2 + $0x159] sm:$0xff] %vm246_vm4, %v241_v36  ;;  %491 = vrot.lane.b32.xlu1 %v4949_v41, %s4613_s18  ;;  %v5043_v4 = vld [vmem:[#allocation2 + $0xd8] sm:$0xff]  ;;  %v5045_v5 = vld [vmem:[#allocation2 + $0xe0] sm:$0xff] }
  0x4a   : > { %306 = vst.msk [vmem:[#allocation2 + $0x151] sm:$0xff] %vm279_vm5, %v4612_v0  ;;  %307 = vst.msk [vmem:[#allocation2 + $0x159] sm:$0xff] %vm279_vm5, %v4612_v0  ;;  %497 = vrot.lane.b32.xlu0 %v4953_v42, %s4613_s18  ;;  %v5055_v6 = vld [vmem:[#allocation2 + $0xf0] sm:$0xff]  ;;  %v5057_v7 = vld [vmem:[#allocation2 + $0xf8] sm:$0xff] }
  0x4b   : > { %275 = vst.msk [vmem:[#allocation2 + $0x169] sm:$0xff] %vm246_vm4, %v242_v37  ;;  %276 = vst.msk [vmem:[#allocation2 + $0x171] sm:$0xff] %vm246_vm4, %v243_v38  ;;  %v5059_v8 = vld [vmem:[#allocation2 + $0x108] sm:$0xff]  ;;  %v5071_v10 = vld [vmem:[#allocation2 + $0x110] sm:$0xff] }
  0x4c   : > { %308 = vst.msk [vmem:[#allocation2 + $0x169] sm:$0xff] %vm279_vm5, %v4612_v0  ;;  %309 = vst.msk [vmem:[#allocation2 + $0x171] sm:$0xff] %vm279_vm5, %v4612_v0  ;;  %v5073_v11 = vld [vmem:[#allocation2 + $0xf1] sm:$0xff]  ;;  %v5085_v14 = vld [vmem:[#allocation2 + $0xe1] sm:$0xff] }
  0x4d   : > { %495 = vrot.lane.b32.xlu1 %v4957_v43, %s4613_s18  ;;  %377 = vst.msk [vmem:[#allocation3] sm:$0xff] %vm171_vm0, %v345_v45  ;;  %379 = vst.msk [vmem:[#allocation3 + $0x10] sm:$0xff] %vm171_vm0, %v4966_v46  ;;  %v5091_v15 = vld [vmem:[#allocation2 + $0x109] sm:$0xff]  ;;  %v5101_v18 = vld [vmem:[#allocation2 + $0xf9] sm:$0xff] }
  0x4e   : > { %501 = vrot.lane.b32.xlu0 %v4961_v44, %s4613_s18  ;;  %378 = vst.msk [vmem:[#allocation3 + $0x8] sm:$0xff] %vm171_vm0, %v346_v47  ;;  %380 = vst.msk [vmem:[#allocation3 + $0x18] sm:$0xff] %vm171_vm0, %v4975_v49  ;;  %v5077_v12 = vld [vmem:[#allocation2 + $0x120] sm:$0xff]  ;;  %v5083_v13 = vld [vmem:[#allocation2 + $0x128] sm:$0xff] }
  0x4f   : > { %381 = vst.msk [vmem:[#allocation3 + $0x20] sm:$0xff] %vm171_vm0, %v4977_v50  ;;  %382 = vst.msk [vmem:[#allocation3 + $0x28] sm:$0xff] %vm171_vm0, %v4985_v52  ;;  %v5093_v16 = vld [vmem:[#allocation2 + $0x138] sm:$0xff]  ;;  %v5099_v17 = vld [vmem:[#allocation2 + $0x140] sm:$0xff] }
  0x50   : > { %383 = vst.msk [vmem:[#allocation3 + $0x30] sm:$0xff] %vm171_vm0, %v4991_v54  ;;  %384 = vst.msk [vmem:[#allocation3 + $0x38] sm:$0xff] %vm171_vm0, %v4993_v55  ;;  %v5107_v19 = vld [vmem:[#allocation2 + $0x121] sm:$0xff]  ;;  %v5117_v22 = vld [vmem:[#allocation2 + $0x111] sm:$0xff] }
  0x51   : > { %499 = vrot.lane.b32.xlu1 %v4968_v48, %s4613_s18  ;;  %385 = vst.msk [vmem:[#allocation3 + $0x40] sm:$0xff] %vm171_vm0, %v5003_v57  ;;  %386 = vst.msk [vmem:[#allocation3 + $0x48] sm:$0xff] %vm171_vm0, %v5005_v58  ;;  %v5109_v20 = vld [vmem:[#allocation2 + $0x150] sm:$0xff]  ;;  %v5115_v21 = vld [vmem:[#allocation2 + $0x158] sm:$0xff] }
  0x52   : > { %505 = vrot.lane.b32.xlu0 %v4979_v51, %s4613_s18  ;;  %387 = vst.msk [vmem:[#allocation3 + $0x50] sm:$0xff] %vm171_vm0, %v5007_v59  ;;  %388 = vst.msk [vmem:[#allocation3 + $0x58] sm:$0xff] %vm171_vm0, %v5017_v60  ;;  %v5123_v23 = vld [vmem:[#allocation2 + $0x139] sm:$0xff]  ;;  %v5133_v26 = vld [vmem:[#allocation2 + $0x129] sm:$0xff] }
  0x53   : > { %389 = vst.msk [vmem:[#allocation3 + $0x60] sm:$0xff] %vm171_vm0, %v5019_v61  ;;  %390 = vst.msk [vmem:[#allocation3 + $0x68] sm:$0xff] %vm171_vm0, %v5021_v62  ;;  %v5125_v24 = vld [vmem:[#allocation2 + $0x168] sm:$0xff]  ;;  %v5131_v25 = vld [vmem:[#allocation2 + $0x170] sm:$0xff] }
  0x54   : > { %391 = vst.msk [vmem:[#allocation3 + $0x70] sm:$0xff] %vm171_vm0, %v5029_v63  ;;  %392 = vst.msk [vmem:[#allocation3 + $0x78] sm:$0xff] %vm171_vm0, %v5031_v1  ;;  %v5139_v27 = vld [vmem:[#allocation2 + $0x151] sm:$0xff]  ;;  %v5145_v33 = vld [vmem:[#allocation2 + $0x141] sm:$0xff] }
  0x55   : > { %393 = vst.msk [vmem:[#allocation3 + $0x80] sm:$0xff] %vm171_vm0, %v5033_v2  ;;  %503 = vrot.lane.b32.xlu1 %v4987_v53, %s4613_s18  ;;  %394 = vst.msk [vmem:[#allocation3 + $0x88] sm:$0xff] %vm171_vm0, %v5041_v3  ;;  %v5151_v36 = vld [vmem:[#allocation2 + $0x169] sm:$0xff]  ;;  %v245_v37 = vld [vmem:[%s4795_s17 + $0xf8] sm:$0xff] }
  0x56   : > { %395 = vst.msk [vmem:[#allocation3 + $0x90] sm:$0xff] %vm171_vm0, %v5043_v4  ;;  %396 = vst.msk [vmem:[#allocation3 + $0x98] sm:$0xff] %vm171_vm0, %v5045_v5  ;;  %509 = vrot.lane.b32.xlu0 %v4997_v56, %s4613_s18  ;;  %v5159_v38 = vld [vmem:[#allocation2 + $0x159] sm:$0xff]  ;;  %v602_v45 = vld [vmem:[#allocation2 + $0x2] sm:$0xff] }
  0x57   : > { %397 = vst.msk [vmem:[#allocation3 + $0xa0] sm:$0xff] %vm171_vm0, %v5055_v6  ;;  %398 = vst.msk [vmem:[#allocation3 + $0xa8] sm:$0xff] %vm171_vm0, %v5057_v7  ;;  %v5165_v47 = vld [vmem:[#allocation2 + $0x171] sm:$0xff] }
  0x58   : > { %399 = vst.msk [vmem:[#allocation3 + $0xb0] sm:$0xff] %vm171_vm0, %v5059_v8  ;;  %400 = vst.msk [vmem:[#allocation3 + $0xb8] sm:$0xff] %vm171_vm0, %v5071_v10 }
  0x59   : > { %507 = vrot.lane.b32.xlu1 %v5061_v9, %s4613_s18  ;;  %401 = vst.msk [vmem:[#allocation3 + $0xc0] sm:$0xff] %vm171_vm0, %v5077_v12  ;;  %402 = vst.msk [vmem:[#allocation3 + $0xc8] sm:$0xff] %vm171_vm0, %v5083_v13 }
  0x5a   : > { %513 = vrot.lane.b32.xlu0 %v5073_v11, %s4613_s18  ;;  %403 = vst.msk [vmem:[#allocation3 + $0xd0] sm:$0xff] %vm171_vm0, %v5093_v16  ;;  %404 = vst.msk [vmem:[#allocation3 + $0xd8] sm:$0xff] %vm171_vm0, %v5099_v17 }
  0x5b   : > { %405 = vst.msk [vmem:[#allocation3 + $0xe0] sm:$0xff] %vm171_vm0, %v5109_v20  ;;  %406 = vst.msk [vmem:[#allocation3 + $0xe8] sm:$0xff] %vm171_vm0, %v5115_v21 }
  0x5c   : > { %407 = vst.msk [vmem:[#allocation3 + $0xf0] sm:$0xff] %vm171_vm0, %v5125_v24  ;;  %408 = vst.msk [vmem:[#allocation3 + $0xf8] sm:$0xff] %vm171_vm0, %v5131_v25 }
  0x5d   : > { %511 = vrot.lane.b32.xlu1 %v5085_v14, %s4613_s18  ;;  %277 = vst.msk [vmem:[#allocation2 + $0x181] sm:$0xff] %vm246_vm4, %v244_v31  ;;  %6975 = vst [vmem:[#allocation4_spill] sm:$0xff] %v5145_v33  ;;  %v5168_v31 = vld [vmem:[#allocation2 + $0x1a] sm:$0xff] }
  0x5e   : > { %517 = vrot.lane.b32.xlu0 %v5091_v15, %s4613_s18  ;;  %310 = vst.msk [vmem:[#allocation2 + $0x181] sm:$0xff] %vm279_vm5, %v4612_v0  ;;  %6976 = vst [vmem:[#allocation5_spill] sm:$0xff] %v5151_v36 }
  0x5f   : > { %278 = vst.msk [vmem:[#allocation2 + $0x189] sm:$0xff] %vm246_vm4, %v245_v37  ;;  %6977 = vst [vmem:[#allocation6_spill] sm:$0xff] %v5159_v38  ;;  %v5174_v37 = vld [vmem:[#allocation2 + $0x32] sm:$0xff] }
  0x60   : > { %311 = vst.msk [vmem:[#allocation2 + $0x189] sm:$0xff] %vm279_vm5, %v4612_v0  ;;  %6978 = vst [vmem:[#allocation7_spill] sm:$0xff] %v5165_v47  ;;  %v603_v0 = vld [vmem:[#allocation2 + $0xa] sm:$0xff] }
  0x61   : > { %515 = vrot.lane.b32.xlu1 %v5101_v18, %s4613_s18  ;;  %6979 = vst [vmem:[#allocation8_spill] sm:$0xff] %v5168_v31  ;;  %6980 = vst [vmem:[#allocation9_spill] sm:$0xff] %v5174_v37 }
  0x62   : > { %521 = vrot.lane.b32.xlu0 %v5107_v19, %s4613_s18 }
  0x65   : > { %519 = vrot.lane.b32.xlu1 %v5117_v22, %s4613_s18 }
  0x66   : > { %525 = vrot.lane.b32.xlu0 %v5123_v23, %s4613_s18 }
  0x69   : > { %523 = vrot.lane.b32.xlu1 %v5133_v26, %s4613_s18 }
  0x6a   : > { %529 = vrot.lane.b32.xlu0 %v5139_v27, %s4613_s18 }
  0x6d   : > { %527 = vrot.lane.b32.xlu1 %v5145_v33, %s4613_s18 }
  0x6e   : > { %533 = vrot.lane.b32.xlu0 %v5151_v36, %s4613_s18  ;;  %v5177_v36 = vld [vmem:[#allocation2 + $0x22] sm:$0xff] }
  0x6f   : > { %6981 = vst [vmem:[#allocation10_spill] sm:$0xff] %v5177_v36 }
  0x71   : > { %531 = vrot.lane.b32.xlu1 %v5159_v38, %s4613_s18  ;;  %v5181_v38 = vld [vmem:[#allocation2 + $0x4a] sm:$0xff] }
  0x72   : > { %666 = vrot.lane.b32.xlu0 %v602_v45, %s4614_s19  ;;  %6982 = vst [vmem:[#allocation11_spill] sm:$0xff] %v5181_v38  ;;  %v5185_v45 = vld [vmem:[#allocation2 + $0x3a] sm:$0xff] }
  0x73   : > { %6983 = vst [vmem:[#allocation12_spill] sm:$0xff] %v5185_v45 }
  0x75   : > { %535 = vrot.lane.b32.xlu1 %v5165_v47, %s4613_s18 }
  0x76   : > { %670 = vrot.lane.b32.xlu0 %v5168_v31, %s4614_s19  ;;  %v5189_v31 = vld [vmem:[#allocation2 + $0x62] sm:$0xff] }
  0x77   : > { %6984 = vst [vmem:[#allocation13_spill] sm:$0xff] %v5189_v31 }
  0x79   : > { %668 = vrot.lane.b32.xlu1 %v603_v0, %s4614_s19  ;;  %v5193_v0 = vld [vmem:[#allocation2 + $0x52] sm:$0xff] }
  0x7a   : > { %674 = vrot.lane.b32.xlu0 %v5174_v37, %s4614_s19  ;;  %6985 = vst [vmem:[#allocation14_spill] sm:$0xff] %v5193_v0  ;;  %v5197_v37 = vld [vmem:[#allocation2 + $0x7a] sm:$0xff] }
  0x7b   : > { %6986 = vst [vmem:[#allocation15_spill] sm:$0xff] %v5197_v37 }
  0x7d   : > { %672 = vrot.lane.b32.xlu1 %v5177_v36, %s4614_s19  ;;  %v5201_v36 = vld [vmem:[#allocation2 + $0x6a] sm:$0xff] }
  0x7e   : > { %678 = vrot.lane.b32.xlu0 %v5181_v38, %s4614_s19  ;;  %6987 = vst [vmem:[#allocation16_spill] sm:$0xff] %v5201_v36  ;;  %v5205_v38 = vld [vmem:[#allocation2 + $0x92] sm:$0xff] }
  0x7f   : > { %6988 = vst [vmem:[#allocation17_spill] sm:$0xff] %v5205_v38 }
  0x81   : > { %676 = vrot.lane.b32.xlu1 %v5185_v45, %s4614_s19  ;;  %v5209_v45 = vld [vmem:[#allocation2 + $0x82] sm:$0xff] }
  0x82   : > { %682 = vrot.lane.b32.xlu0 %v5189_v31, %s4614_s19  ;;  %6989 = vst [vmem:[#allocation18_spill] sm:$0xff] %v5209_v45  ;;  %v5213_v31 = vld [vmem:[#allocation2 + $0xaa] sm:$0xff] }
  0x83   : > { %6990 = vst [vmem:[#allocation19_spill] sm:$0xff] %v5213_v31 }
  0x85   : > { %680 = vrot.lane.b32.xlu1 %v5193_v0, %s4614_s19  ;;  %v5217_v0 = vld [vmem:[#allocation2 + $0x9a] sm:$0xff] }
  0x86   : > { %686 = vrot.lane.b32.xlu0 %v5197_v37, %s4614_s19  ;;  %6991 = vst [vmem:[#allocation20_spill] sm:$0xff] %v5217_v0  ;;  %v5221_v37 = vld [vmem:[#allocation2 + $0xc2] sm:$0xff]  ;;  %v474_v47 = vpop.permute.xlu0 %473 }
  0x87   : > { %6992 = vst [vmem:[#allocation21_spill] sm:$0xff] %v5221_v37  ;;  %570 = vst.msk [vmem:[#allocation3] sm:$0xff] %vm569_vm6, %v474_v47  ;;  %v5279_v47 = vld [vmem:[#allocation2 + $0x16a] sm:$0xff] }
  0x89   : > { %684 = vrot.lane.b32.xlu1 %v5201_v36, %s4614_s19  ;;  %v5225_v36 = vld [vmem:[#allocation2 + $0xb2] sm:$0xff] }
  0x8a   : > { %690 = vrot.lane.b32.xlu0 %v5205_v38, %s4614_s19  ;;  %6993 = vst [vmem:[#allocation22_spill] sm:$0xff] %v5225_v36  ;;  %v5229_v38 = vld [vmem:[#allocation2 + $0xda] sm:$0xff] }
  0x8b   : > { %6994 = vst [vmem:[#allocation23_spill] sm:$0xff] %v5229_v38 }
  0x8d   : > { %688 = vrot.lane.b32.xlu1 %v5209_v45, %s4614_s19  ;;  %v5233_v45 = vld [vmem:[#allocation2 + $0xca] sm:$0xff] }
  0x8e   : > { %694 = vrot.lane.b32.xlu0 %v5213_v31, %s4614_s19  ;;  %6995 = vst [vmem:[#allocation24_spill] sm:$0xff] %v5233_v45  ;;  %v5237_v31 = vld [vmem:[#allocation2 + $0xf2] sm:$0xff] }
  0x8f   : > { %6996 = vst [vmem:[#allocation25_spill] sm:$0xff] %v5237_v31 }
  0x91   : > { %692 = vrot.lane.b32.xlu1 %v5217_v0, %s4614_s19  ;;  %v5241_v0 = vld [vmem:[#allocation2 + $0xe2] sm:$0xff] }
  0x92   : > { %698 = vrot.lane.b32.xlu0 %v5221_v37, %s4614_s19  ;;  %6997 = vst [vmem:[#allocation26_spill] sm:$0xff] %v5241_v0  ;;  %v5245_v37 = vld [vmem:[#allocation2 + $0x10a] sm:$0xff] }
  0x93   : > { %6998 = vst [vmem:[#allocation27_spill] sm:$0xff] %v5245_v37 }
  0x95   : > { %696 = vrot.lane.b32.xlu1 %v5225_v36, %s4614_s19  ;;  %v5249_v36 = vld [vmem:[#allocation2 + $0xfa] sm:$0xff] }
  0x96   : > { %702 = vrot.lane.b32.xlu0 %v5229_v38, %s4614_s19  ;;  %6999 = vst [vmem:[#allocation28_spill] sm:$0xff] %v5249_v36  ;;  %v5253_v38 = vld [vmem:[#allocation2 + $0x122] sm:$0xff] }
  0x97   : > { %7000 = vst [vmem:[#allocation29_spill] sm:$0xff] %v5253_v38 }
  0x99   : > { %700 = vrot.lane.b32.xlu1 %v5233_v45, %s4614_s19  ;;  %v5257_v45 = vld [vmem:[#allocation2 + $0x112] sm:$0xff] }
  0x9a   : > { %706 = vrot.lane.b32.xlu0 %v5237_v31, %s4614_s19  ;;  %7001 = vst [vmem:[#allocation30_spill] sm:$0xff] %v5257_v45  ;;  %v5261_v31 = vld [vmem:[#allocation2 + $0x13a] sm:$0xff] }
  0x9b   : > { %7002 = vst [vmem:[#allocation31_spill] sm:$0xff] %v5261_v31 }
  0x9d   : > { %704 = vrot.lane.b32.xlu1 %v5241_v0, %s4614_s19  ;;  %v476_v0 = vpop.permute.xlu0 %475 }
  0x9e   : > { %710 = vrot.lane.b32.xlu0 %v5245_v37, %s4614_s19  ;;  %v5266_v37 = vld [vmem:[#allocation2 + $0x12a] sm:$0xff]  ;;  %571 = vst.msk [vmem:[#allocation3 + $0x8] sm:$0xff] %vm569_vm6, %v476_v0 }
  0xa1   : > { %708 = vrot.lane.b32.xlu1 %v5249_v36, %s4614_s19  ;;  %v5270_v36 = vld [vmem:[#allocation2 + $0x152] sm:$0xff] }
  0xa2   : > { %714 = vrot.lane.b32.xlu0 %v5253_v38, %s4614_s19  ;;  %7003 = vst [vmem:[#allocation32_spill] sm:$0xff] %v5270_v36  ;;  %v5275_v38 = vld [vmem:[#allocation2 + $0x142] sm:$0xff] }
  0xa3   : > { %7004 = vst [vmem:[#allocation33_spill] sm:$0xff] %v5275_v38 }
  0xa5   : > { %712 = vrot.lane.b32.xlu1 %v5257_v45, %s4614_s19 }
  0xa6   : > { %718 = vrot.lane.b32.xlu0 %v5261_v31, %s4614_s19  ;;  %v5285_v31 = vld [vmem:[#allocation2 + $0x15a] sm:$0xff] }
  0xa9   : > { %716 = vrot.lane.b32.xlu1 %v5266_v37, %s4614_s19 }
  0xaa   : > { %722 = vrot.lane.b32.xlu0 %v5270_v36, %s4614_s19 }
  0xab   : > { %v478_v45 = vpop.permute.xlu1 %477 }
  0xac   : > { %572 = vst.msk [vmem:[#allocation3 + $0x10] sm:$0xff] %vm569_vm6, %v478_v45  ;;  %v482_v33 = vpop.permute.xlu0 %481  ;;  %v5293_v45 = vld [vmem:[#allocation2 + $0x172] sm:$0xff] }
  0xad   : > { %720 = vrot.lane.b32.xlu1 %v5275_v38, %s4614_s19  ;;  %574 = vst.msk [vmem:[#allocation3 + $0x20] sm:$0xff] %vm569_vm6, %v482_v33 }
  0xae   : > { %726 = vrot.lane.b32.xlu0 %v5279_v47, %s4614_s19 }
  0xaf   : > { %v480_v0 = vpop.permute.xlu1 %479 }
  0xb0   : > { %573 = vst.msk [vmem:[#allocation3 + $0x18] sm:$0xff] %vm569_vm6, %v480_v0  ;;  %v486_v36 = vpop.permute.xlu0 %485 }
  0xb1   : > { %724 = vrot.lane.b32.xlu1 %v5285_v31, %s4614_s19  ;;  %576 = vst.msk [vmem:[#allocation3 + $0x30] sm:$0xff] %vm569_vm6, %v486_v36 }
  0xb2   : > { %859 = vrot.lane.b32.xlu0 %v4966_v46, %s4615_s20 }
  0xb3   : > { %v484_v33 = vpop.permute.xlu1 %483 }
  0xb4   : > { %575 = vst.msk [vmem:[#allocation3 + $0x28] sm:$0xff] %vm569_vm6, %v484_v33  ;;  %v490_v38 = vpop.permute.xlu0 %489 }
  0xb5   : > { %728 = vrot.lane.b32.xlu1 %v5293_v45, %s4614_s19  ;;  %578 = vst.msk [vmem:[#allocation3 + $0x40] sm:$0xff] %vm569_vm6, %v490_v38 }
  0xb6   : > { %863 = vrot.lane.b32.xlu0 %v4977_v50, %s4615_s20 }
  0xb7   : > { %v488_v0 = vpop.permute.xlu1 %487 }
  0xb8   : > { %577 = vst.msk [vmem:[#allocation3 + $0x38] sm:$0xff] %vm569_vm6, %v488_v0  ;;  %v494_v36 = vpop.permute.xlu0 %493 }
  0xb9   : > { %861 = vrot.lane.b32.xlu1 %v4975_v49, %s4615_s20  ;;  %580 = vst.msk [vmem:[#allocation3 + $0x50] sm:$0xff] %vm569_vm6, %v494_v36 }
  0xba   : > { %867 = vrot.lane.b32.xlu0 %v4991_v54, %s4615_s20 }
  0xbb   : > { %v492_v46 = vpop.permute.xlu1 %491 }
  0xbc   : > { %579 = vst.msk [vmem:[#allocation3 + $0x48] sm:$0xff] %vm569_vm6, %v492_v46  ;;  %v498_v33 = vpop.permute.xlu0 %497 }
  0xbd   : > { %865 = vrot.lane.b32.xlu1 %v4985_v52, %s4615_s20  ;;  %582 = vst.msk [vmem:[#allocation3 + $0x60] sm:$0xff] %vm569_vm6, %v498_v33 }
  0xbe   : > { %871 = vrot.lane.b32.xlu0 %v5003_v57, %s4615_s20 }
  0xbf   : > { %v496_v38 = vpop.permute.xlu1 %495 }
  0xc0   : > { %581 = vst.msk [vmem:[#allocation3 + $0x58] sm:$0xff] %vm569_vm6, %v496_v38  ;;  %v502_v49 = vpop.permute.xlu0 %501 }
  0xc1   : > { %869 = vrot.lane.b32.xlu1 %v4993_v55, %s4615_s20  ;;  %584 = vst.msk [vmem:[#allocation3 + $0x70] sm:$0xff] %vm569_vm6, %v502_v49 }
  0xc2   : > { %875 = vrot.lane.b32.xlu0 %v5007_v59, %s4615_s20 }
  0xc3   : > { %v500_v0 = vpop.permute.xlu1 %499 }
  0xc4   : > { %583 = vst.msk [vmem:[#allocation3 + $0x68] sm:$0xff] %vm569_vm6, %v500_v0  ;;  %v506_v36 = vpop.permute.xlu0 %505 }
  0xc5   : > { %873 = vrot.lane.b32.xlu1 %v5005_v58, %s4615_s20  ;;  %586 = vst.msk [vmem:[#allocation3 + $0x80] sm:$0xff] %vm569_vm6, %v506_v36 }
  0xc6   : > { %879 = vrot.lane.b32.xlu0 %v5019_v61, %s4615_s20 }
  0xc7   : > { %v504_v46 = vpop.permute.xlu1 %503 }
  0xc8   : > { %585 = vst.msk [vmem:[#allocation3 + $0x78] sm:$0xff] %vm569_vm6, %v504_v46  ;;  %v510_v33 = vpop.permute.xlu0 %509 }
  0xc9   : > { %877 = vrot.lane.b32.xlu1 %v5017_v60, %s4615_s20  ;;  %588 = vst.msk [vmem:[#allocation3 + $0x90] sm:$0xff] %vm569_vm6, %v510_v33 }
  0xca   : > { %883 = vrot.lane.b32.xlu0 %v5029_v63, %s4615_s20 }
  0xcb   : > { %v508_v38 = vpop.permute.xlu1 %507 }
  0xcc   : > { %587 = vst.msk [vmem:[#allocation3 + $0x88] sm:$0xff] %vm569_vm6, %v508_v38  ;;  %v514_v49 = vpop.permute.xlu0 %513 }
  0xcd   : > { %881 = vrot.lane.b32.xlu1 %v5021_v62, %s4615_s20  ;;  %590 = vst.msk [vmem:[#allocation3 + $0xa0] sm:$0xff] %vm569_vm6, %v514_v49 }
  0xce   : > { %887 = vrot.lane.b32.xlu0 %v5033_v2, %s4615_s20 }
  0xcf   : > { %v512_v0 = vpop.permute.xlu1 %511 }
  0xd0   : > { %589 = vst.msk [vmem:[#allocation3 + $0x98] sm:$0xff] %vm569_vm6, %v512_v0  ;;  %v518_v36 = vpop.permute.xlu0 %517 }
  0xd1   : > { %885 = vrot.lane.b32.xlu1 %v5031_v1, %s4615_s20  ;;  %592 = vst.msk [vmem:[#allocation3 + $0xb0] sm:$0xff] %vm569_vm6, %v518_v36 }
  0xd2   : > { %891 = vrot.lane.b32.xlu0 %v5043_v4, %s4615_s20 }
  0xd3   : > { %v516_v46 = vpop.permute.xlu1 %515 }
  0xd4   : > { %591 = vst.msk [vmem:[#allocation3 + $0xa8] sm:$0xff] %vm569_vm6, %v516_v46  ;;  %v522_v33 = vpop.permute.xlu0 %521 }
  0xd5   : > { %889 = vrot.lane.b32.xlu1 %v5041_v3, %s4615_s20  ;;  %594 = vst.msk [vmem:[#allocation3 + $0xc0] sm:$0xff] %vm569_vm6, %v522_v33 }
  0xd6   : > { %895 = vrot.lane.b32.xlu0 %v5055_v6, %s4615_s20 }
  0xd7   : > { %v520_v38 = vpop.permute.xlu1 %519 }
  0xd8   : > { %593 = vst.msk [vmem:[#allocation3 + $0xb8] sm:$0xff] %vm569_vm6, %v520_v38  ;;  %v526_v49 = vpop.permute.xlu0 %525 }
  0xd9   : > { %893 = vrot.lane.b32.xlu1 %v5045_v5, %s4615_s20  ;;  %596 = vst.msk [vmem:[#allocation3 + $0xd0] sm:$0xff] %vm569_vm6, %v526_v49 }
  0xda   : > { %899 = vrot.lane.b32.xlu0 %v5059_v8, %s4615_s20 }
  0xdb   : > { %v524_v0 = vpop.permute.xlu1 %523 }
  0xdc   : > { %595 = vst.msk [vmem:[#allocation3 + $0xc8] sm:$0xff] %vm569_vm6, %v524_v0  ;;  %v530_v36 = vpop.permute.xlu0 %529 }
  0xdd   : > { %897 = vrot.lane.b32.xlu1 %v5057_v7, %s4615_s20  ;;  %598 = vst.msk [vmem:[#allocation3 + $0xe0] sm:$0xff] %vm569_vm6, %v530_v36 }
  0xde   : > { %903 = vrot.lane.b32.xlu0 %v5077_v12, %s4615_s20 }
  0xdf   : > { %v528_v46 = vpop.permute.xlu1 %527 }
  0xe0   : > { %597 = vst.msk [vmem:[#allocation3 + $0xd8] sm:$0xff] %vm569_vm6, %v528_v46  ;;  %v534_v33 = vpop.permute.xlu0 %533 }
  0xe1   : > { %901 = vrot.lane.b32.xlu1 %v5071_v10, %s4615_s20  ;;  %600 = vst.msk [vmem:[#allocation3 + $0xf0] sm:$0xff] %vm569_vm6, %v534_v33  ;;  %v5381_v33 = vld [vmem:[#allocation2 + $0x180] sm:$0xff] }
  0xe2   : > { %907 = vrot.lane.b32.xlu0 %v5093_v16, %s4615_s20 }
  0xe3   : > { %v532_v38 = vpop.permute.xlu1 %531 }
  0xe4   : > { %599 = vst.msk [vmem:[#allocation3 + $0xe8] sm:$0xff] %vm569_vm6, %v532_v38  ;;  %v667_v49 = vpop.permute.xlu0 %666 }
  0xe5   : > { %905 = vrot.lane.b32.xlu1 %v5083_v13, %s4615_s20  ;;  %763 = vst.msk [vmem:[#allocation3] sm:$0xff] %vm762_vm7, %v667_v49 }
  0xe6   : > { %911 = vrot.lane.b32.xlu0 %v5109_v20, %s4615_s20 }
  0xe7   : > { %v536_v0 = vpop.permute.xlu1 %535 }
  0xe8   : > { %601 = vst.msk [vmem:[#allocation3 + $0xf8] sm:$0xff] %vm569_vm6, %v536_v0  ;;  %v671_v36 = vpop.permute.xlu0 %670 }
  0xe9   : > { %909 = vrot.lane.b32.xlu1 %v5099_v17, %s4615_s20  ;;  %765 = vst.msk [vmem:[#allocation3 + $0x10] sm:$0xff] %vm762_vm7, %v671_v36  ;;  %v5393_v36 = vld [vmem:[#allocation2 + $0x188] sm:$0xff] }
  0xea   : > { %915 = vrot.lane.b32.xlu0 %v5125_v24, %s4615_s20 }
  0xeb   : > { %v669_v46 = vpop.permute.xlu1 %668 }
  0xec   : > { %764 = vst.msk [vmem:[#allocation3 + $0x8] sm:$0xff] %vm762_vm7, %v669_v46  ;;  %v675_v38 = vpop.permute.xlu0 %674 }
  0xed   : > { %913 = vrot.lane.b32.xlu1 %v5115_v21, %s4615_s20  ;;  %767 = vst.msk [vmem:[#allocation3 + $0x20] sm:$0xff] %vm762_vm7, %v675_v38 }
  0xee   : > { %919 = vrot.lane.b32.xlu0 %v5381_v33, %s4615_s20 }
  0xef   : > { %v673_v49 = vpop.permute.xlu1 %672 }
  0xf0   : > { %766 = vst.msk [vmem:[#allocation3 + $0x18] sm:$0xff] %vm762_vm7, %v673_v49  ;;  %v679_v0 = vpop.permute.xlu0 %678 }
  0xf1   : > { %917 = vrot.lane.b32.xlu1 %v5131_v25, %s4615_s20  ;;  %769 = vst.msk [vmem:[#allocation3 + $0x30] sm:$0xff] %vm762_vm7, %v679_v0 }
  0xf2   : > { %1052 = vrot.lane.b32.xlu0 %v4884_v28, %s4616_s21 }
  0xf3   : > { %v677_v46 = vpop.permute.xlu1 %676 }
  0xf4   : > { %768 = vst.msk [vmem:[#allocation3 + $0x28] sm:$0xff] %vm762_vm7, %v677_v46  ;;  %v683_v38 = vpop.permute.xlu0 %682 }
  0xf5   : > { %921 = vrot.lane.b32.xlu1 %v5393_v36, %s4615_s20  ;;  %771 = vst.msk [vmem:[#allocation3 + $0x40] sm:$0xff] %vm762_vm7, %v683_v38  ;;  %v7005_v38 = vld [vmem:[#allocation4_spill] sm:$0xff] }
  0xf6   : > { %1056 = vrot.lane.b32.xlu0 %v4886_v29, %s4616_s21 }
  0xf7   : > { %v681_v49 = vpop.permute.xlu1 %680 }
  0xf8   : > { %770 = vst.msk [vmem:[#allocation3 + $0x38] sm:$0xff] %vm762_vm7, %v681_v49  ;;  %v687_v0 = vpop.permute.xlu0 %686 }
  0xf9   : > { %1054 = vrot.lane.b32.xlu1 %v4905_v30, %s4616_s21  ;;  %773 = vst.msk [vmem:[#allocation3 + $0x50] sm:$0xff] %vm762_vm7, %v687_v0  ;;  %v5481_v0 = vld [vmem:[#allocation2 + $0x181] sm:$0xff] }
  0xfa   : > { %1060 = vrot.lane.b32.xlu0 %v4910_v32, %s4616_s21 }
  0xfb   : > { %v685_v28 = vpop.permute.xlu1 %684 }
  0xfc   : > { %772 = vst.msk [vmem:[#allocation3 + $0x48] sm:$0xff] %vm762_vm7, %v685_v28  ;;  %v691_v46 = vpop.permute.xlu0 %690 }
  0xfd   : > { %1058 = vrot.lane.b32.xlu1 %v4921_v34, %s4616_s21  ;;  %775 = vst.msk [vmem:[#allocation3 + $0x60] sm:$0xff] %vm762_vm7, %v691_v46 }
  0xfe   : > { %1064 = vrot.lane.b32.xlu0 %v4925_v35, %s4616_s21 }
  0xff   : > { %v689_v29 = vpop.permute.xlu1 %688 }
 0x100   : > { %774 = vst.msk [vmem:[#allocation3 + $0x58] sm:$0xff] %vm762_vm7, %v689_v29  ;;  %v695_v30 = vpop.permute.xlu0 %694  ;;  %v7008_v29 = vld [vmem:[#allocation7_spill] sm:$0xff] }
 0x101   : > { %1062 = vrot.lane.b32.xlu1 %v4932_v39, %s4616_s21  ;;  %777 = vst.msk [vmem:[#allocation3 + $0x70] sm:$0xff] %vm762_vm7, %v695_v30  ;;  %v5493_v30 = vld [vmem:[#allocation2 + $0x189] sm:$0xff] }
 0x102   : > { %1068 = vrot.lane.b32.xlu0 %v4939_v40, %s4616_s21 }
 0x103   : > { %v693_v32 = vpop.permute.xlu1 %692 }
 0x104   : > { %776 = vst.msk [vmem:[#allocation3 + $0x68] sm:$0xff] %vm762_vm7, %v693_v32  ;;  %v699_v34 = vpop.permute.xlu0 %698  ;;  %v7009_v32 = vld [vmem:[#allocation8_spill] sm:$0xff] }
 0x105   : > { %1066 = vrot.lane.b32.xlu1 %v4949_v41, %s4616_s21  ;;  %779 = vst.msk [vmem:[#allocation3 + $0x80] sm:$0xff] %vm762_vm7, %v699_v34 }
 0x106   : > { %1072 = vrot.lane.b32.xlu0 %v4953_v42, %s4616_s21 }
 0x107   : > { %v697_v35 = vpop.permute.xlu1 %696 }
 0x108   : > { %778 = vst.msk [vmem:[#allocation3 + $0x78] sm:$0xff] %vm762_vm7, %v697_v35  ;;  %v703_v39 = vpop.permute.xlu0 %702 }
 0x109   : > { %1070 = vrot.lane.b32.xlu1 %v4957_v43, %s4616_s21  ;;  %781 = vst.msk [vmem:[#allocation3 + $0x90] sm:$0xff] %vm762_vm7, %v703_v39  ;;  %v7010_v39 = vld [vmem:[#allocation9_spill] sm:$0xff] }
 0x10a   : > { %1076 = vrot.lane.b32.xlu0 %v4961_v44, %s4616_s21 }
 0x10b   : > { %v701_v40 = vpop.permute.xlu1 %700 }
 0x10c   : > { %780 = vst.msk [vmem:[#allocation3 + $0x88] sm:$0xff] %vm762_vm7, %v701_v40  ;;  %v707_v41 = vpop.permute.xlu0 %706 }
 0x10d   : > { %1074 = vrot.lane.b32.xlu1 %v4968_v48, %s4616_s21  ;;  %783 = vst.msk [vmem:[#allocation3 + $0xa0] sm:$0xff] %vm762_vm7, %v707_v41 }
 0x10e   : > { %1080 = vrot.lane.b32.xlu0 %v4979_v51, %s4616_s21 }
 0x10f   : > { %v705_v42 = vpop.permute.xlu1 %704 }
 0x110   : > { %782 = vst.msk [vmem:[#allocation3 + $0x98] sm:$0xff] %vm762_vm7, %v705_v42  ;;  %v711_v43 = vpop.permute.xlu0 %710  ;;  %v7011_v42 = vld [vmem:[#allocation10_spill] sm:$0xff] }
 0x111   : > { %1078 = vrot.lane.b32.xlu1 %v4987_v53, %s4616_s21  ;;  %785 = vst.msk [vmem:[#allocation3 + $0xb0] sm:$0xff] %vm762_vm7, %v711_v43  ;;  %v7012_v43 = vld [vmem:[#allocation11_spill] sm:$0xff] }
 0x112   : > { %1084 = vrot.lane.b32.xlu0 %v4997_v56, %s4616_s21 }
 0x113   : > { %v709_v44 = vpop.permute.xlu1 %708 }
 0x114   : > { %784 = vst.msk [vmem:[#allocation3 + $0xa8] sm:$0xff] %vm762_vm7, %v709_v44  ;;  %v715_v48 = vpop.permute.xlu0 %714 }
 0x115   : > { %1082 = vrot.lane.b32.xlu1 %v5061_v9, %s4616_s21  ;;  %787 = vst.msk [vmem:[#allocation3 + $0xc0] sm:$0xff] %vm762_vm7, %v715_v48 }
 0x116   : > { %1088 = vrot.lane.b32.xlu0 %v5073_v11, %s4616_s21 }
 0x117   : > { %v713_v51 = vpop.permute.xlu1 %712 }
 0x118   : > { %786 = vst.msk [vmem:[#allocation3 + $0xb8] sm:$0xff] %vm762_vm7, %v713_v51  ;;  %v719_v53 = vpop.permute.xlu0 %718  ;;  %v7013_v51 = vld [vmem:[#allocation12_spill] sm:$0xff] }
 0x119   : > { %1086 = vrot.lane.b32.xlu1 %v5085_v14, %s4616_s21  ;;  %789 = vst.msk [vmem:[#allocation3 + $0xd0] sm:$0xff] %vm762_vm7, %v719_v53  ;;  %v7014_v53 = vld [vmem:[#allocation13_spill] sm:$0xff] }
 0x11a   : > { %1092 = vrot.lane.b32.xlu0 %v5091_v15, %s4616_s21 }
 0x11b   : > { %v717_v56 = vpop.permute.xlu1 %716 }
 0x11c   : > { %788 = vst.msk [vmem:[#allocation3 + $0xc8] sm:$0xff] %vm762_vm7, %v717_v56  ;;  %v723_v9 = vpop.permute.xlu0 %722 }
 0x11d   : > { %1090 = vrot.lane.b32.xlu1 %v5101_v18, %s4616_s21  ;;  %791 = vst.msk [vmem:[#allocation3 + $0xe0] sm:$0xff] %vm762_vm7, %v723_v9 }
 0x11e   : > { %1096 = vrot.lane.b32.xlu0 %v5107_v19, %s4616_s21 }
 0x11f   : > { %v721_v11 = vpop.permute.xlu1 %720 }
 0x120   : > { %790 = vst.msk [vmem:[#allocation3 + $0xd8] sm:$0xff] %vm762_vm7, %v721_v11  ;;  %v727_v14 = vpop.permute.xlu0 %726  ;;  %v7015_v11 = vld [vmem:[#allocation14_spill] sm:$0xff] }
 0x121   : > { %1094 = vrot.lane.b32.xlu1 %v5117_v22, %s4616_s21  ;;  %793 = vst.msk [vmem:[#allocation3 + $0xf0] sm:$0xff] %vm762_vm7, %v727_v14  ;;  %v7016_v14 = vld [vmem:[#allocation15_spill] sm:$0xff] }
 0x122   : > { %1100 = vrot.lane.b32.xlu0 %v5123_v23, %s4616_s21  ;;  %v7006_v23 = vld [vmem:[#allocation5_spill] sm:$0xff] }
 0x123   : > { %v725_v15 = vpop.permute.xlu1 %724 }
 0x124   : > { %792 = vst.msk [vmem:[#allocation3 + $0xe8] sm:$0xff] %vm762_vm7, %v725_v15  ;;  %v860_v18 = vpop.permute.xlu0 %859 }
 0x125   : > { %1098 = vrot.lane.b32.xlu1 %v5133_v26, %s4616_s21  ;;  %956 = vst.msk [vmem:[#allocation3] sm:$0xff] %vm955_vm8, %v860_v18 }
 0x126   : > { %1104 = vrot.lane.b32.xlu0 %v5139_v27, %s4616_s21  ;;  %v7007_v27 = vld [vmem:[#allocation6_spill] sm:$0xff] }
 0x127   : > { %v729_v19 = vpop.permute.xlu1 %728 }
 0x128   : > { %794 = vst.msk [vmem:[#allocation3 + $0xf8] sm:$0xff] %vm762_vm7, %v729_v19  ;;  %v864_v22 = vpop.permute.xlu0 %863  ;;  %v7017_v19 = vld [vmem:[#allocation16_spill] sm:$0xff] }
 0x129   : > { %1102 = vrot.lane.b32.xlu1 %v7005_v38, %s4616_s21  ;;  %958 = vst.msk [vmem:[#allocation3 + $0x10] sm:$0xff] %vm955_vm8, %v864_v22  ;;  %v7018_v22 = vld [vmem:[#allocation17_spill] sm:$0xff] }
 0x12a   : > { %1108 = vrot.lane.b32.xlu0 %v7006_v23, %s4616_s21 }
 0x12b   : > { %v862_v49 = vpop.permute.xlu1 %861 }
 0x12c   : > { %957 = vst.msk [vmem:[#allocation3 + $0x8] sm:$0xff] %vm955_vm8, %v862_v49  ;;  %v868_v26 = vpop.permute.xlu0 %867  ;;  %v7019_v49 = vld [vmem:[#allocation18_spill] sm:$0xff] }
 0x12d   : > { %1106 = vrot.lane.b32.xlu1 %v7007_v27, %s4616_s21  ;;  %960 = vst.msk [vmem:[#allocation3 + $0x20] sm:$0xff] %vm955_vm8, %v868_v26  ;;  %v7020_v26 = vld [vmem:[#allocation19_spill] sm:$0xff] }
 0x12e   : > { %1112 = vrot.lane.b32.xlu0 %v5481_v0, %s4616_s21 }
 0x12f   : > { %v866_v28 = vpop.permute.xlu1 %865 }
 0x130   : > { %959 = vst.msk [vmem:[#allocation3 + $0x18] sm:$0xff] %vm955_vm8, %v866_v28  ;;  %v872_v46 = vpop.permute.xlu0 %871 }
 0x131   : > { %1110 = vrot.lane.b32.xlu1 %v7008_v29, %s4616_s21  ;;  %962 = vst.msk [vmem:[#allocation3 + $0x30] sm:$0xff] %vm955_vm8, %v872_v46  ;;  %v7021_v46 = vld [vmem:[#allocation20_spill] sm:$0xff]  ;;  %v7022_v29 = vld [vmem:[#allocation21_spill] sm:$0xff] }
 0x132   : > { %1245 = vrot.lane.b32.xlu0 %v7009_v32, %s4617_s22 }
 0x133   : > { %v870_v34 = vpop.permute.xlu1 %869 }
 0x134   : > { %961 = vst.msk [vmem:[#allocation3 + $0x28] sm:$0xff] %vm955_vm8, %v870_v34  ;;  %v876_v35 = vpop.permute.xlu0 %875 }
 0x135   : > { %1114 = vrot.lane.b32.xlu1 %v5493_v30, %s4616_s21  ;;  %964 = vst.msk [vmem:[#allocation3 + $0x40] sm:$0xff] %vm955_vm8, %v876_v35  ;;  %v7023_v35 = vld [vmem:[#allocation22_spill] sm:$0xff] }
 0x136   : > { %1249 = vrot.lane.b32.xlu0 %v7010_v39, %s4617_s22  ;;  %v7024_v39 = vld [vmem:[#allocation23_spill] sm:$0xff] }
 0x137   : > { %v874_v40 = vpop.permute.xlu1 %873 }
 0x138   : > { %963 = vst.msk [vmem:[#allocation3 + $0x38] sm:$0xff] %vm955_vm8, %v874_v40  ;;  %v880_v41 = vpop.permute.xlu0 %879 }
 0x139   : > { %1247 = vrot.lane.b32.xlu1 %v7011_v42, %s4617_s22  ;;  %966 = vst.msk [vmem:[#allocation3 + $0x50] sm:$0xff] %vm955_vm8, %v880_v41  ;;  %v7025_v42 = vld [vmem:[#allocation24_spill] sm:$0xff] }
 0x13a   : > { %1253 = vrot.lane.b32.xlu0 %v7012_v43, %s4617_s22  ;;  %v7026_v43 = vld [vmem:[#allocation25_spill] sm:$0xff] }
 0x13b   : > { %v878_v44 = vpop.permute.xlu1 %877 }
 0x13c   : > { %965 = vst.msk [vmem:[#allocation3 + $0x48] sm:$0xff] %vm955_vm8, %v878_v44  ;;  %v884_v48 = vpop.permute.xlu0 %883 }
 0x13d   : > { %1251 = vrot.lane.b32.xlu1 %v7013_v51, %s4617_s22  ;;  %968 = vst.msk [vmem:[#allocation3 + $0x60] sm:$0xff] %vm955_vm8, %v884_v48  ;;  %v7027_v51 = vld [vmem:[#allocation26_spill] sm:$0xff] }
 0x13e   : > { %1257 = vrot.lane.b32.xlu0 %v7014_v53, %s4617_s22  ;;  %v7028_v53 = vld [vmem:[#allocation27_spill] sm:$0xff] }
 0x13f   : > { %v882_v56 = vpop.permute.xlu1 %881 }
 0x140   : > { %967 = vst.msk [vmem:[#allocation3 + $0x58] sm:$0xff] %vm955_vm8, %v882_v56  ;;  %v888_v9 = vpop.permute.xlu0 %887 }
 0x141   : > { %1255 = vrot.lane.b32.xlu1 %v7015_v11, %s4617_s22  ;;  %970 = vst.msk [vmem:[#allocation3 + $0x70] sm:$0xff] %vm955_vm8, %v888_v9  ;;  %v7029_v11 = vld [vmem:[#allocation28_spill] sm:$0xff] }
 0x142   : > { %1261 = vrot.lane.b32.xlu0 %v7016_v14, %s4617_s22  ;;  %v7030_v14 = vld [vmem:[#allocation29_spill] sm:$0xff] }
 0x143   : > { %v886_v15 = vpop.permute.xlu1 %885 }
 0x144   : > { %969 = vst.msk [vmem:[#allocation3 + $0x68] sm:$0xff] %vm955_vm8, %v886_v15  ;;  %v892_v18 = vpop.permute.xlu0 %891 }
 0x145   : > { %1259 = vrot.lane.b32.xlu1 %v7017_v19, %s4617_s22  ;;  %972 = vst.msk [vmem:[#allocation3 + $0x80] sm:$0xff] %vm955_vm8, %v892_v18  ;;  %v7031_v19 = vld [vmem:[#allocation30_spill] sm:$0xff] }
 0x146   : > { %1265 = vrot.lane.b32.xlu0 %v7018_v22, %s4617_s22  ;;  %v7032_v22 = vld [vmem:[#allocation31_spill] sm:$0xff] }
 0x147   : > { %v890_v38 = vpop.permute.xlu1 %889 }
 0x148   : > { %971 = vst.msk [vmem:[#allocation3 + $0x78] sm:$0xff] %vm955_vm8, %v890_v38  ;;  %v896_v23 = vpop.permute.xlu0 %895 }
 0x149   : > { %1263 = vrot.lane.b32.xlu1 %v7019_v49, %s4617_s22  ;;  %974 = vst.msk [vmem:[#allocation3 + $0x90] sm:$0xff] %vm955_vm8, %v896_v23  ;;  %v7033_v49 = vld [vmem:[#allocation32_spill] sm:$0xff] }
 0x14a   : > { %1269 = vrot.lane.b32.xlu0 %v7020_v26, %s4617_s22 }
 0x14b   : > { %v894_v27 = vpop.permute.xlu1 %893 }
 0x14c   : > { %973 = vst.msk [vmem:[#allocation3 + $0x88] sm:$0xff] %vm955_vm8, %v894_v27  ;;  %v900_v28 = vpop.permute.xlu0 %899 }
 0x14d   : > { %1267 = vrot.lane.b32.xlu1 %v7021_v46, %s4617_s22  ;;  %976 = vst.msk [vmem:[#allocation3 + $0xa0] sm:$0xff] %vm955_vm8, %v900_v28  ;;  %v7034_v28 = vld [vmem:[#allocation33_spill] sm:$0xff] }
 0x14e   : > { %1273 = vrot.lane.b32.xlu0 %v7022_v29, %s4617_s22  ;;  %v5581_v29 = vld [vmem:[#allocation2 + $0x182] sm:$0xff] }
 0x14f   : > { %v898_v32 = vpop.permute.xlu1 %897 }
 0x150   : > { %975 = vst.msk [vmem:[#allocation3 + $0x98] sm:$0xff] %vm955_vm8, %v898_v32  ;;  %v904_v34 = vpop.permute.xlu0 %903 }
 0x151   : > { %1271 = vrot.lane.b32.xlu1 %v7023_v35, %s4617_s22  ;;  %978 = vst.msk [vmem:[#allocation3 + $0xb0] sm:$0xff] %vm955_vm8, %v904_v34 }
 0x152   : > { %1277 = vrot.lane.b32.xlu0 %v7024_v39, %s4617_s22 }
 0x153   : > { %v902_v40 = vpop.permute.xlu1 %901 }
 0x154   : > { %977 = vst.msk [vmem:[#allocation3 + $0xa8] sm:$0xff] %vm955_vm8, %v902_v40  ;;  %v908_v41 = vpop.permute.xlu0 %907 }
 0x155   : > { %1275 = vrot.lane.b32.xlu1 %v7025_v42, %s4617_s22  ;;  %980 = vst.msk [vmem:[#allocation3 + $0xc0] sm:$0xff] %vm955_vm8, %v908_v41  ;;  %v1405_v41 = vld [vmem:[#allocation2 + $0x198] sm:$0xff] }
 0x156   : > { %1281 = vrot.lane.b32.xlu0 %v7026_v43, %s4617_s22  ;;  %v1568_v42 = vld [vmem:[#allocation2 + $0x31] sm:$0xff] }
 0x157   : > { %v906_v44 = vpop.permute.xlu1 %905 }
 0x158   : > { %979 = vst.msk [vmem:[#allocation3 + $0xb8] sm:$0xff] %vm955_vm8, %v906_v44  ;;  %v912_v48 = vpop.permute.xlu0 %911 }
 0x159   : > { %1279 = vrot.lane.b32.xlu1 %v7027_v51, %s4617_s22  ;;  %982 = vst.msk [vmem:[#allocation3 + $0xd0] sm:$0xff] %vm955_vm8, %v912_v48  ;;  %v2001_v48 = vld [vmem:[%s6942_s1 + $0x78] sm:$0xff]  ;;  %v2000_v51 = vld [vmem:[%s6942_s1 + $0x70] sm:$0xff] }
 0x15a   : > { %1285 = vrot.lane.b32.xlu0 %v7028_v53, %s4617_s22  ;;  %4427 = vmatprep.subr.mxu0 %v2001_v48 }
 0x15b   : > { %v910_v56 = vpop.permute.xlu1 %909  ;;  %4428 = vmatpush3.msra.mxu0 %v2001_v48  ;;  %v1767_v48 = vld [vmem:[#allocation2 + $0x7a] sm:$0xff] }
 0x15c   : > { %981 = vst.msk [vmem:[#allocation3 + $0xc8] sm:$0xff] %vm955_vm8, %v910_v56  ;;  %v916_v9 = vpop.permute.xlu0 %915  ;;  %v1572_v56 = vld [vmem:[#allocation2 + $0x61] sm:$0xff]  ;;  %4429 = vmatprep.subr.mxu0 %v2000_v51 }
 0x15d   : > { %1283 = vrot.lane.b32.xlu1 %v7029_v11, %s4617_s22  ;;  %984 = vst.msk [vmem:[#allocation3 + $0xe0] sm:$0xff] %vm955_vm8, %v916_v9  ;;  %4430 = vmatpush3.msra.mxu0 %v2000_v51  ;;  %v1999_v11 = vld [vmem:[%s6942_s1 + $0x68] sm:$0xff] }
 0x15e   : > { %1289 = vrot.lane.b32.xlu0 %v7030_v14, %s4617_s22  ;;  %v1998_v14 = vld [vmem:[%s6942_s1 + $0x60] sm:$0xff]  ;;  %4431 = vmatprep.subr.mxu0 %v1999_v11 }
 0x15f   : > { %v914_v15 = vpop.permute.xlu1 %913  ;;  %4432 = vmatpush3.msra.mxu0 %v1999_v11  ;;  %v1772_v11 = vld [vmem:[#allocation2 + $0xb2] sm:$0xff] }
 0x160   : > { %983 = vst.msk [vmem:[#allocation3 + $0xd8] sm:$0xff] %vm955_vm8, %v914_v15  ;;  %v920_v18 = vpop.permute.xlu0 %919  ;;  %v1571_v15 = vld [vmem:[#allocation2 + $0x51] sm:$0xff]  ;;  %4433 = vmatprep.subr.mxu0 %v1998_v14 }
 0x161   : > { %1287 = vrot.lane.b32.xlu1 %v7031_v19, %s4617_s22  ;;  %986 = vst.msk [vmem:[#allocation3 + $0xf0] sm:$0xff] %vm955_vm8, %v920_v18  ;;  %v1574_v19 = vld [vmem:[#allocation2 + $0x79] sm:$0xff]  ;;  %4434 = vmatpush3.msra.mxu0 %v1998_v14 }
 0x162   : > { %1293 = vrot.lane.b32.xlu0 %v7032_v22, %s4617_s22 }
 0x163   : > { %v918_v38 = vpop.permute.xlu1 %917 }
 0x164   : > { %985 = vst.msk [vmem:[#allocation3 + $0xe8] sm:$0xff] %vm955_vm8, %v918_v38  ;;  %v1053_v23 = vpop.permute.xlu0 %1052  ;;  %v1997_v38 = vld [vmem:[%s6942_s1 + $0x58] sm:$0xff] }
 0x165   : > { %1291 = vrot.lane.b32.xlu1 %v5266_v37, %s4617_s22  ;;  %1149 = vst.msk [vmem:[#allocation3] sm:$0xff] %vm1148_vm9, %v1053_v23  ;;  %v1996_v23 = vld [vmem:[%s6942_s1 + $0x50] sm:$0xff]  ;;  %4435 = vmatprep.subr.mxu0 %v1997_v38 }
 0x166   : > { %1297 = vrot.lane.b32.xlu0 %v7033_v49, %s4617_s22  ;;  %v1573_v49 = vld [vmem:[#allocation2 + $0x69] sm:$0xff]  ;;  %4436 = vmatpush3.msra.mxu0 %v1997_v38 }
 0x167   : > { %v922_v26 = vpop.permute.xlu1 %921  ;;  %4437 = vmatprep.subr.mxu0 %v1996_v23  ;;  %v1773_v38 = vld [vmem:[#allocation2 + $0xc2] sm:$0xff] }
 0x168   : > { %987 = vst.msk [vmem:[#allocation3 + $0xf8] sm:$0xff] %vm955_vm8, %v922_v26  ;;  %v1057_v27 = vpop.permute.xlu0 %1056  ;;  %4438 = vmatpush3.msra.mxu0 %v1996_v23 }
 0x169   : > { %1295 = vrot.lane.b32.xlu1 %v7034_v28, %s4617_s22  ;;  %1151 = vst.msk [vmem:[#allocation3 + $0x10] sm:$0xff] %vm1148_vm9, %v1057_v27  ;;  %v1576_v27 = vld [vmem:[#allocation2 + $0x91] sm:$0xff] }
 0x16a   : > { %1301 = vrot.lane.b32.xlu0 %v5279_v47, %s4617_s22  ;;  %v5593_v47 = vld [vmem:[#allocation2 + $0x18a] sm:$0xff] }
 0x16b   : > { %v1055_v46 = vpop.permute.xlu1 %1054 }
 0x16c   : > { %1150 = vst.msk [vmem:[#allocation3 + $0x8] sm:$0xff] %vm1148_vm9, %v1055_v46  ;;  %v1061_v37 = vpop.permute.xlu0 %1060  ;;  %v1995_v46 = vld [vmem:[%s6942_s1 + $0x48] sm:$0xff] }
 0x16d   : > { %1299 = vrot.lane.b32.xlu1 %v5285_v31, %s4617_s22  ;;  %1153 = vst.msk [vmem:[#allocation3 + $0x20] sm:$0xff] %vm1148_vm9, %v1061_v37  ;;  %v1994_v37 = vld [vmem:[%s6942_s1 + $0x40] sm:$0xff]  ;;  %4439 = vmatprep.subr.mxu0 %v1995_v46 }
 0x16e   : > { %1305 = vrot.lane.b32.xlu0 %v5581_v29, %s4617_s22  ;;  %4440 = vmatpush3.msra.mxu0 %v1995_v46  ;;  %v1777_v46 = vld [vmem:[#allocation2 + $0xf2] sm:$0xff] }
 0x16f   : > { %v1059_v32 = vpop.permute.xlu1 %1058  ;;  %4441 = vmatprep.subr.mxu0 %v1994_v37 }
 0x170   : > { %1152 = vst.msk [vmem:[#allocation3 + $0x18] sm:$0xff] %vm1148_vm9, %v1059_v32  ;;  %v1065_v34 = vpop.permute.xlu0 %1064  ;;  %v1575_v32 = vld [vmem:[#allocation2 + $0x81] sm:$0xff]  ;;  %4442 = vmatpush3.msra.mxu0 %v1994_v37 }
 0x171   : > { %1303 = vrot.lane.b32.xlu1 %v5293_v45, %s4617_s22  ;;  %1155 = vst.msk [vmem:[#allocation3 + $0x30] sm:$0xff] %vm1148_vm9, %v1065_v34 }
 0x172   : > { %1439 = vrot.lane.b32.xlu0 %v4977_v50, %s4618_s23 }
 0x173   : > { %v1063_v31 = vpop.permute.xlu1 %1062 }
 0x174   : > { %1154 = vst.msk [vmem:[#allocation3 + $0x28] sm:$0xff] %vm1148_vm9, %v1063_v31  ;;  %v1069_v35 = vpop.permute.xlu0 %1068  ;;  %v1578_v31 = vld [vmem:[#allocation2 + $0xa9] sm:$0xff] }
 0x175   : > { %1307 = vrot.lane.b32.xlu1 %v5593_v47, %s4617_s22  ;;  %1157 = vst.msk [vmem:[#allocation3 + $0x40] sm:$0xff] %vm1148_vm9, %v1069_v35 }
 0x176   : > { %1443 = vrot.lane.b32.xlu0 %v4991_v54, %s4618_s23 }
 0x177   : > { %v1067_v45 = vpop.permute.xlu1 %1066 }
 0x178   : > { %1156 = vst.msk [vmem:[#allocation3 + $0x38] sm:$0xff] %vm1148_vm9, %v1067_v45  ;;  %v1073_v39 = vpop.permute.xlu0 %1072  ;;  %v1993_v45 = vld [vmem:[%s6942_s1 + $0x38] sm:$0xff] }
 0x179   : > { %1441 = vrot.lane.b32.xlu1 %v4985_v52, %s4618_s23  ;;  %1159 = vst.msk [vmem:[#allocation3 + $0x50] sm:$0xff] %vm1148_vm9, %v1073_v39  ;;  %v1992_v39 = vld [vmem:[%s6942_s1 + $0x30] sm:$0xff]  ;;  %4443 = vmatprep.subr.mxu0 %v1993_v45 }
 0x17a   : > { %1447 = vrot.lane.b32.xlu0 %v5003_v57, %s4618_s23  ;;  %4444 = vmatpush3.msra.mxu0 %v1993_v45  ;;  %v1778_v45 = vld [vmem:[#allocation2 + $0xfa] sm:$0xff] }
 0x17b   : > { %v1071_v50 = vpop.permute.xlu1 %1070  ;;  %4445 = vmatprep.subr.mxu0 %v1992_v39 }
 0x17c   : > { %1158 = vst.msk [vmem:[#allocation3 + $0x48] sm:$0xff] %vm1148_vm9, %v1071_v50  ;;  %v1077_v40 = vpop.permute.xlu0 %1076  ;;  %v1577_v50 = vld [vmem:[#allocation2 + $0x99] sm:$0xff]  ;;  %4446 = vmatpush3.msra.mxu0 %v1992_v39 }
 0x17d   : > { %1445 = vrot.lane.b32.xlu1 %v4993_v55, %s4618_s23  ;;  %1161 = vst.msk [vmem:[#allocation3 + $0x60] sm:$0xff] %vm1148_vm9, %v1077_v40 }
 0x17e   : > { %1451 = vrot.lane.b32.xlu0 %v5007_v59, %s4618_s23 }
 0x17f   : > { %v1075_v54 = vpop.permute.xlu1 %1074 }
 0x180   : > { %1160 = vst.msk [vmem:[#allocation3 + $0x58] sm:$0xff] %vm1148_vm9, %v1075_v54  ;;  %v1081_v52 = vpop.permute.xlu0 %1080  ;;  %v1580_v54 = vld [vmem:[#allocation2 + $0xc1] sm:$0xff] }
 0x181   : > { %1449 = vrot.lane.b32.xlu1 %v5005_v58, %s4618_s23  ;;  %1163 = vst.msk [vmem:[#allocation3 + $0x70] sm:$0xff] %vm1148_vm9, %v1081_v52 }
 0x182   : > { %1455 = vrot.lane.b32.xlu0 %v5019_v61, %s4618_s23 }
 0x183   : > { %v1079_v57 = vpop.permute.xlu1 %1078 }
 0x184   : > { %1162 = vst.msk [vmem:[#allocation3 + $0x68] sm:$0xff] %vm1148_vm9, %v1079_v57  ;;  %v1085_v55 = vpop.permute.xlu0 %1084  ;;  %v1991_v57 = vld [vmem:[%s6942_s1 + $0x28] sm:$0xff] }
 0x185   : > { %1453 = vrot.lane.b32.xlu1 %v5017_v60, %s4618_s23  ;;  %1165 = vst.msk [vmem:[#allocation3 + $0x80] sm:$0xff] %vm1148_vm9, %v1085_v55  ;;  %v1990_v55 = vld [vmem:[%s6942_s1 + $0x20] sm:$0xff]  ;;  %4447 = vmatprep.subr.mxu0 %v1991_v57 }
 0x186   : > { %1459 = vrot.lane.b32.xlu0 %v5029_v63, %s4618_s23  ;;  %4448 = vmatpush3.msra.mxu0 %v1991_v57  ;;  %v1588_v57 = vld [vmem:[#allocation2 + $0x121] sm:$0xff] }
 0x187   : > { %v1083_v59 = vpop.permute.xlu1 %1082  ;;  %4449 = vmatprep.subr.mxu0 %v1990_v55 }
 0x188   : > { %1164 = vst.msk [vmem:[#allocation3 + $0x78] sm:$0xff] %vm1148_vm9, %v1083_v59  ;;  %v1089_v58 = vpop.permute.xlu0 %1088  ;;  %v1579_v59 = vld [vmem:[#allocation2 + $0xb1] sm:$0xff]  ;;  %4450 = vmatpush3.msra.mxu0 %v1990_v55 }
 0x189   : > { %1457 = vrot.lane.b32.xlu1 %v5021_v62, %s4618_s23  ;;  %1167 = vst.msk [vmem:[#allocation3 + $0x90] sm:$0xff] %vm1148_vm9, %v1089_v58 }
 0x18a   : > { %1463 = vrot.lane.b32.xlu0 %v5033_v2, %s4618_s23 }
 0x18b   : > { %v1087_v61 = vpop.permute.xlu1 %1086 }
 0x18c   : > { %1166 = vst.msk [vmem:[#allocation3 + $0x88] sm:$0xff] %vm1148_vm9, %v1087_v61  ;;  %v1093_v60 = vpop.permute.xlu0 %1092  ;;  %v1582_v61 = vld [vmem:[#allocation2 + $0xd9] sm:$0xff] }
 0x18d   : > { %1461 = vrot.lane.b32.xlu1 %v5031_v1, %s4618_s23  ;;  %1169 = vst.msk [vmem:[#allocation3 + $0xa0] sm:$0xff] %vm1148_vm9, %v1093_v60 }
 0x18e   : > { %1467 = vrot.lane.b32.xlu0 %v5043_v4, %s4618_s23 }
 0x18f   : > { %v1091_v63 = vpop.permute.xlu1 %1090 }
 0x190   : > { %1168 = vst.msk [vmem:[#allocation3 + $0x98] sm:$0xff] %vm1148_vm9, %v1091_v63  ;;  %v1097_v62 = vpop.permute.xlu0 %1096  ;;  %v1989_v63 = vld [vmem:[%s6942_s1 + $0x18] sm:$0xff] }
 0x191   : > { %1465 = vrot.lane.b32.xlu1 %v5041_v3, %s4618_s23  ;;  %1171 = vst.msk [vmem:[#allocation3 + $0xb0] sm:$0xff] %vm1148_vm9, %v1097_v62  ;;  %v1988_v62 = vld [vmem:[%s6942_s1 + $0x10] sm:$0xff]  ;;  %4451 = vmatprep.subr.mxu0 %v1989_v63 }
 0x192   : > { %1471 = vrot.lane.b32.xlu0 %v5055_v6, %s4618_s23  ;;  %4452 = vmatpush3.msra.mxu0 %v1989_v63  ;;  %v1589_v63 = vld [vmem:[#allocation2 + $0x129] sm:$0xff] }
 0x193   : > { %v1095_v2 = vpop.permute.xlu1 %1094  ;;  %4453 = vmatprep.subr.mxu0 %v1988_v62 }
 0x194   : > { %1170 = vst.msk [vmem:[#allocation3 + $0xa8] sm:$0xff] %vm1148_vm9, %v1095_v2  ;;  %v1101_v1 = vpop.permute.xlu0 %1100  ;;  %v1581_v2 = vld [vmem:[#allocation2 + $0xc9] sm:$0xff]  ;;  %4454 = vmatpush3.msra.mxu0 %v1988_v62 }
 0x195   : > { %1469 = vrot.lane.b32.xlu1 %v5045_v5, %s4618_s23  ;;  %1173 = vst.msk [vmem:[#allocation3 + $0xc0] sm:$0xff] %vm1148_vm9, %v1101_v1 }
 0x196   : > { %1475 = vrot.lane.b32.xlu0 %v5059_v8, %s4618_s23 }
 0x197   : > { %v1099_v4 = vpop.permute.xlu1 %1098 }
 0x198   : > { %1172 = vst.msk [vmem:[#allocation3 + $0xb8] sm:$0xff] %vm1148_vm9, %v1099_v4  ;;  %v1105_v3 = vpop.permute.xlu0 %1104  ;;  %v1584_v4 = vld [vmem:[#allocation2 + $0xf1] sm:$0xff] }
 0x199   : > { %1473 = vrot.lane.b32.xlu1 %v5057_v7, %s4618_s23  ;;  %1175 = vst.msk [vmem:[#allocation3 + $0xd0] sm:$0xff] %vm1148_vm9, %v1105_v3 }
 0x19a   : > { %1479 = vrot.lane.b32.xlu0 %v5077_v12, %s4618_s23 }
 0x19b   : > { %v1103_v6 = vpop.permute.xlu1 %1102 }
 0x19c   : > { %1174 = vst.msk [vmem:[#allocation3 + $0xc8] sm:$0xff] %vm1148_vm9, %v1103_v6  ;;  %v1109_v5 = vpop.permute.xlu0 %1108  ;;  %v1987_v6 = vld [vmem:[%s6942_s1 + $0x8] sm:$0xff] }
 0x19d   : > { %1477 = vrot.lane.b32.xlu1 %v5071_v10, %s4618_s23  ;;  %1177 = vst.msk [vmem:[#allocation3 + $0xe0] sm:$0xff] %vm1148_vm9, %v1109_v5  ;;  %v1986_v5 = vld [vmem:[%s6942_s1] sm:$0xff]  ;;  %4455 = vmatprep.subr.mxu0 %v1987_v6 }
 0x19e   : > { %1483 = vrot.lane.b32.xlu0 %v5093_v16, %s4618_s23  ;;  %4456 = vmatpush3.msra.mxu0 %v1987_v6  ;;  %v1783_v6 = vld [vmem:[#allocation2 + $0x13a] sm:$0xff] }
 0x19f   : > { %v1107_v8 = vpop.permute.xlu1 %1106  ;;  %4457 = vmatprep.subr.mxu0 %v1986_v5 }
 0x1a0   : > { %1176 = vst.msk [vmem:[#allocation3 + $0xd8] sm:$0xff] %vm1148_vm9, %v1107_v8  ;;  %v1113_v7 = vpop.permute.xlu0 %1112  ;;  %v1583_v8 = vld [vmem:[#allocation2 + $0xe1] sm:$0xff]  ;;  %4458 = vmatpush3.msra.mxu0 %v1986_v5 }
 0x1a1   : > { %1481 = vrot.lane.b32.xlu1 %v5083_v13, %s4618_s23  ;;  %1179 = vst.msk [vmem:[#allocation3 + $0xf0] sm:$0xff] %vm1148_vm9, %v1113_v7 }
 0x1a2   : > { %1487 = vrot.lane.b32.xlu0 %v5109_v20, %s4618_s23 }
 0x1a3   : > { %v1111_v12 = vpop.permute.xlu1 %1110 }
 0x1a4   : > { %1178 = vst.msk [vmem:[#allocation3 + $0xe8] sm:$0xff] %vm1148_vm9, %v1111_v12  ;;  %v1246_v10 = vpop.permute.xlu0 %1245  ;;  %v1762_v12 = vld [vmem:[#allocation2 + $0x3a] sm:$0xff] }
 0x1a5   : > { %1485 = vrot.lane.b32.xlu1 %v5099_v17, %s4618_s23  ;;  %1342 = vst.msk [vmem:[#allocation3] sm:$0xff] %vm1341_vm10, %v1246_v10 }
 0x1a6   : > { %1491 = vrot.lane.b32.xlu0 %v5125_v24, %s4618_s23 }
 0x1a7   : > { %v1115_v16 = vpop.permute.xlu1 %1114 }
 0x1a8   : > { %1180 = vst.msk [vmem:[#allocation3 + $0xf8] sm:$0xff] %vm1148_vm9, %v1115_v16  ;;  %v1250_v13 = vpop.permute.xlu0 %1249  ;;  %v1761_v16 = vld [vmem:[#allocation2 + $0x32] sm:$0xff] }
 0x1a9   : > { %1489 = vrot.lane.b32.xlu1 %v5115_v21, %s4618_s23  ;;  %1344 = vst.msk [vmem:[#allocation3 + $0x10] sm:$0xff] %vm1341_vm10, %v1250_v13 }
 0x1aa   : > { %1495 = vrot.lane.b32.xlu0 %v5381_v33, %s4618_s23  ;;  %v1406_v33 = vld [vmem:[#allocation2 + $0x1a0] sm:$0xff] }
 0x1ab   : > { %v1248_v20 = vpop.permute.xlu1 %1247 }
 0x1ac   : > { %1343 = vst.msk [vmem:[#allocation3 + $0x8] sm:$0xff] %vm1341_vm10, %v1248_v20  ;;  %v1254_v17 = vpop.permute.xlu0 %1253  ;;  %v1764_v20 = vld [vmem:[#allocation2 + $0x52] sm:$0xff] }
 0x1ad   : > { %1493 = vrot.lane.b32.xlu1 %v5131_v25, %s4618_s23  ;;  %1346 = vst.msk [vmem:[#allocation3 + $0x20] sm:$0xff] %vm1341_vm10, %v1254_v17  ;;  %v1570_v25 = vld [vmem:[#allocation2 + $0x49] sm:$0xff] }
 0x1ae   : > { %1499 = vrot.lane.b32.xlu0 %v1405_v41, %s4618_s23  ;;  %v1763_v17 = vld [vmem:[#allocation2 + $0x4a] sm:$0xff] }
 0x1af   : > { %v1252_v24 = vpop.permute.xlu1 %1251 }
 0x1b0   : > { %1345 = vst.msk [vmem:[#allocation3 + $0x18] sm:$0xff] %vm1341_vm10, %v1252_v24  ;;  %v1258_v21 = vpop.permute.xlu0 %1257 }
 0x1b1   : > { %1497 = vrot.lane.b32.xlu1 %v5393_v36, %s4618_s23  ;;  %1348 = vst.msk [vmem:[#allocation3 + $0x30] sm:$0xff] %vm1341_vm10, %v1258_v21  ;;  %v1569_v36 = vld [vmem:[#allocation2 + $0x39] sm:$0xff] }
 0x1b2   : > { %1632 = vrot.lane.b32.xlu0 %v1568_v42, %s4619_s24  ;;  %v1766_v42 = vld [vmem:[#allocation2 + $0x6a] sm:$0xff] }
 0x1b3   : > { %v1256_v43 = vpop.permute.xlu1 %1255 }
 0x1b4   : > { %1347 = vst.msk [vmem:[#allocation3 + $0x28] sm:$0xff] %vm1341_vm10, %v1256_v43  ;;  %v1262_v44 = vpop.permute.xlu0 %1261 }
 0x1b5   : > { %1501 = vrot.lane.b32.xlu1 %v1406_v33, %s4618_s23  ;;  %1350 = vst.msk [vmem:[#allocation3 + $0x40] sm:$0xff] %vm1341_vm10, %v1262_v44  ;;  %v1765_v33 = vld [vmem:[#allocation2 + $0x62] sm:$0xff] }
 0x1b6   : > { %1636 = vrot.lane.b32.xlu0 %v1570_v25, %s4619_s24  ;;  %v1768_v25 = vld [vmem:[#allocation2 + $0x82] sm:$0xff] }
 0x1b7   : > { %v1260_v53 = vpop.permute.xlu1 %1259 }
 0x1b8   : > { %1349 = vst.msk [vmem:[#allocation3 + $0x38] sm:$0xff] %vm1341_vm10, %v1260_v53  ;;  %v1266_v9 = vpop.permute.xlu0 %1265 }
 0x1b9   : > { %1634 = vrot.lane.b32.xlu1 %v1569_v36, %s4619_s24  ;;  %1352 = vst.msk [vmem:[#allocation3 + $0x50] sm:$0xff] %vm1341_vm10, %v1266_v9  ;;  %v1770_v36 = vld [vmem:[#allocation2 + $0x9a] sm:$0xff] }
 0x1ba   : > { %1640 = vrot.lane.b32.xlu0 %v1572_v56, %s4619_s24  ;;  %v1769_v56 = vld [vmem:[#allocation2 + $0x92] sm:$0xff] }
 0x1bb   : > { %v1264_v18 = vpop.permute.xlu1 %1263 }
 0x1bc   : > { %1351 = vst.msk [vmem:[#allocation3 + $0x48] sm:$0xff] %vm1341_vm10, %v1264_v18  ;;  %v1270_v22 = vpop.permute.xlu0 %1269 }
 0x1bd   : > { %1638 = vrot.lane.b32.xlu1 %v1571_v15, %s4619_s24  ;;  %1354 = vst.msk [vmem:[#allocation3 + $0x60] sm:$0xff] %vm1341_vm10, %v1270_v22  ;;  %v1771_v15 = vld [vmem:[#allocation2 + $0xaa] sm:$0xff] }
 0x1be   : > { %1644 = vrot.lane.b32.xlu0 %v1574_v19, %s4619_s24  ;;  %v1774_v19 = vld [vmem:[#allocation2 + $0xca] sm:$0xff] }
 0x1bf   : > { %v1268_v26 = vpop.permute.xlu1 %1267 }
 0x1c0   : > { %1353 = vst.msk [vmem:[#allocation3 + $0x58] sm:$0xff] %vm1341_vm10, %v1268_v26  ;;  %v1274_v28 = vpop.permute.xlu0 %1273 }
 0x1c1   : > { %1642 = vrot.lane.b32.xlu1 %v1573_v49, %s4619_s24  ;;  %1356 = vst.msk [vmem:[#allocation3 + $0x70] sm:$0xff] %vm1341_vm10, %v1274_v28  ;;  %v1776_v49 = vld [vmem:[#allocation2 + $0xe2] sm:$0xff] }
 0x1c2   : > { %1648 = vrot.lane.b32.xlu0 %v1576_v27, %s4619_s24  ;;  %v1775_v27 = vld [vmem:[#allocation2 + $0xda] sm:$0xff] }
 0x1c3   : > { %v1272_v34 = vpop.permute.xlu1 %1271 }
 0x1c4   : > { %1355 = vst.msk [vmem:[#allocation3 + $0x68] sm:$0xff] %vm1341_vm10, %v1272_v34  ;;  %v1278_v35 = vpop.permute.xlu0 %1277 }
 0x1c5   : > { %1646 = vrot.lane.b32.xlu1 %v1575_v32, %s4619_s24  ;;  %1358 = vst.msk [vmem:[#allocation3 + $0x80] sm:$0xff] %vm1341_vm10, %v1278_v35  ;;  %v1585_v32 = vld [vmem:[#allocation2 + $0xf9] sm:$0xff] }
 0x1c6   : > { %1652 = vrot.lane.b32.xlu0 %v1578_v31, %s4619_s24  ;;  %v1586_v31 = vld [vmem:[#allocation2 + $0x109] sm:$0xff] }
 0x1c7   : > { %v1276_v40 = vpop.permute.xlu1 %1275 }
 0x1c8   : > { %1357 = vst.msk [vmem:[#allocation3 + $0x78] sm:$0xff] %vm1341_vm10, %v1276_v40  ;;  %v1282_v52 = vpop.permute.xlu0 %1281 }
 0x1c9   : > { %1650 = vrot.lane.b32.xlu1 %v1577_v50, %s4619_s24  ;;  %1360 = vst.msk [vmem:[#allocation3 + $0x90] sm:$0xff] %vm1341_vm10, %v1282_v52  ;;  %v1779_v50 = vld [vmem:[#allocation2 + $0x10a] sm:$0xff] }
 0x1ca   : > { %1656 = vrot.lane.b32.xlu0 %v1580_v54, %s4619_s24  ;;  %v1587_v54 = vld [vmem:[#allocation2 + $0x111] sm:$0xff] }
 0x1cb   : > { %v1280_v58 = vpop.permute.xlu1 %1279 }
 0x1cc   : > { %1359 = vst.msk [vmem:[#allocation3 + $0x88] sm:$0xff] %vm1341_vm10, %v1280_v58  ;;  %v1286_v60 = vpop.permute.xlu0 %1285 }
 0x1cd   : > { %1654 = vrot.lane.b32.xlu1 %v1579_v59, %s4619_s24  ;;  %1362 = vst.msk [vmem:[#allocation3 + $0xa0] sm:$0xff] %vm1341_vm10, %v1286_v60  ;;  %v1780_v59 = vld [vmem:[#allocation2 + $0x112] sm:$0xff] }
 0x1ce   : > { %1660 = vrot.lane.b32.xlu0 %v1582_v61, %s4619_s24  ;;  %v1781_v61 = vld [vmem:[#allocation2 + $0x122] sm:$0xff] }
 0x1cf   : > { %v1284_v1 = vpop.permute.xlu1 %1283 }
 0x1d0   : > { %1361 = vst.msk [vmem:[#allocation3 + $0x98] sm:$0xff] %vm1341_vm10, %v1284_v1  ;;  %v1290_v3 = vpop.permute.xlu0 %1289 }
 0x1d1   : > { %1658 = vrot.lane.b32.xlu1 %v1581_v2, %s4619_s24  ;;  %1364 = vst.msk [vmem:[#allocation3 + $0xb0] sm:$0xff] %vm1341_vm10, %v1290_v3  ;;  %v1590_v2 = vld [vmem:[#allocation2 + $0x139] sm:$0xff] }
 0x1d2   : > { %1664 = vrot.lane.b32.xlu0 %v1584_v4, %s4619_s24  ;;  %v1782_v4 = vld [vmem:[#allocation2 + $0x12a] sm:$0xff] }
 0x1d3   : > { %v1288_v7 = vpop.permute.xlu1 %1287 }
 0x1d4   : > { %1363 = vst.msk [vmem:[#allocation3 + $0xa8] sm:$0xff] %vm1341_vm10, %v1288_v7  ;;  %v1294_v10 = vpop.permute.xlu0 %1293 }
 0x1d5   : > { %1662 = vrot.lane.b32.xlu1 %v1583_v8, %s4619_s24  ;;  %1366 = vst.msk [vmem:[#allocation3 + $0xc0] sm:$0xff] %vm1341_vm10, %v1294_v10  ;;  %v1591_v8 = vld [vmem:[#allocation2 + $0x141] sm:$0xff] }
 0x1d6   : > { %1827 = vrot.lane.b32.xlu0 %v1762_v12, %s4620_s16  ;;  %v1592_v12 = vld [vmem:[#allocation2 + $0x151] sm:$0xff] }
 0x1d7   : > { %v1292_v13 = vpop.permute.xlu1 %1291 }
 0x1d8   : > { %1365 = vst.msk [vmem:[#allocation3 + $0xb8] sm:$0xff] %vm1341_vm10, %v1292_v13  ;;  %v1298_v41 = vpop.permute.xlu0 %1297 }
 0x1d9   : > { %1825 = vrot.lane.b32.xlu1 %v1761_v16, %s4620_s16  ;;  %1368 = vst.msk [vmem:[#allocation3 + $0xd0] sm:$0xff] %vm1341_vm10, %v1298_v41  ;;  %v1784_v16 = vld [vmem:[#allocation2 + $0x142] sm:$0xff] }
 0x1da   : > { %1831 = vrot.lane.b32.xlu0 %v1764_v20, %s4620_s16  ;;  %v1785_v20 = vld [vmem:[#allocation2 + $0x152] sm:$0xff] }
 0x1db   : > { %v1296_v24 = vpop.permute.xlu1 %1295 }
 0x1dc   : > { %1367 = vst.msk [vmem:[#allocation3 + $0xc8] sm:$0xff] %vm1341_vm10, %v1296_v24  ;;  %v1302_v21 = vpop.permute.xlu0 %1301 }
 0x1dd   : > { %1829 = vrot.lane.b32.xlu1 %v1763_v17, %s4620_s16  ;;  %1370 = vst.msk [vmem:[#allocation3 + $0xe0] sm:$0xff] %vm1341_vm10, %v1302_v21  ;;  %v1593_v17 = vld [vmem:[#allocation2 + $0x159] sm:$0xff] }
 0x1de   : > { %1835 = vrot.lane.b32.xlu0 %v1766_v42, %s4620_s16  ;;  %v1594_v42 = vld [vmem:[#allocation2 + $0x169] sm:$0xff] }
 0x1df   : > { %v1300_v43 = vpop.permute.xlu1 %1299 }
 0x1e0   : > { %1369 = vst.msk [vmem:[#allocation3 + $0xd8] sm:$0xff] %vm1341_vm10, %v1300_v43  ;;  %v1306_v44 = vpop.permute.xlu0 %1305 }
 0x1e1   : > { %1833 = vrot.lane.b32.xlu1 %v1765_v33, %s4620_s16  ;;  %1372 = vst.msk [vmem:[#allocation3 + $0xf0] sm:$0xff] %vm1341_vm10, %v1306_v44  ;;  %v1786_v33 = vld [vmem:[#allocation2 + $0x15a] sm:$0xff] }
 0x1e2   : > { %1839 = vrot.lane.b32.xlu0 %v1768_v25, %s4620_s16  ;;  %v1787_v25 = vld [vmem:[#allocation2 + $0x16a] sm:$0xff] }
 0x1e3   : > { %v1304_v51 = vpop.permute.xlu1 %1303 }
 0x1e4   : > { %1371 = vst.msk [vmem:[#allocation3 + $0xe8] sm:$0xff] %vm1341_vm10, %v1304_v51  ;;  %v1440_v53 = vpop.permute.xlu0 %1439 }
 0x1e5   : > { %1837 = vrot.lane.b32.xlu1 %v1767_v48, %s4620_s16  ;;  %1536 = vst.msk [vmem:[#allocation3] sm:$0xff] %vm1535_vm11, %v1440_v53  ;;  %v1595_v48 = vld [vmem:[#allocation2 + $0x171] sm:$0xff] }
 0x1e6   : > { %1843 = vrot.lane.b32.xlu0 %v1770_v36, %s4620_s16  ;;  %v1788_v53 = vld [vmem:[#allocation2 + $0x172] sm:$0xff] }
 0x1e7   : > { %v1308_v9 = vpop.permute.xlu1 %1307 }
 0x1e8   : > { %1373 = vst.msk [vmem:[#allocation3 + $0xf8] sm:$0xff] %vm1341_vm10, %v1308_v9  ;;  %v1444_v14 = vpop.permute.xlu0 %1443 }
 0x1e9   : > { %1841 = vrot.lane.b32.xlu1 %v1769_v56, %s4620_s16  ;;  %1538 = vst.msk [vmem:[#allocation3 + $0x10] sm:$0xff] %vm1535_vm11, %v1444_v14 }
 0x1ea   : > { %1847 = vrot.lane.b32.xlu0 %v1772_v11, %s4620_s16 }
 0x1eb   : > { %v1442_v18 = vpop.permute.xlu1 %1441 }
 0x1ec   : > { %1537 = vst.msk [vmem:[#allocation3 + $0x8] sm:$0xff] %vm1535_vm11, %v1442_v18  ;;  %v1448_v22 = vpop.permute.xlu0 %1447  ;;  %v1791_v18 = vld [vmem:[#allocation2 + $0x19a] sm:$0xff] }
 0x1ed   : > { %1845 = vrot.lane.b32.xlu1 %v1771_v15, %s4620_s16  ;;  %1540 = vst.msk [vmem:[#allocation3 + $0x20] sm:$0xff] %vm1535_vm11, %v1448_v22  ;;  %v1598_v15 = vld [vmem:[#allocation2 + $0x199] sm:$0xff] }
 0x1ee   : > { %1851 = vrot.lane.b32.xlu0 %v1774_v19, %s4620_s16 }
 0x1ef   : > { %v1446_v23 = vpop.permute.xlu1 %1445 }
 0x1f0   : > { %1539 = vst.msk [vmem:[#allocation3 + $0x18] sm:$0xff] %vm1535_vm11, %v1446_v23  ;;  %v1452_v26 = vpop.permute.xlu0 %1451 }
 0x1f1   : > { %1849 = vrot.lane.b32.xlu1 %v1773_v38, %s4620_s16  ;;  %1542 = vst.msk [vmem:[#allocation3 + $0x30] sm:$0xff] %vm1535_vm11, %v1452_v26  ;;  %v1792_v38 = vld [vmem:[#allocation2 + $0x1a2] sm:$0xff] }
 0x1f2   : > { %1855 = vrot.lane.b32.xlu0 %v1776_v49, %s4620_s16 }
 0x1f3   : > { %v1450_v28 = vpop.permute.xlu1 %1449 }
 0x1f4   : > { %1541 = vst.msk [vmem:[#allocation3 + $0x28] sm:$0xff] %vm1535_vm11, %v1450_v28  ;;  %v1456_v37 = vpop.permute.xlu0 %1455 }
 0x1f5   : > { %1853 = vrot.lane.b32.xlu1 %v1775_v27, %s4620_s16  ;;  %1544 = vst.msk [vmem:[#allocation3 + $0x40] sm:$0xff] %vm1535_vm11, %v1456_v37 }
 0x1f6   : > { %1857 = vrot.lane.b32.xlu0 %v1777_v46, %s4620_s16 }
 0x1f7   : > { %v1454_v34 = vpop.permute.xlu1 %1453 }
 0x1f8   : > { %1543 = vst.msk [vmem:[#allocation3 + $0x38] sm:$0xff] %vm1535_vm11, %v1454_v34  ;;  %v1460_v35 = vpop.permute.xlu0 %1459 }
 0x1f9   : > { %1666 = vrot.lane.b32.xlu1 %v1585_v32, %s4619_s24  ;;  %1546 = vst.msk [vmem:[#allocation3 + $0x50] sm:$0xff] %vm1535_vm11, %v1460_v35 }
 0x1fa   : > { %1668 = vrot.lane.b32.xlu0 %v1586_v31, %s4619_s24 }
 0x1fb   : > { %v1458_v39 = vpop.permute.xlu1 %1457 }
 0x1fc   : > { %1545 = vst.msk [vmem:[#allocation3 + $0x48] sm:$0xff] %vm1535_vm11, %v1458_v39  ;;  %v1464_v40 = vpop.permute.xlu0 %1463 }
 0x1fd   : > { %1859 = vrot.lane.b32.xlu1 %v1778_v45, %s4620_s16  ;;  %1548 = vst.msk [vmem:[#allocation3 + $0x60] sm:$0xff] %vm1535_vm11, %v1464_v40 }
 0x1fe   : > { %1861 = vrot.lane.b32.xlu0 %v1779_v50, %s4620_s16 }
 0x1ff   : > { %v1462_v52 = vpop.permute.xlu1 %1461 }
 0x200   : > { %1547 = vst.msk [vmem:[#allocation3 + $0x58] sm:$0xff] %vm1535_vm11, %v1462_v52  ;;  %v1468_v55 = vpop.permute.xlu0 %1467 }
 0x201   : > { %1670 = vrot.lane.b32.xlu1 %v1587_v54, %s4619_s24  ;;  %1550 = vst.msk [vmem:[#allocation3 + $0x70] sm:$0xff] %vm1535_vm11, %v1468_v55 }
 0x202   : > { %1672 = vrot.lane.b32.xlu0 %v1588_v57, %s4619_s24 }
 0x203   : > { %v1466_v58 = vpop.permute.xlu1 %1465 }
 0x204   : > { %1549 = vst.msk [vmem:[#allocation3 + $0x68] sm:$0xff] %vm1535_vm11, %v1466_v58  ;;  %v1472_v60 = vpop.permute.xlu0 %1471 }
 0x205   : > { %1863 = vrot.lane.b32.xlu1 %v1780_v59, %s4620_s16  ;;  %1552 = vst.msk [vmem:[#allocation3 + $0x80] sm:$0xff] %vm1535_vm11, %v1472_v60 }
 0x206   : > { %1865 = vrot.lane.b32.xlu0 %v1781_v61, %s4620_s16 }
 0x207   : > { %v1470_v62 = vpop.permute.xlu1 %1469 }
 0x208   : > { %1551 = vst.msk [vmem:[#allocation3 + $0x78] sm:$0xff] %vm1535_vm11, %v1470_v62  ;;  %v1476_v1 = vpop.permute.xlu0 %1475 }
 0x209   : > { %1674 = vrot.lane.b32.xlu1 %v1589_v63, %s4619_s24  ;;  %1554 = vst.msk [vmem:[#allocation3 + $0x90] sm:$0xff] %vm1535_vm11, %v1476_v1 }
 0x20a   : > { %1676 = vrot.lane.b32.xlu0 %v1590_v2, %s4619_s24 }
 0x20b   : > { %v1474_v3 = vpop.permute.xlu1 %1473 }
 0x20c   : > { %1553 = vst.msk [vmem:[#allocation3 + $0x88] sm:$0xff] %vm1535_vm11, %v1474_v3  ;;  %v1480_v5 = vpop.permute.xlu0 %1479 }
 0x20d   : > { %1867 = vrot.lane.b32.xlu1 %v1782_v4, %s4620_s16  ;;  %1556 = vst.msk [vmem:[#allocation3 + $0xa0] sm:$0xff] %vm1535_vm11, %v1480_v5 }
 0x20e   : > { %1869 = vrot.lane.b32.xlu0 %v1783_v6, %s4620_s16 }
 0x20f   : > { %v1478_v7 = vpop.permute.xlu1 %1477 }
 0x210   : > { %1555 = vst.msk [vmem:[#allocation3 + $0x98] sm:$0xff] %vm1535_vm11, %v1478_v7  ;;  %v1484_v10 = vpop.permute.xlu0 %1483 }
 0x211   : > { %1678 = vrot.lane.b32.xlu1 %v1591_v8, %s4619_s24  ;;  %1558 = vst.msk [vmem:[#allocation3 + $0xb0] sm:$0xff] %vm1535_vm11, %v1484_v10 }
 0x212   : > { %1680 = vrot.lane.b32.xlu0 %v1592_v12, %s4619_s24 }
 0x213   : > { %v1482_v13 = vpop.permute.xlu1 %1481 }
 0x214   : > { %1557 = vst.msk [vmem:[#allocation3 + $0xa8] sm:$0xff] %vm1535_vm11, %v1482_v13  ;;  %v1488_v41 = vpop.permute.xlu0 %1487 }
 0x215   : > { %1871 = vrot.lane.b32.xlu1 %v1784_v16, %s4620_s16  ;;  %1560 = vst.msk [vmem:[#allocation3 + $0xc0] sm:$0xff] %vm1535_vm11, %v1488_v41 }
 0x216   : > { %1873 = vrot.lane.b32.xlu0 %v1785_v20, %s4620_s16 }
 0x217   : > { %v1486_v24 = vpop.permute.xlu1 %1485 }
 0x218   : > { %1559 = vst.msk [vmem:[#allocation3 + $0xb8] sm:$0xff] %vm1535_vm11, %v1486_v24  ;;  %v1492_v21 = vpop.permute.xlu0 %1491 }
 0x219   : > { %1682 = vrot.lane.b32.xlu1 %v1593_v17, %s4619_s24  ;;  %1562 = vst.msk [vmem:[#allocation3 + $0xd0] sm:$0xff] %vm1535_vm11, %v1492_v21 }
 0x21a   : > { %1684 = vrot.lane.b32.xlu0 %v1594_v42, %s4619_s24 }
 0x21b   : > { %v1490_v43 = vpop.permute.xlu1 %1489 }
 0x21c   : > { %1561 = vst.msk [vmem:[#allocation3 + $0xc8] sm:$0xff] %vm1535_vm11, %v1490_v43  ;;  %v1496_v44 = vpop.permute.xlu0 %1495 }
 0x21d   : > { %1875 = vrot.lane.b32.xlu1 %v1786_v33, %s4620_s16  ;;  %1564 = vst.msk [vmem:[#allocation3 + $0xe0] sm:$0xff] %vm1535_vm11, %v1496_v44 }
 0x21e   : > { %1877 = vrot.lane.b32.xlu0 %v1787_v25, %s4620_s16 }
 0x21f   : > { %v1494_v51 = vpop.permute.xlu1 %1493 }
 0x220   : > { %1563 = vst.msk [vmem:[#allocation3 + $0xd8] sm:$0xff] %vm1535_vm11, %v1494_v51  ;;  %v1500_v36 = vpop.permute.xlu0 %1499 }
 0x221   : > { %1686 = vrot.lane.b32.xlu1 %v1595_v48, %s4619_s24  ;;  %1566 = vst.msk [vmem:[#allocation3 + $0xf0] sm:$0xff] %vm1535_vm11, %v1500_v36 }
 0x222   : > { %1688 = vrot.lane.b32.xlu0 %v5481_v0, %s4619_s24 }
 0x223   : > { %v1498_v56 = vpop.permute.xlu1 %1497 }
 0x224   : > { %1565 = vst.msk [vmem:[#allocation3 + $0xe8] sm:$0xff] %vm1535_vm11, %v1498_v56  ;;  %v1633_v9 = vpop.permute.xlu0 %1632 }
 0x225   : > { %1879 = vrot.lane.b32.xlu1 %v1788_v53, %s4620_s16  ;;  %1729 = vst.msk [vmem:[#allocation3] sm:$0xff] %vm1728_vm12, %v1633_v9 }
 0x226   : > { %1881 = vrot.lane.b32.xlu0 %v5581_v29, %s4620_s16  ;;  %v1599_v29 = vld [vmem:[#allocation2 + $0x1a1] sm:$0xff] }
 0x227   : > { %v1502_v11 = vpop.permute.xlu1 %1501 }
 0x228   : > { %1567 = vst.msk [vmem:[#allocation3 + $0xf8] sm:$0xff] %vm1535_vm11, %v1502_v11  ;;  %v1637_v14 = vpop.permute.xlu0 %1636 }
 0x229   : > { %1690 = vrot.lane.b32.xlu1 %v5493_v30, %s4619_s24  ;;  %1731 = vst.msk [vmem:[#allocation3 + $0x10] sm:$0xff] %vm1728_vm12, %v1637_v14 }
 0x22a   : > { %1692 = vrot.lane.b32.xlu0 %v1598_v15, %s4619_s24 }
 0x22b   : > { %v1635_v0 = vpop.permute.xlu1 %1634 }
 0x22c   : > { %1730 = vst.msk [vmem:[#allocation3 + $0x8] sm:$0xff] %vm1728_vm12, %v1635_v0  ;;  %v1641_v19 = vpop.permute.xlu0 %1640 }
 0x22d   : > { %1883 = vrot.lane.b32.xlu1 %v5593_v47, %s4620_s16  ;;  %1733 = vst.msk [vmem:[#allocation3 + $0x20] sm:$0xff] %vm1728_vm12, %v1641_v19 }
 0x22e   : > { %1885 = vrot.lane.b32.xlu0 %v1791_v18, %s4620_s16 }
 0x22f   : > { %v1639_v22 = vpop.permute.xlu1 %1638 }
 0x230   : > { %1732 = vst.msk [vmem:[#allocation3 + $0x18] sm:$0xff] %vm1728_vm12, %v1639_v22  ;;  %v1645_v30 = vpop.permute.xlu0 %1644 }
 0x231   : > { %1735 = vst.msk [vmem:[#allocation3 + $0x30] sm:$0xff] %vm1728_vm12, %v1645_v30  ;;  %1694 = vrot.lane.b32.xlu1 %v1599_v29, %s4619_s24 }
 0x233   : > { %v1643_v23 = vpop.permute.xlu1 %1642 }
 0x234   : > { %1734 = vst.msk [vmem:[#allocation3 + $0x28] sm:$0xff] %vm1728_vm12, %v1643_v23  ;;  %v1649_v49 = vpop.permute.xlu0 %1648 }
 0x235   : > { %1737 = vst.msk [vmem:[#allocation3 + $0x40] sm:$0xff] %vm1728_vm12, %v1649_v49  ;;  %1887 = vrot.lane.b32.xlu1 %v1792_v38, %s4620_s16 }
 0x237   : > { %v1647_v47 = vpop.permute.xlu1 %1646 }
 0x238   : > { %1736 = vst.msk [vmem:[#allocation3 + $0x38] sm:$0xff] %vm1728_vm12, %v1647_v47  ;;  %v1653_v26 = vpop.permute.xlu0 %1652 }
 0x239   : > { %1739 = vst.msk [vmem:[#allocation3 + $0x50] sm:$0xff] %vm1728_vm12, %v1653_v26 }
 0x23b   : > { %v1651_v27 = vpop.permute.xlu1 %1650 }
 0x23c   : > { %1738 = vst.msk [vmem:[#allocation3 + $0x48] sm:$0xff] %vm1728_vm12, %v1651_v27  ;;  %v1657_v28 = vpop.permute.xlu0 %1656 }
 0x23d   : > { %1741 = vst.msk [vmem:[#allocation3 + $0x60] sm:$0xff] %vm1728_vm12, %v1657_v28 }
 0x23f   : > { %v1655_v46 = vpop.permute.xlu1 %1654 }
 0x240   : > { %1740 = vst.msk [vmem:[#allocation3 + $0x58] sm:$0xff] %vm1728_vm12, %v1655_v46  ;;  %v1661_v37 = vpop.permute.xlu0 %1660 }
 0x241   : > { %1743 = vst.msk [vmem:[#allocation3 + $0x70] sm:$0xff] %vm1728_vm12, %v1661_v37 }
 0x243   : > { %v1659_v32 = vpop.permute.xlu1 %1658 }
 0x244   : > { %1742 = vst.msk [vmem:[#allocation3 + $0x68] sm:$0xff] %vm1728_vm12, %v1659_v32  ;;  %v1665_v34 = vpop.permute.xlu0 %1664 }
 0x245   : > { %1745 = vst.msk [vmem:[#allocation3 + $0x80] sm:$0xff] %vm1728_vm12, %v1665_v34 }
 0x247   : > { %v1663_v31 = vpop.permute.xlu1 %1662 }
 0x248   : > { %1744 = vst.msk [vmem:[#allocation3 + $0x78] sm:$0xff] %vm1728_vm12, %v1663_v31  ;;  %v1828_v35 = vpop.permute.xlu0 %1827 }
 0x249   : > { %1923 = vst.msk [vmem:[#allocation3 + $0x8] sm:$0xff] %vm1921_vm13, %v1828_v35 }
 0x24b   : > { %v1826_v45 = vpop.permute.xlu1 %1825 }
 0x24c   : > { %1922 = vst.msk [vmem:[#allocation3] sm:$0xff] %vm1921_vm13, %v1826_v45  ;;  %v1832_v39 = vpop.permute.xlu0 %1831 }
 0x24d   : > { %1925 = vst.msk [vmem:[#allocation3 + $0x18] sm:$0xff] %vm1921_vm13, %v1832_v39 }
 0x24f   : > { %v1830_v50 = vpop.permute.xlu1 %1829 }
 0x250   : > { %1924 = vst.msk [vmem:[#allocation3 + $0x10] sm:$0xff] %vm1921_vm13, %v1830_v50  ;;  %v1836_v40 = vpop.permute.xlu0 %1835  ;;  %v1955_v54 = vld [vmem:[#allocation3 + $0x8] sm:$0xff] }
 0x251   : > { %1927 = vst.msk [vmem:[#allocation3 + $0x28] sm:$0xff] %vm1921_vm13, %v1836_v40 }
 0x253   : > { %v1834_v52 = vpop.permute.xlu1 %1833  ;;  %v1954_v57 = vld [vmem:[#allocation3] sm:$0xff] }
 0x254   : > { %1926 = vst.msk [vmem:[#allocation3 + $0x20] sm:$0xff] %vm1921_vm13, %v1834_v52  ;;  %4459 = vmatprep.mubr.f32.mxu0 %v1954_v57  ;;  %v1840_v55 = vpop.permute.xlu0 %1839  ;;  %v1957_v59 = vld [vmem:[#allocation3 + $0x18] sm:$0xff] }
 0x255   : > { %4460 = vmatmul.mubr.f32.vlgmr.msra.gmra.mxu0 %v1955_v54  ;;  %1929 = vst.msk [vmem:[#allocation3 + $0x38] sm:$0xff] %vm1921_vm13, %v1840_v55  ;;  %v2362_v57 = vld [vmem:[#allocation2 + $0x1] sm:$0xff]  ;;  %v2363_v55 = vld [vmem:[#allocation2 + $0x9] sm:$0xff] }
 0x256   : > { %2426 = vrot.lane.b32.xlu0 %v2362_v57, %s4613_s18  ;;  %2428 = vrot.lane.b32.xlu1 %v2363_v55, %s4613_s18 }
 0x257   : > { %v1838_v58 = vpop.permute.xlu1 %1837  ;;  %v1956_v61 = vld [vmem:[#allocation3 + $0x10] sm:$0xff] }
 0x258   : > { %1928 = vst.msk [vmem:[#allocation3 + $0x30] sm:$0xff] %vm1921_vm13, %v1838_v58  ;;  %4462 = vmatprep.mubr.f32.mxu0 %v1956_v61  ;;  %v1844_v60 = vpop.permute.xlu0 %1843  ;;  %v1959_v63 = vld [vmem:[#allocation3 + $0x28] sm:$0xff] }
 0x259   : > { %4463 = vmatmul.mubr.f32.gmra.mxu0 %v1957_v59  ;;  %1931 = vst.msk [vmem:[#allocation3 + $0x48] sm:$0xff] %vm1921_vm13, %v1844_v60 }
 0x25b   : > { %v1842_v62 = vpop.permute.xlu1 %1841  ;;  %v1958_v2 = vld [vmem:[#allocation3 + $0x20] sm:$0xff] }
 0x25c   : > { %1930 = vst.msk [vmem:[#allocation3 + $0x40] sm:$0xff] %vm1921_vm13, %v1842_v62  ;;  %4465 = vmatprep.mubr.f32.mxu0 %v1958_v2  ;;  %v1848_v1 = vpop.permute.xlu0 %1847  ;;  %v1961_v4 = vld [vmem:[#allocation3 + $0x38] sm:$0xff] }
 0x25d   : > { %4466 = vmatmul.mubr.f32.gmra.mxu0 %v1959_v63  ;;  %1933 = vst.msk [vmem:[#allocation3 + $0x58] sm:$0xff] %vm1921_vm13, %v1848_v1 }
 0x25f   : > { %v1846_v3 = vpop.permute.xlu1 %1845  ;;  %v1960_v6 = vld [vmem:[#allocation3 + $0x30] sm:$0xff] }
 0x260   : > { %1932 = vst.msk [vmem:[#allocation3 + $0x50] sm:$0xff] %vm1921_vm13, %v1846_v3  ;;  %4468 = vmatprep.mubr.f32.mxu0 %v1960_v6  ;;  %v1852_v5 = vpop.permute.xlu0 %1851  ;;  %v1963_v8 = vld [vmem:[#allocation3 + $0x48] sm:$0xff]  ;;  %v2299_v3 = vld [vmem:[#allocation2 + $0x8] sm:$0xff] }
 0x261   : > { %4469 = vmatmul.mubr.f32.gmra.mxu0 %v1961_v4  ;;  %1935 = vst.msk [vmem:[#allocation3 + $0x68] sm:$0xff] %vm1921_vm13, %v1852_v5  ;;  %v2298_v4 = vld [vmem:[#allocation2] sm:$0xff] }
 0x262   : > { %2330 = vst.msk [vmem:[#allocation3] sm:$0xff] %vm171_vm0, %v2298_v4  ;;  %2331 = vst.msk [vmem:[#allocation3 + $0x8] sm:$0xff] %vm171_vm0, %v2299_v3  ;;  %v5936_v5 = vld [vmem:[%s6943_s2] ss:$0 sm:$0xff] }
 0x263   : > { %v1850_v7 = vpop.permute.xlu1 %1849  ;;  %v1962_v12 = vld [vmem:[#allocation3 + $0x40] sm:$0xff] }
 0x264   : > { %1934 = vst.msk [vmem:[#allocation3 + $0x60] sm:$0xff] %vm1921_vm13, %v1850_v7  ;;  %4471 = vmatprep.mubr.f32.mxu0 %v1962_v12  ;;  %v1856_v10 = vpop.permute.xlu0 %1855  ;;  %v1965_v16 = vld [vmem:[#allocation3 + $0x58] sm:$0xff] }
 0x265   : > { %4472 = vmatmul.mubr.f32.gmra.mxu0 %v1963_v8  ;;  %1937 = vst.msk [vmem:[#allocation3 + $0x78] sm:$0xff] %vm1921_vm13, %v1856_v10 }
 0x267   : > { %v1854_v13 = vpop.permute.xlu1 %1853  ;;  %v1964_v20 = vld [vmem:[#allocation3 + $0x50] sm:$0xff] }
 0x268   : > { %1936 = vst.msk [vmem:[#allocation3 + $0x70] sm:$0xff] %vm1921_vm13, %v1854_v13  ;;  %4474 = vmatprep.mubr.f32.mxu0 %v1964_v20  ;;  %v1858_v41 = vpop.permute.xlu0 %1857  ;;  %v1967_v17 = vld [vmem:[#allocation3 + $0x68] sm:$0xff] }
 0x269   : > { %4475 = vmatmul.mubr.f32.gmra.mxu0 %v1965_v16  ;;  %1938 = vst.msk [vmem:[#allocation3 + $0x80] sm:$0xff] %vm1921_vm13, %v1858_v41 }
 0x26b   : > { %v1667_v24 = vpop.permute.xlu1 %1666  ;;  %v1966_v42 = vld [vmem:[#allocation3 + $0x60] sm:$0xff] }
 0x26c   : > { %1746 = vst.msk [vmem:[#allocation3 + $0x88] sm:$0xff] %vm1728_vm12, %v1667_v24  ;;  %4477 = vmatprep.mubr.f32.mxu0 %v1966_v42  ;;  %v1669_v21 = vpop.permute.xlu0 %1668  ;;  %v1969_v33 = vld [vmem:[#allocation3 + $0x78] sm:$0xff] }
 0x26d   : > { %4478 = vmatmul.mubr.f32.gmra.mxu0 %v1967_v17  ;;  %1747 = vst.msk [vmem:[#allocation3 + $0x90] sm:$0xff] %vm1728_vm12, %v1669_v21 }
 0x26f   : > { %v1860_v43 = vpop.permute.xlu1 %1859  ;;  %v1968_v25 = vld [vmem:[#allocation3 + $0x70] sm:$0xff] }
 0x270   : > { %1939 = vst.msk [vmem:[#allocation3 + $0x88] sm:$0xff] %vm1921_vm13, %v1860_v43  ;;  %4480 = vmatprep.mubr.f32.mxu0 %v1968_v25  ;;  %v1862_v44 = vpop.permute.xlu0 %1861  ;;  %v1970_v48 = vld [vmem:[#allocation3 + $0x80] sm:$0xff] }
 0x271   : > { %4481 = vmatmul.mubr.f32.gmra.mxu0 %v1969_v33  ;;  %1940 = vst.msk [vmem:[#allocation3 + $0x90] sm:$0xff] %vm1921_vm13, %v1862_v44 }
 0x272   : > { %4483 = vmatprep.mubr.f32.mxu0 %v1970_v48 }
 0x273   : > { %v1671_v51 = vpop.permute.xlu1 %1670 }
 0x274   : > { %1748 = vst.msk [vmem:[#allocation3 + $0x98] sm:$0xff] %vm1728_vm12, %v1671_v51  ;;  %v1673_v36 = vpop.permute.xlu0 %1672 }
 0x275   : > { %1749 = vst.msk [vmem:[#allocation3 + $0xa0] sm:$0xff] %vm1728_vm12, %v1673_v36 }
 0x277   : > { %v1864_v53 = vpop.permute.xlu1 %1863  ;;  %v1971_v56 = vld [vmem:[#allocation3 + $0x88] sm:$0xff] }
 0x278   : > { %1941 = vst.msk [vmem:[#allocation3 + $0x98] sm:$0xff] %vm1921_vm13, %v1864_v53  ;;  %4484 = vmatmul.mubr.f32.gmra.mxu0 %v1971_v56  ;;  %v1866_v9 = vpop.permute.xlu0 %1865  ;;  %v1972_v11 = vld [vmem:[#allocation3 + $0x90] sm:$0xff] }
 0x279   : > { %1942 = vst.msk [vmem:[#allocation3 + $0xa0] sm:$0xff] %vm1921_vm13, %v1866_v9  ;;  %4486 = vmatprep.mubr.f32.mxu0 %v1972_v11 }
 0x27b   : > { %v1675_v14 = vpop.permute.xlu1 %1674 }
 0x27c   : > { %1750 = vst.msk [vmem:[#allocation3 + $0xa8] sm:$0xff] %vm1728_vm12, %v1675_v14  ;;  %v1677_v15 = vpop.permute.xlu0 %1676 }
 0x27d   : > { %1751 = vst.msk [vmem:[#allocation3 + $0xb0] sm:$0xff] %vm1728_vm12, %v1677_v15 }
 0x27f   : > { %v1868_v0 = vpop.permute.xlu1 %1867  ;;  %v1973_v18 = vld [vmem:[#allocation3 + $0x98] sm:$0xff] }
 0x280   : > { %1943 = vst.msk [vmem:[#allocation3 + $0xa8] sm:$0xff] %vm1921_vm13, %v1868_v0  ;;  %4487 = vmatmul.mubr.f32.gmra.mxu0 %v1973_v18  ;;  %v1870_v19 = vpop.permute.xlu0 %1869  ;;  %v1974_v29 = vld [vmem:[#allocation3 + $0xa0] sm:$0xff] }
 0x281   : > { %1944 = vst.msk [vmem:[#allocation3 + $0xb0] sm:$0xff] %vm1921_vm13, %v1870_v19  ;;  %4489 = vmatprep.mubr.f32.mxu0 %v1974_v29 }
 0x283   : > { %v1679_v22 = vpop.permute.xlu1 %1678 }
 0x284   : > { %1752 = vst.msk [vmem:[#allocation3 + $0xb8] sm:$0xff] %vm1728_vm12, %v1679_v22  ;;  %v1681_v30 = vpop.permute.xlu0 %1680 }
 0x285   : > { %1753 = vst.msk [vmem:[#allocation3 + $0xc0] sm:$0xff] %vm1728_vm12, %v1681_v30 }
 0x287   : > { %v1872_v38 = vpop.permute.xlu1 %1871  ;;  %v1975_v23 = vld [vmem:[#allocation3 + $0xa8] sm:$0xff] }
 0x288   : > { %1945 = vst.msk [vmem:[#allocation3 + $0xb8] sm:$0xff] %vm1921_vm13, %v1872_v38  ;;  %4490 = vmatmul.mubr.f32.gmra.mxu0 %v1975_v23  ;;  %v1874_v49 = vpop.permute.xlu0 %1873  ;;  %v1976_v47 = vld [vmem:[#allocation3 + $0xb0] sm:$0xff] }
 0x289   : > { %1946 = vst.msk [vmem:[#allocation3 + $0xc0] sm:$0xff] %vm1921_vm13, %v1874_v49  ;;  %4492 = vmatprep.mubr.f32.mxu0 %v1976_v47 }
 0x28b   : > { %v1683_v26 = vpop.permute.xlu1 %1682 }
 0x28c   : > { %1754 = vst.msk [vmem:[#allocation3 + $0xc8] sm:$0xff] %vm1728_vm12, %v1683_v26  ;;  %v1685_v27 = vpop.permute.xlu0 %1684 }
 0x28d   : > { %1755 = vst.msk [vmem:[#allocation3 + $0xd0] sm:$0xff] %vm1728_vm12, %v1685_v27 }
 0x28f   : > { %v1876_v28 = vpop.permute.xlu1 %1875  ;;  %v1977_v46 = vld [vmem:[#allocation3 + $0xb8] sm:$0xff] }
 0x290   : > { %1947 = vst.msk [vmem:[#allocation3 + $0xc8] sm:$0xff] %vm1921_vm13, %v1876_v28  ;;  %4493 = vmatmul.mubr.f32.gmra.mxu0 %v1977_v46  ;;  %v1878_v37 = vpop.permute.xlu0 %1877  ;;  %v1978_v32 = vld [vmem:[#allocation3 + $0xc0] sm:$0xff] }
 0x291   : > { %1948 = vst.msk [vmem:[#allocation3 + $0xd0] sm:$0xff] %vm1921_vm13, %v1878_v37  ;;  %4495 = vmatprep.mubr.f32.mxu0 %v1978_v32 }
 0x293   : > { %v1687_v34 = vpop.permute.xlu1 %1686 }
 0x294   : > { %1756 = vst.msk [vmem:[#allocation3 + $0xd8] sm:$0xff] %vm1728_vm12, %v1687_v34  ;;  %v1689_v31 = vpop.permute.xlu0 %1688 }
 0x295   : > { %1757 = vst.msk [vmem:[#allocation3 + $0xe0] sm:$0xff] %vm1728_vm12, %v1689_v31 }
 0x297   : > { %v1880_v35 = vpop.permute.xlu1 %1879  ;;  %v1979_v45 = vld [vmem:[#allocation3 + $0xc8] sm:$0xff] }
 0x298   : > { %1949 = vst.msk [vmem:[#allocation3 + $0xd8] sm:$0xff] %vm1921_vm13, %v1880_v35  ;;  %4496 = vmatmul.mubr.f32.gmra.mxu0 %v1979_v45  ;;  %v1882_v39 = vpop.permute.xlu0 %1881  ;;  %v1980_v50 = vld [vmem:[#allocation3 + $0xd0] sm:$0xff] }
 0x299   : > { %1950 = vst.msk [vmem:[#allocation3 + $0xe0] sm:$0xff] %vm1921_vm13, %v1882_v39  ;;  %4498 = vmatprep.mubr.f32.mxu0 %v1980_v50 }
 0x29b   : > { %v1691_v40 = vpop.permute.xlu1 %1690 }
 0x29c   : > { %1758 = vst.msk [vmem:[#allocation3 + $0xe8] sm:$0xff] %vm1728_vm12, %v1691_v40  ;;  %v1693_v61 = vpop.permute.xlu0 %1692 }
 0x29d   : > { %1759 = vst.msk [vmem:[#allocation3 + $0xf0] sm:$0xff] %vm1728_vm12, %v1693_v61 }
 0x29f   : > { %v1884_v54 = vpop.permute.xlu1 %1883  ;;  %v1981_v52 = vld [vmem:[#allocation3 + $0xd8] sm:$0xff] }
 0x2a0   : > { %1951 = vst.msk [vmem:[#allocation3 + $0xe8] sm:$0xff] %vm1921_vm13, %v1884_v54  ;;  %4499 = vmatmul.mubr.f32.gmra.mxu0 %v1981_v52  ;;  %v1982_v59 = vld [vmem:[#allocation3 + $0xe0] sm:$0xff]  ;;  %v1886_v63 = vpop.permute.xlu0 %1885 }
 0x2a1   : > { %4501 = vmatprep.mubr.f32.mxu0 %v1982_v59  ;;  %1952 = vst.msk [vmem:[#allocation3 + $0xf0] sm:$0xff] %vm1921_vm13, %v1886_v63 }
 0x2a3   : > { %v1695_v60 = vpop.permute.xlu1 %1694 }
 0x2a4   : > { %1760 = vst.msk [vmem:[#allocation3 + $0xf8] sm:$0xff] %vm1728_vm12, %v1695_v60 }
 0x2a7   : > { %v1983_v58 = vld [vmem:[#allocation3 + $0xe8] sm:$0xff]  ;;  %v1888_v62 = vpop.permute.xlu1 %1887 }
 0x2a8   : > { %4502 = vmatmul.mubr.f32.gmra.mxu0 %v1983_v58  ;;  %1953 = vst.msk [vmem:[#allocation3 + $0xf8] sm:$0xff] %vm1921_vm13, %v1888_v62  ;;  %v1984_v2 = vld [vmem:[#allocation3 + $0xf0] sm:$0xff] }
 0x2a9   : > { %4504 = vmatprep.mubr.f32.mxu0 %v1984_v2 }
 0x2af   : > { %v1985_v1 = vld [vmem:[#allocation3 + $0xf8] sm:$0xff] }
 0x2b0   : > { %4505 = vmatmul.mubr.f32.gmra.mxu0 %v1985_v1 }
 0x2c8   : > { %v2427_v6 = vpop.permute.xlu0 %2426  ;;  %v2429_v8 = vpop.permute.xlu1 %2428 }
 0x2c9   : > { %2522 = vst.msk [vmem:[#allocation3] sm:$0xff] %vm569_vm6, %v2427_v6  ;;  %2523 = vst.msk [vmem:[#allocation3 + $0x8] sm:$0xff] %vm569_vm6, %v2429_v8 }
 0x315   : > { %v4461_v7 = vpop.f32.mrf.mxu0 }
 0x316   : > { %v2081_v12 = vadd.f32 %v4461_v7, %v5936_v5 }
 0x317   : > { %v2075_v10 = vpop.f32.mrf.mxu0 }
 0x318   : > { %v2235_v16 = vmax.f32 %v2081_v12, 0.0  ;;  %v2076_v13 = vadd.f32 %v5936_v5, %v2075_v10 }
 0x319   : > { %v4464_v20 = vpop.f32.mrf.mxu0 }
 0x31a   : > { %2267 = vst.msk [vmem:[#allocation2 + $0x21] sm:$0xff] %vm171_vm0, %v2235_v16  ;;  %v2234_v41 = vmax.f32 %v2076_v13, 0.0  ;;  %v2091_v17 = vadd.f32 %v4464_v20, %v5936_v5 }
 0x31b   : > { %v2085_v24 = vpop.f32.mrf.mxu0 }
 0x31c   : > { %2266 = vst.msk [vmem:[#allocation2 + $0x19] sm:$0xff] %vm171_vm0, %v2234_v41  ;;  %v2237_v42 = vmax.f32 %v2091_v17, 0.0  ;;  %v2086_v21 = vadd.f32 %v5936_v5, %v2085_v24 }
 0x31d   : > { %v4467_v33 = vpop.f32.mrf.mxu0 }
 0x31e   : > { %2269 = vst.msk [vmem:[#allocation2 + $0x39] sm:$0xff] %vm171_vm0, %v2237_v42  ;;  %v2236_v43 = vmax.f32 %v2086_v21, 0.0  ;;  %v2101_v25 = vadd.f32 %v4467_v33, %v5936_v5 }
 0x31f   : > { %v2095_v44 = vpop.f32.mrf.mxu0 }
 0x320   : > { %2268 = vst.msk [vmem:[#allocation2 + $0x31] sm:$0xff] %vm171_vm0, %v2236_v43  ;;  %v2239_v48 = vmax.f32 %v2101_v25, 0.0  ;;  %v2096_v51 = vadd.f32 %v5936_v5, %v2095_v44 }
 0x321   : > { %v4470_v36 = vpop.f32.mrf.mxu0  ;;  %v5950_v53 = vld [vmem:[#allocation2 + $0x21] sm:$0xff] }
 0x322   : > { %2271 = vst.msk [vmem:[#allocation2 + $0x51] sm:$0xff] %vm171_vm0, %v2239_v48  ;;  %v2238_v56 = vmax.f32 %v2096_v51, 0.0  ;;  %v2111_v9 = vadd.f32 %v4470_v36, %v5936_v5  ;;  %2432 = vrot.lane.b32.xlu1 %v5950_v53, %s4613_s18 }
 0x323   : > { %v2105_v11 = vpop.f32.mrf.mxu0  ;;  %v5956_v14 = vld [vmem:[#allocation2 + $0x19] sm:$0xff] }
 0x324   : > { %v5958_v15 = vld [vmem:[#allocation2 + $0x20] sm:$0xff]  ;;  %2270 = vst.msk [vmem:[#allocation2 + $0x49] sm:$0xff] %vm171_vm0, %v2238_v56  ;;  %v2241_v0 = vmax.f32 %v2111_v9, 0.0  ;;  %v2106_v18 = vadd.f32 %v5936_v5, %v2105_v11  ;;  %2430 = vrot.lane.b32.xlu0 %v5956_v14, %s4613_s18  ;;  %v5966_v19 = vld [vmem:[#allocation2 + $0x18] sm:$0xff] }
 0x325   : > { %2333 = vst.msk [vmem:[#allocation3 + $0x18] sm:$0xff] %vm171_vm0, %v5958_v15  ;;  %v4473_v29 = vpop.f32.mrf.mxu0  ;;  %v5968_v22 = vld [vmem:[#allocation2 + $0x39] sm:$0xff]  ;;  %2332 = vst.msk [vmem:[#allocation3 + $0x10] sm:$0xff] %vm171_vm0, %v5966_v19 }
 0x326   : > { %2273 = vst.msk [vmem:[#allocation2 + $0x69] sm:$0xff] %vm171_vm0, %v2241_v0  ;;  %v2240_v30 = vmax.f32 %v2106_v18, 0.0  ;;  %v2121_v38 = vadd.f32 %v4473_v29, %v5936_v5  ;;  %2436 = vrot.lane.b32.xlu1 %v5968_v22, %s4613_s18 }
 0x327   : > { %v2115_v23 = vpop.f32.mrf.mxu0  ;;  %v5976_v49 = vld [vmem:[#allocation2 + $0x31] sm:$0xff] }
 0x328   : > { %v5978_v47 = vld [vmem:[#allocation2 + $0x38] sm:$0xff]  ;;  %2272 = vst.msk [vmem:[#allocation2 + $0x61] sm:$0xff] %vm171_vm0, %v2240_v30  ;;  %v2243_v26 = vmax.f32 %v2121_v38, 0.0  ;;  %v2116_v27 = vadd.f32 %v5936_v5, %v2115_v23  ;;  %2434 = vrot.lane.b32.xlu0 %v5976_v49, %s4613_s18  ;;  %v5986_v28 = vld [vmem:[#allocation2 + $0x30] sm:$0xff] }
 0x329   : > { %2335 = vst.msk [vmem:[#allocation3 + $0x28] sm:$0xff] %vm171_vm0, %v5978_v47  ;;  %v4476_v46 = vpop.f32.mrf.mxu0  ;;  %v5988_v37 = vld [vmem:[#allocation2 + $0x51] sm:$0xff]  ;;  %2334 = vst.msk [vmem:[#allocation3 + $0x20] sm:$0xff] %vm171_vm0, %v5986_v28 }
 0x32a   : > { %2275 = vst.msk [vmem:[#allocation2 + $0x81] sm:$0xff] %vm171_vm0, %v2243_v26  ;;  %v2242_v32 = vmax.f32 %v2116_v27, 0.0  ;;  %v2131_v34 = vadd.f32 %v4476_v46, %v5936_v5  ;;  %2440 = vrot.lane.b32.xlu1 %v5988_v37, %s4613_s18 }
 0x32b   : > { %v2125_v31 = vpop.f32.mrf.mxu0  ;;  %v5996_v35 = vld [vmem:[#allocation2 + $0x49] sm:$0xff] }
 0x32c   : > { %v5998_v45 = vld [vmem:[#allocation2 + $0x50] sm:$0xff]  ;;  %2274 = vst.msk [vmem:[#allocation2 + $0x79] sm:$0xff] %vm171_vm0, %v2242_v32  ;;  %v2245_v39 = vmax.f32 %v2131_v34, 0.0  ;;  %v2126_v50 = vadd.f32 %v5936_v5, %v2125_v31  ;;  %2438 = vrot.lane.b32.xlu0 %v5996_v35, %s4613_s18  ;;  %v6006_v40 = vld [vmem:[#allocation2 + $0x48] sm:$0xff] }
 0x32d   : > { %2337 = vst.msk [vmem:[#allocation3 + $0x38] sm:$0xff] %vm171_vm0, %v5998_v45  ;;  %v4479_v54 = vpop.f32.mrf.mxu0  ;;  %v6008_v52 = vld [vmem:[#allocation2 + $0x69] sm:$0xff]  ;;  %2336 = vst.msk [vmem:[#allocation3 + $0x30] sm:$0xff] %vm171_vm0, %v6006_v40 }
 0x32e   : > { %2277 = vst.msk [vmem:[#allocation2 + $0x99] sm:$0xff] %vm171_vm0, %v2245_v39  ;;  %v2244_v57 = vmax.f32 %v2126_v50, 0.0  ;;  %v2141_v55 = vadd.f32 %v4479_v54, %v5936_v5  ;;  %2444 = vrot.lane.b32.xlu1 %v6008_v52, %s4613_s18 }
 0x32f   : > { %v2135_v59 = vpop.f32.mrf.mxu0  ;;  %v6016_v58 = vld [vmem:[#allocation2 + $0x61] sm:$0xff] }
 0x330   : > { %v6018_v61 = vld [vmem:[#allocation2 + $0x68] sm:$0xff]  ;;  %2276 = vst.msk [vmem:[#allocation2 + $0x91] sm:$0xff] %vm171_vm0, %v2244_v57  ;;  %v2247_v60 = vmax.f32 %v2141_v55, 0.0  ;;  %v2136_v63 = vadd.f32 %v5936_v5, %v2135_v59  ;;  %2442 = vrot.lane.b32.xlu0 %v6016_v58, %s4613_s18  ;;  %v6026_v62 = vld [vmem:[#allocation2 + $0x60] sm:$0xff] }
 0x331   : > { %2339 = vst.msk [vmem:[#allocation3 + $0x48] sm:$0xff] %vm171_vm0, %v6018_v61  ;;  %v4482_v2 = vpop.f32.mrf.mxu0  ;;  %v6028_v1 = vld [vmem:[#allocation2 + $0x81] sm:$0xff]  ;;  %2338 = vst.msk [vmem:[#allocation3 + $0x40] sm:$0xff] %vm171_vm0, %v6026_v62 }
 0x332   : > { %2279 = vst.msk [vmem:[#allocation2 + $0xb1] sm:$0xff] %vm171_vm0, %v2247_v60  ;;  %v2246_v4 = vmax.f32 %v2136_v63, 0.0  ;;  %v2151_v3 = vadd.f32 %v4482_v2, %v5936_v5  ;;  %2448 = vrot.lane.b32.xlu1 %v6028_v1, %s4613_s18 }
 0x333   : > { %v2145_v6 = vpop.f32.mrf.mxu0  ;;  %v6036_v8 = vld [vmem:[#allocation2 + $0x79] sm:$0xff] }
 0x334   : > { %v6038_v7 = vld [vmem:[#allocation2 + $0x80] sm:$0xff]  ;;  %2278 = vst.msk [vmem:[#allocation2 + $0xa9] sm:$0xff] %vm171_vm0, %v2246_v4  ;;  %v2249_v12 = vmax.f32 %v2151_v3, 0.0  ;;  %v2146_v10 = vadd.f32 %v5936_v5, %v2145_v6  ;;  %2446 = vrot.lane.b32.xlu0 %v6036_v8, %s4613_s18  ;;  %v6046_v16 = vld [vmem:[#allocation2 + $0x78] sm:$0xff] }
 0x335   : > { %2341 = vst.msk [vmem:[#allocation3 + $0x58] sm:$0xff] %vm171_vm0, %v6038_v7  ;;  %v2375_v13 = vld [vmem:[#allocation2 + $0x99] sm:$0xff]  ;;  %2340 = vst.msk [vmem:[#allocation3 + $0x50] sm:$0xff] %vm171_vm0, %v6046_v16 }
 0x336   : > { %2281 = vst.msk [vmem:[#allocation2 + $0xc9] sm:$0xff] %vm171_vm0, %v2249_v12  ;;  %v2248_v20 = vmax.f32 %v2146_v10, 0.0  ;;  %2452 = vrot.lane.b32.xlu1 %v2375_v13, %s4613_s18 }
 0x337   : > { %v2374_v41 = vld [vmem:[#allocation2 + $0x91] sm:$0xff] }
 0x338   : > { %v6052_v17 = vld [vmem:[#allocation2 + $0x98] sm:$0xff]  ;;  %2280 = vst.msk [vmem:[#allocation2 + $0xc1] sm:$0xff] %vm171_vm0, %v2248_v20  ;;  %v4485_v24 = vpop.f32.mrf.mxu0  ;;  %2450 = vrot.lane.b32.xlu0 %v2374_v41, %s4613_s18  ;;  %v6058_v42 = vld [vmem:[#allocation2 + $0x90] sm:$0xff] }
 0x339   : > { %2343 = vst.msk [vmem:[#allocation3 + $0x68] sm:$0xff] %vm171_vm0, %v6052_v17  ;;  %v2161_v21 = vadd.f32 %v4485_v24, %v5936_v5  ;;  %v2377_v33 = vld [vmem:[#allocation2 + $0xb1] sm:$0xff]  ;;  %2342 = vst.msk [vmem:[#allocation3 + $0x60] sm:$0xff] %vm171_vm0, %v6058_v42 }
 0x33a   : > { %v2155_v43 = vpop.f32.mrf.mxu0  ;;  %2456 = vrot.lane.b32.xlu1 %v2377_v33, %s4613_s18 }
 0x33b   : > { %v2251_v25 = vmax.f32 %v2161_v21, 0.0  ;;  %v2156_v44 = vadd.f32 %v5936_v5, %v2155_v43  ;;  %v2376_v48 = vld [vmem:[#allocation2 + $0xa9] sm:$0xff] }
 0x33c   : > { %v6065_v51 = vld [vmem:[#allocation2 + $0xb0] sm:$0xff]  ;;  %2454 = vrot.lane.b32.xlu0 %v2376_v48, %s4613_s18  ;;  %v6070_v36 = vld [vmem:[#allocation2 + $0xa8] sm:$0xff] }
 0x33d   : > { %2345 = vst.msk [vmem:[#allocation3 + $0x78] sm:$0xff] %vm171_vm0, %v6065_v51  ;;  %2283 = vst.msk [vmem:[#allocation2 + $0xe1] sm:$0xff] %vm171_vm0, %v2251_v25  ;;  %v2250_v56 = vmax.f32 %v2156_v44, 0.0  ;;  %v2379_v9 = vld [vmem:[#allocation2 + $0xc9] sm:$0xff] }
 0x33e   : > { %2344 = vst.msk [vmem:[#allocation3 + $0x70] sm:$0xff] %vm171_vm0, %v6070_v36  ;;  %2460 = vrot.lane.b32.xlu1 %v2379_v9, %s4613_s18 }
 0x33f   : > { %2282 = vst.msk [vmem:[#allocation2 + $0xd9] sm:$0xff] %vm171_vm0, %v2250_v56  ;;  %v2378_v11 = vld [vmem:[#allocation2 + $0xc1] sm:$0xff] }
 0x340   : > { %v6077_v0 = vld [vmem:[#allocation2 + $0xc8] sm:$0xff]  ;;  %v4488_v18 = vpop.f32.mrf.mxu0  ;;  %2458 = vrot.lane.b32.xlu0 %v2378_v11, %s4613_s18  ;;  %v6082_v29 = vld [vmem:[#allocation2 + $0xc0] sm:$0xff] }
 0x341   : > { %2347 = vst.msk [vmem:[#allocation3 + $0x88] sm:$0xff] %vm171_vm0, %v6077_v0  ;;  %v2171_v30 = vadd.f32 %v4488_v18, %v5936_v5  ;;  %2346 = vst.msk [vmem:[#allocation3 + $0x80] sm:$0xff] %vm171_vm0, %v6082_v29 }
 0x342   : > { %v2165_v38 = vpop.f32.mrf.mxu0 }
 0x343   : > { %v2253_v23 = vmax.f32 %v2171_v30, 0.0  ;;  %v2166_v26 = vadd.f32 %v5936_v5, %v2165_v38 }
 0x344   : > { %v2381_v27 = vld [vmem:[#allocation2 + $0xe1] sm:$0xff] }
 0x345   : > { %2285 = vst.msk [vmem:[#allocation2 + $0xf9] sm:$0xff] %vm171_vm0, %v2253_v23  ;;  %v2252_v46 = vmax.f32 %v2166_v26, 0.0  ;;  %2464 = vrot.lane.b32.xlu1 %v2381_v27, %s4613_s18 }
 0x346   : > { %v2380_v32 = vld [vmem:[#allocation2 + $0xd9] sm:$0xff] }
 0x347   : > { %v6090_v34 = vld [vmem:[#allocation2 + $0xe0] sm:$0xff]  ;;  %2284 = vst.msk [vmem:[#allocation2 + $0xf1] sm:$0xff] %vm171_vm0, %v2252_v46  ;;  %2462 = vrot.lane.b32.xlu0 %v2380_v32, %s4613_s18  ;;  %v6096_v31 = vld [vmem:[#allocation2 + $0xd8] sm:$0xff] }
 0x348   : > { %2349 = vst.msk [vmem:[#allocation3 + $0x98] sm:$0xff] %vm171_vm0, %v6090_v34  ;;  %v4491_v39 = vpop.f32.mrf.mxu0  ;;  %2348 = vst.msk [vmem:[#allocation3 + $0x90] sm:$0xff] %vm171_vm0, %v6096_v31 }
 0x349   : > { %v2181_v50 = vadd.f32 %v4491_v39, %v5936_v5 }
 0x34a   : > { %v2175_v54 = vpop.f32.mrf.mxu0 }
 0x34b   : > { %v2255_v57 = vmax.f32 %v2181_v50, 0.0  ;;  %v2176_v55 = vadd.f32 %v5936_v5, %v2175_v54 }
 0x34c   : > { %v2383_v59 = vld [vmem:[#allocation2 + $0xf9] sm:$0xff] }
 0x34d   : > { %2287 = vst.msk [vmem:[#allocation2 + $0x111] sm:$0xff] %vm171_vm0, %v2255_v57  ;;  %v2254_v60 = vmax.f32 %v2176_v55, 0.0  ;;  %2468 = vrot.lane.b32.xlu1 %v2383_v59, %s4613_s18 }
 0x34e   : > { %v2382_v63 = vld [vmem:[#allocation2 + $0xf1] sm:$0xff] }
 0x34f   : > { %v6104_v2 = vld [vmem:[#allocation2 + $0xf8] sm:$0xff]  ;;  %2286 = vst.msk [vmem:[#allocation2 + $0x109] sm:$0xff] %vm171_vm0, %v2254_v60  ;;  %2466 = vrot.lane.b32.xlu0 %v2382_v63, %s4613_s18  ;;  %v6110_v4 = vld [vmem:[#allocation2 + $0xf0] sm:$0xff] }
 0x350   : > { %2351 = vst.msk [vmem:[#allocation3 + $0xa8] sm:$0xff] %vm171_vm0, %v6104_v2  ;;  %v4494_v3 = vpop.f32.mrf.mxu0  ;;  %2350 = vst.msk [vmem:[#allocation3 + $0xa0] sm:$0xff] %vm171_vm0, %v6110_v4 }
 0x351   : > { %v2191_v6 = vadd.f32 %v4494_v3, %v5936_v5 }
 0x352   : > { %v2185_v12 = vpop.f32.mrf.mxu0 }
 0x353   : > { %v2257_v10 = vmax.f32 %v2191_v6, 0.0  ;;  %v2186_v13 = vadd.f32 %v5936_v5, %v2185_v12 }
 0x354   : > { %v2385_v20 = vld [vmem:[#allocation2 + $0x111] sm:$0xff] }
 0x355   : > { %2289 = vst.msk [vmem:[#allocation2 + $0x129] sm:$0xff] %vm171_vm0, %v2257_v10  ;;  %v2256_v41 = vmax.f32 %v2186_v13, 0.0  ;;  %2472 = vrot.lane.b32.xlu1 %v2385_v20, %s4613_s18 }
 0x356   : > { %v2384_v24 = vld [vmem:[#allocation2 + $0x109] sm:$0xff] }
 0x357   : > { %v6118_v21 = vld [vmem:[#allocation2 + $0x110] sm:$0xff]  ;;  %2288 = vst.msk [vmem:[#allocation2 + $0x121] sm:$0xff] %vm171_vm0, %v2256_v41  ;;  %2470 = vrot.lane.b32.xlu0 %v2384_v24, %s4613_s18  ;;  %v6124_v33 = vld [vmem:[#allocation2 + $0x108] sm:$0xff] }
 0x358   : > { %2353 = vst.msk [vmem:[#allocation3 + $0xb8] sm:$0xff] %vm171_vm0, %v6118_v21  ;;  %v4497_v43 = vpop.f32.mrf.mxu0  ;;  %2352 = vst.msk [vmem:[#allocation3 + $0xb0] sm:$0xff] %vm171_vm0, %v6124_v33 }
 0x359   : > { %v2201_v25 = vadd.f32 %v4497_v43, %v5936_v5 }
 0x35a   : > { %v2195_v44 = vpop.f32.mrf.mxu0 }
 0x35b   : > { %v2259_v48 = vmax.f32 %v2201_v25, 0.0  ;;  %v2196_v56 = vadd.f32 %v5936_v5, %v2195_v44  ;;  %v2555_v25 = vld [vmem:[#allocation2 + $0xa] sm:$0xff] }
 0x35c   : > { %v2387_v9 = vld [vmem:[#allocation2 + $0x129] sm:$0xff] }
 0x35d   : > { %2291 = vst.msk [vmem:[#allocation2 + $0x141] sm:$0xff] %vm171_vm0, %v2259_v48  ;;  %v2258_v11 = vmax.f32 %v2196_v56, 0.0  ;;  %2476 = vrot.lane.b32.xlu1 %v2387_v9, %s4613_s18  ;;  %v2554_v56 = vld [vmem:[#allocation2 + $0x2] sm:$0xff] }
 0x35e   : > { %v2386_v18 = vld [vmem:[#allocation2 + $0x121] sm:$0xff] }
 0x35f   : > { %v6132_v30 = vld [vmem:[#allocation2 + $0x128] sm:$0xff]  ;;  %2290 = vst.msk [vmem:[#allocation2 + $0x139] sm:$0xff] %vm171_vm0, %v2258_v11  ;;  %2474 = vrot.lane.b32.xlu0 %v2386_v18, %s4613_s18  ;;  %v6138_v38 = vld [vmem:[#allocation2 + $0x120] sm:$0xff] }
 0x360   : > { %2355 = vst.msk [vmem:[#allocation3 + $0xc8] sm:$0xff] %vm171_vm0, %v6132_v30  ;;  %v4500_v23 = vpop.f32.mrf.mxu0  ;;  %2354 = vst.msk [vmem:[#allocation3 + $0xc0] sm:$0xff] %vm171_vm0, %v6138_v38  ;;  %v6173_v9 = vld [vmem:[#allocation2 + $0x22] sm:$0xff]  ;;  %v6177_v11 = vld [vmem:[#allocation2 + $0x1a] sm:$0xff] }
 0x361   : > { %v2211_v26 = vadd.f32 %v4500_v23, %v5936_v5  ;;  %v6181_v18 = vld [vmem:[#allocation2 + $0x3a] sm:$0xff]  ;;  %v6185_v23 = vld [vmem:[#allocation2 + $0x32] sm:$0xff] }
 0x362   : > { %v2205_v27 = vpop.f32.mrf.mxu0 }
 0x363   : > { %v2261_v46 = vmax.f32 %v2211_v26, 0.0  ;;  %v2206_v32 = vadd.f32 %v5936_v5, %v2205_v27  ;;  %v6189_v26 = vld [vmem:[#allocation2 + $0x52] sm:$0xff]  ;;  %v6193_v27 = vld [vmem:[#allocation2 + $0x4a] sm:$0xff] }
 0x364   : > { %v2389_v39 = vld [vmem:[#allocation2 + $0x141] sm:$0xff] }
 0x365   : > { %2293 = vst.msk [vmem:[#allocation2 + $0x159] sm:$0xff] %vm171_vm0, %v2261_v46  ;;  %v2260_v50 = vmax.f32 %v2206_v32, 0.0  ;;  %2480 = vrot.lane.b32.xlu1 %v2389_v39, %s4613_s18  ;;  %v6197_v46 = vld [vmem:[#allocation2 + $0x6a] sm:$0xff]  ;;  %v6201_v32 = vld [vmem:[#allocation2 + $0x62] sm:$0xff] }
 0x366   : > { %v2388_v54 = vld [vmem:[#allocation2 + $0x139] sm:$0xff]  ;;  %v6205_v39 = vld [vmem:[#allocation2 + $0x82] sm:$0xff] }
 0x367   : > { %v6146_v57 = vld [vmem:[#allocation2 + $0x140] sm:$0xff]  ;;  %2292 = vst.msk [vmem:[#allocation2 + $0x151] sm:$0xff] %vm171_vm0, %v2260_v50  ;;  %2478 = vrot.lane.b32.xlu0 %v2388_v54, %s4613_s18  ;;  %v6152_v55 = vld [vmem:[#allocation2 + $0x138] sm:$0xff] }
 0x368   : > { %2357 = vst.msk [vmem:[#allocation3 + $0xd8] sm:$0xff] %vm171_vm0, %v6146_v57  ;;  %v4503_v59 = vpop.f32.mrf.mxu0  ;;  %2356 = vst.msk [vmem:[#allocation3 + $0xd0] sm:$0xff] %vm171_vm0, %v6152_v55  ;;  %v6209_v50 = vld [vmem:[#allocation2 + $0x7a] sm:$0xff] }
 0x369   : > { %v2221_v60 = vadd.f32 %v4503_v59, %v5936_v5  ;;  %v6213_v54 = vld [vmem:[#allocation2 + $0x9a] sm:$0xff]  ;;  %v6217_v59 = vld [vmem:[#allocation2 + $0x92] sm:$0xff] }
 0x36a   : > { %v2215_v63 = vpop.f32.mrf.mxu0 }
 0x36b   : > { %v2263_v3 = vmax.f32 %v2221_v60, 0.0  ;;  %v2216_v6 = vadd.f32 %v5936_v5, %v2215_v63  ;;  %v6221_v60 = vld [vmem:[#allocation2 + $0xb2] sm:$0xff] }
 0x36c   : > { %v2391_v12 = vld [vmem:[#allocation2 + $0x159] sm:$0xff] }
 0x36d   : > { %2295 = vst.msk [vmem:[#allocation2 + $0x171] sm:$0xff] %vm171_vm0, %v2263_v3  ;;  %v2262_v10 = vmax.f32 %v2216_v6, 0.0  ;;  %2484 = vrot.lane.b32.xlu1 %v2391_v12, %s4613_s18  ;;  %v6226_v6 = vld [vmem:[#allocation2 + $0xaa] sm:$0xff] }
 0x36e   : > { %v2390_v13 = vld [vmem:[#allocation2 + $0x151] sm:$0xff] }
 0x36f   : > { %v2327_v20 = vld [vmem:[#allocation2 + $0x158] sm:$0xff]  ;;  %2294 = vst.msk [vmem:[#allocation2 + $0x169] sm:$0xff] %vm171_vm0, %v2262_v10  ;;  %2482 = vrot.lane.b32.xlu0 %v2390_v13, %s4613_s18  ;;  %v6163_v41 = vld [vmem:[#allocation2 + $0x150] sm:$0xff] }
 0x370   : > { %2359 = vst.msk [vmem:[#allocation3 + $0xe8] sm:$0xff] %vm171_vm0, %v2327_v20  ;;  %2358 = vst.msk [vmem:[#allocation3 + $0xe0] sm:$0xff] %vm171_vm0, %v6163_v41  ;;  %v2571_v12 = vld [vmem:[#allocation2 + $0xca] sm:$0xff]  ;;  %v2570_v20 = vld [vmem:[#allocation2 + $0xc2] sm:$0xff] }
 0x374   : > { %v2393_v24 = vld [vmem:[#allocation2 + $0x171] sm:$0xff] }
 0x375   : > { %2488 = vrot.lane.b32.xlu1 %v2393_v24, %s4613_s18  ;;  %v2573_v24 = vld [vmem:[#allocation2 + $0xe2] sm:$0xff] }
 0x376   : > { %v2392_v43 = vld [vmem:[#allocation2 + $0x169] sm:$0xff] }
 0x377   : > { %v2329_v44 = vld [vmem:[#allocation2 + $0x170] sm:$0xff]  ;;  %2486 = vrot.lane.b32.xlu0 %v2392_v43, %s4613_s18  ;;  %v2328_v48 = vld [vmem:[#allocation2 + $0x168] sm:$0xff] }
 0x378   : > { %2361 = vst.msk [vmem:[#allocation3 + $0xf8] sm:$0xff] %vm171_vm0, %v2329_v44  ;;  %2360 = vst.msk [vmem:[#allocation3 + $0xf0] sm:$0xff] %vm171_vm0, %v2328_v48  ;;  %v2572_v44 = vld [vmem:[#allocation2 + $0xda] sm:$0xff] }
 0x379   : > { %2620 = vrot.lane.b32.xlu1 %v2555_v25, %s4614_s19  ;;  %v2575_v48 = vld [vmem:[#allocation2 + $0xfa] sm:$0xff] }
 0x37b   : > { %2618 = vrot.lane.b32.xlu0 %v2554_v56, %s4614_s19 }
 0x37d   : > { %2624 = vrot.lane.b32.xlu1 %v6173_v9, %s4614_s19 }
 0x37f   : > { %2622 = vrot.lane.b32.xlu0 %v6177_v11, %s4614_s19 }
 0x381   : > { %2628 = vrot.lane.b32.xlu1 %v6181_v18, %s4614_s19 }
 0x383   : > { %2626 = vrot.lane.b32.xlu0 %v6185_v23, %s4614_s19 }
 0x385   : > { %2632 = vrot.lane.b32.xlu1 %v6189_v26, %s4614_s19 }
 0x387   : > { %2630 = vrot.lane.b32.xlu0 %v6193_v27, %s4614_s19 }
 0x389   : > { %2636 = vrot.lane.b32.xlu1 %v6197_v46, %s4614_s19 }
 0x38b   : > { %2634 = vrot.lane.b32.xlu0 %v6201_v32, %s4614_s19 }
 0x38d   : > { %2640 = vrot.lane.b32.xlu1 %v6205_v39, %s4614_s19 }
 0x38f   : > { %2638 = vrot.lane.b32.xlu0 %v6209_v50, %s4614_s19 }
 0x391   : > { %2644 = vrot.lane.b32.xlu1 %v6213_v54, %s4614_s19 }
 0x393   : > { %2642 = vrot.lane.b32.xlu0 %v6217_v59, %s4614_s19 }
 0x394   : > { %v2433_v63 = vpop.permute.xlu1 %2432 }
 0x395   : > { %2648 = vrot.lane.b32.xlu1 %v6221_v60, %s4614_s19  ;;  %2525 = vst.msk [vmem:[#allocation3 + $0x18] sm:$0xff] %vm569_vm6, %v2433_v63 }
 0x396   : > { %v2431_v3 = vpop.permute.xlu0 %2430 }
 0x397   : > { %2524 = vst.msk [vmem:[#allocation3 + $0x10] sm:$0xff] %vm569_vm6, %v2431_v3  ;;  %2646 = vrot.lane.b32.xlu0 %v6226_v6, %s4614_s19  ;;  %v2574_v3 = vld [vmem:[#allocation2 + $0xf2] sm:$0xff] }
 0x398   : > { %v2437_v10 = vpop.permute.xlu1 %2436 }
 0x399   : > { %2652 = vrot.lane.b32.xlu1 %v2571_v12, %s4614_s19  ;;  %2527 = vst.msk [vmem:[#allocation3 + $0x28] sm:$0xff] %vm569_vm6, %v2437_v10  ;;  %v2577_v12 = vld [vmem:[#allocation2 + $0x112] sm:$0xff] }
 0x39a   : > { %v2435_v13 = vpop.permute.xlu0 %2434 }
 0x39b   : > { %2526 = vst.msk [vmem:[#allocation3 + $0x20] sm:$0xff] %vm569_vm6, %v2435_v13  ;;  %2650 = vrot.lane.b32.xlu0 %v2570_v20, %s4614_s19  ;;  %v2576_v20 = vld [vmem:[#allocation2 + $0x10a] sm:$0xff] }
 0x39c   : > { %v2441_v43 = vpop.permute.xlu1 %2440 }
 0x39d   : > { %2656 = vrot.lane.b32.xlu1 %v2573_v24, %s4614_s19  ;;  %2529 = vst.msk [vmem:[#allocation3 + $0x38] sm:$0xff] %vm569_vm6, %v2441_v43  ;;  %v2579_v24 = vld [vmem:[#allocation2 + $0x12a] sm:$0xff] }
 0x39e   : > { %v2439_v25 = vpop.permute.xlu0 %2438 }
 0x39f   : > { %2528 = vst.msk [vmem:[#allocation3 + $0x30] sm:$0xff] %vm569_vm6, %v2439_v25  ;;  %2654 = vrot.lane.b32.xlu0 %v2572_v44, %s4614_s19  ;;  %v2578_v44 = vld [vmem:[#allocation2 + $0x122] sm:$0xff] }
 0x3a0   : > { %v2445_v56 = vpop.permute.xlu1 %2444 }
 0x3a1   : > { %2660 = vrot.lane.b32.xlu1 %v2575_v48, %s4614_s19  ;;  %2531 = vst.msk [vmem:[#allocation3 + $0x48] sm:$0xff] %vm569_vm6, %v2445_v56  ;;  %v2581_v48 = vld [vmem:[#allocation2 + $0x142] sm:$0xff] }
 0x3a2   : > { %v2443_v63 = vpop.permute.xlu0 %2442 }
 0x3a3   : > { %2530 = vst.msk [vmem:[#allocation3 + $0x40] sm:$0xff] %vm569_vm6, %v2443_v63  ;;  %2658 = vrot.lane.b32.xlu0 %v2574_v3, %s4614_s19  ;;  %v2580_v3 = vld [vmem:[#allocation2 + $0x13a] sm:$0xff] }
 0x3a4   : > { %v2449_v10 = vpop.permute.xlu1 %2448 }
 0x3a5   : > { %2664 = vrot.lane.b32.xlu1 %v2577_v12, %s4614_s19  ;;  %2533 = vst.msk [vmem:[#allocation3 + $0x58] sm:$0xff] %vm569_vm6, %v2449_v10  ;;  %v2583_v12 = vld [vmem:[#allocation2 + $0x15a] sm:$0xff] }
 0x3a6   : > { %v2447_v13 = vpop.permute.xlu0 %2446 }
 0x3a7   : > { %2532 = vst.msk [vmem:[#allocation3 + $0x50] sm:$0xff] %vm569_vm6, %v2447_v13  ;;  %2662 = vrot.lane.b32.xlu0 %v2576_v20, %s4614_s19  ;;  %v2582_v20 = vld [vmem:[#allocation2 + $0x152] sm:$0xff] }
 0x3a8   : > { %v2453_v43 = vpop.permute.xlu1 %2452 }
 0x3a9   : > { %2668 = vrot.lane.b32.xlu1 %v2579_v24, %s4614_s19  ;;  %2535 = vst.msk [vmem:[#allocation3 + $0x68] sm:$0xff] %vm569_vm6, %v2453_v43  ;;  %v2585_v24 = vld [vmem:[#allocation2 + $0x172] sm:$0xff]  ;;  %v2584_v43 = vld [vmem:[#allocation2 + $0x16a] sm:$0xff] }
 0x3aa   : > { %v2451_v25 = vpop.permute.xlu0 %2450 }
 0x3ab   : > { %2534 = vst.msk [vmem:[#allocation3 + $0x60] sm:$0xff] %vm569_vm6, %v2451_v25  ;;  %2666 = vrot.lane.b32.xlu0 %v2578_v44, %s4614_s19 }
 0x3ac   : > { %v2457_v56 = vpop.permute.xlu1 %2456 }
 0x3ad   : > { %2672 = vrot.lane.b32.xlu1 %v2581_v48, %s4614_s19  ;;  %2537 = vst.msk [vmem:[#allocation3 + $0x78] sm:$0xff] %vm569_vm6, %v2457_v56 }
 0x3ae   : > { %v2455_v63 = vpop.permute.xlu0 %2454 }
 0x3af   : > { %2536 = vst.msk [vmem:[#allocation3 + $0x70] sm:$0xff] %vm569_vm6, %v2455_v63  ;;  %2670 = vrot.lane.b32.xlu0 %v2580_v3, %s4614_s19 }
 0x3b0   : > { %v2461_v10 = vpop.permute.xlu1 %2460 }
 0x3b1   : > { %2676 = vrot.lane.b32.xlu1 %v2583_v12, %s4614_s19  ;;  %2539 = vst.msk [vmem:[#allocation3 + $0x88] sm:$0xff] %vm569_vm6, %v2461_v10 }
 0x3b2   : > { %v2459_v13 = vpop.permute.xlu0 %2458 }
 0x3b3   : > { %2538 = vst.msk [vmem:[#allocation3 + $0x80] sm:$0xff] %vm569_vm6, %v2459_v13  ;;  %2674 = vrot.lane.b32.xlu0 %v2582_v20, %s4614_s19  ;;  %v4324_v20 = vld [vmem:[%s6942_s1 + $0xf8] sm:$0xff] }
 0x3b4   : > { %4507 = vmatprep.subr.mxu1 %v4324_v20 }
 0x3b5   : > { %2680 = vrot.lane.b32.xlu1 %v2585_v24, %s4614_s19  ;;  %4508 = vmatpush3.msra.mxu1 %v4324_v20  ;;  %v4314_v20 = vld [vmem:[%s6942_s1 + $0xa8] sm:$0xff] }
 0x3b7   : > { %v2465_v25 = vpop.permute.xlu1 %2464  ;;  %2678 = vrot.lane.b32.xlu0 %v2584_v43, %s4614_s19  ;;  %v4323_v43 = vld [vmem:[%s6942_s1 + $0xf0] sm:$0xff] }
 0x3b8   : > { %2541 = vst.msk [vmem:[#allocation3 + $0x98] sm:$0xff] %vm569_vm6, %v2465_v25  ;;  %4509 = vmatprep.subr.mxu1 %v4323_v43  ;;  %v4322_v25 = vld [vmem:[%s6942_s1 + $0xe8] sm:$0xff] }
 0x3b9   : > { %2812 = vrot.lane.b32.xlu1 %v5958_v15, %s4615_s20  ;;  %v2463_v44 = vpop.permute.xlu0 %2462  ;;  %4510 = vmatpush3.msra.mxu1 %v4323_v43 }
 0x3ba   : > { %2540 = vst.msk [vmem:[#allocation3 + $0x90] sm:$0xff] %vm569_vm6, %v2463_v44  ;;  %4511 = vmatprep.subr.mxu1 %v4322_v25 }
 0x3bb   : > { %2810 = vrot.lane.b32.xlu0 %v5966_v19, %s4615_s20  ;;  %4512 = vmatpush3.msra.mxu1 %v4322_v25 }
 0x3bd   : > { %2816 = vrot.lane.b32.xlu1 %v5978_v47, %s4615_s20 }
 0x3bf   : > { %v2469_v48 = vpop.permute.xlu1 %2468  ;;  %2814 = vrot.lane.b32.xlu0 %v5986_v28, %s4615_s20 }
 0x3c0   : > { %2543 = vst.msk [vmem:[#allocation3 + $0xa8] sm:$0xff] %vm569_vm6, %v2469_v48 }
 0x3c1   : > { %2820 = vrot.lane.b32.xlu1 %v5998_v45, %s4615_s20  ;;  %v2467_v56 = vpop.permute.xlu0 %2466 }
 0x3c2   : > { %2542 = vst.msk [vmem:[#allocation3 + $0xa0] sm:$0xff] %vm569_vm6, %v2467_v56 }
 0x3c3   : > { %2818 = vrot.lane.b32.xlu0 %v6006_v40, %s4615_s20 }
 0x3c5   : > { %2824 = vrot.lane.b32.xlu1 %v6018_v61, %s4615_s20 }
 0x3c7   : > { %v2473_v15 = vpop.permute.xlu1 %2472  ;;  %2822 = vrot.lane.b32.xlu0 %v6026_v62, %s4615_s20 }
 0x3c8   : > { %2545 = vst.msk [vmem:[#allocation3 + $0xb8] sm:$0xff] %vm569_vm6, %v2473_v15 }
 0x3c9   : > { %2828 = vrot.lane.b32.xlu1 %v6038_v7, %s4615_s20  ;;  %v2471_v19 = vpop.permute.xlu0 %2470 }
 0x3ca   : > { %2544 = vst.msk [vmem:[#allocation3 + $0xb0] sm:$0xff] %vm569_vm6, %v2471_v19  ;;  %v4506_v19 = vpop.f32.mrf.mxu0 }
 0x3cb   : > { %2826 = vrot.lane.b32.xlu0 %v6046_v16, %s4615_s20 }
 0x3cd   : > { %2832 = vrot.lane.b32.xlu1 %v6052_v17, %s4615_s20 }
 0x3cf   : > { %v2477_v63 = vpop.permute.xlu1 %2476  ;;  %2830 = vrot.lane.b32.xlu0 %v6058_v42, %s4615_s20 }
 0x3d0   : > { %2547 = vst.msk [vmem:[#allocation3 + $0xc8] sm:$0xff] %vm569_vm6, %v2477_v63 }
 0x3d1   : > { %2836 = vrot.lane.b32.xlu1 %v6065_v51, %s4615_s20  ;;  %v2475_v3 = vpop.permute.xlu0 %2474 }
 0x3d2   : > { %2546 = vst.msk [vmem:[#allocation3 + $0xc0] sm:$0xff] %vm569_vm6, %v2475_v3  ;;  %v2231_v3 = vadd.f32 %v4506_v19, %v5936_v5 }
 0x3d3   : > { %2834 = vrot.lane.b32.xlu0 %v6070_v36, %s4615_s20 }
 0x3d5   : > { %2840 = vrot.lane.b32.xlu1 %v6077_v0, %s4615_s20 }
 0x3d7   : > { %v2481_v12 = vpop.permute.xlu1 %2480  ;;  %2838 = vrot.lane.b32.xlu0 %v6082_v29, %s4615_s20 }
 0x3d8   : > { %2549 = vst.msk [vmem:[#allocation3 + $0xd8] sm:$0xff] %vm569_vm6, %v2481_v12  ;;  %v2225_v12 = vpop.f32.mrf.mxu0 }
 0x3d9   : > { %2844 = vrot.lane.b32.xlu1 %v6090_v34, %s4615_s20  ;;  %v2479_v10 = vpop.permute.xlu0 %2478 }
 0x3da   : > { %2548 = vst.msk [vmem:[#allocation3 + $0xd0] sm:$0xff] %vm569_vm6, %v2479_v10 }
 0x3db   : > { %2842 = vrot.lane.b32.xlu0 %v6096_v31, %s4615_s20 }
 0x3dd   : > { %2848 = vrot.lane.b32.xlu1 %v6104_v2, %s4615_s20 }
 0x3df   : > { %v2485_v13 = vpop.permute.xlu1 %2484  ;;  %2846 = vrot.lane.b32.xlu0 %v6110_v4, %s4615_s20 }
 0x3e0   : > { %2551 = vst.msk [vmem:[#allocation3 + $0xe8] sm:$0xff] %vm569_vm6, %v2485_v13  ;;  %v2265_v13 = vmax.f32 %v2231_v3, 0.0 }
 0x3e1   : > { %2852 = vrot.lane.b32.xlu1 %v6118_v21, %s4615_s20  ;;  %v2483_v24 = vpop.permute.xlu0 %2482  ;;  %v4321_v21 = vld [vmem:[%s6942_s1 + $0xe0] sm:$0xff] }
 0x3e2   : > { %2550 = vst.msk [vmem:[#allocation3 + $0xe0] sm:$0xff] %vm569_vm6, %v2483_v24  ;;  %4513 = vmatprep.subr.mxu1 %v4321_v21 }
 0x3e3   : > { %2850 = vrot.lane.b32.xlu0 %v6124_v33, %s4615_s20  ;;  %4514 = vmatpush3.msra.mxu1 %v4321_v21  ;;  %v4320_v33 = vld [vmem:[%s6942_s1 + $0xd8] sm:$0xff]  ;;  %2297 = vst.msk [vmem:[#allocation2 + $0x189] sm:$0xff] %vm171_vm0, %v2265_v13 }
 0x3e4   : > { %4515 = vmatprep.subr.mxu1 %v4320_v33 }
 0x3e5   : > { %2856 = vrot.lane.b32.xlu1 %v6132_v30, %s4615_s20  ;;  %4516 = vmatpush3.msra.mxu1 %v4320_v33 }
 0x3e7   : > { %v2489_v44 = vpop.permute.xlu1 %2488  ;;  %2854 = vrot.lane.b32.xlu0 %v6138_v38, %s4615_s20  ;;  %v4319_v38 = vld [vmem:[%s6942_s1 + $0xd0] sm:$0xff] }
 0x3e8   : > { %2553 = vst.msk [vmem:[#allocation3 + $0xf8] sm:$0xff] %vm569_vm6, %v2489_v44  ;;  %4517 = vmatprep.subr.mxu1 %v4319_v38  ;;  %v4310_v44 = vld [vmem:[%s6942_s1 + $0x88] sm:$0xff] }
 0x3e9   : > { %2860 = vrot.lane.b32.xlu1 %v6146_v57, %s4615_s20  ;;  %v2487_v30 = vpop.permute.xlu0 %2486  ;;  %4518 = vmatpush3.msra.mxu1 %v4319_v38  ;;  %v4318_v57 = vld [vmem:[%s6942_s1 + $0xc8] sm:$0xff] }
 0x3ea   : > { %2552 = vst.msk [vmem:[#allocation3 + $0xf0] sm:$0xff] %vm569_vm6, %v2487_v30  ;;  %4519 = vmatprep.subr.mxu1 %v4318_v57 }
 0x3eb   : > { %v2621_v48 = vpop.permute.xlu1 %2620  ;;  %2858 = vrot.lane.b32.xlu0 %v6152_v55, %s4615_s20  ;;  %4520 = vmatpush3.msra.mxu1 %v4318_v57  ;;  %v4317_v55 = vld [vmem:[%s6942_s1 + $0xc0] sm:$0xff] }
 0x3ec   : > { %2715 = vst.msk [vmem:[#allocation3 + $0x8] sm:$0xff] %vm762_vm7, %v2621_v48  ;;  %4521 = vmatprep.subr.mxu1 %v4317_v55 }
 0x3ed   : > { %3002 = vrot.lane.b32.xlu1 %v5956_v14, %s4616_s21  ;;  %v2619_v56 = vpop.permute.xlu0 %2618  ;;  %4522 = vmatpush3.msra.mxu1 %v4317_v55  ;;  %v4316_v14 = vld [vmem:[%s6942_s1 + $0xb8] sm:$0xff] }
 0x3ee   : > { %2714 = vst.msk [vmem:[#allocation3] sm:$0xff] %vm762_vm7, %v2619_v56  ;;  %4523 = vmatprep.subr.mxu1 %v4316_v14 }
 0x3ef   : > { %v2625_v15 = vpop.permute.xlu1 %2624  ;;  %2862 = vrot.lane.b32.xlu0 %v6163_v41, %s4615_s20  ;;  %4524 = vmatpush3.msra.mxu1 %v4316_v14  ;;  %v4315_v41 = vld [vmem:[%s6942_s1 + $0xb0] sm:$0xff] }
 0x3f0   : > { %2717 = vst.msk [vmem:[#allocation3 + $0x18] sm:$0xff] %vm762_vm7, %v2625_v15  ;;  %4525 = vmatprep.subr.mxu1 %v4315_v41 }
 0x3f1   : > { %3194 = vrot.lane.b32.xlu1 %v6177_v11, %s4617_s22  ;;  %v2623_v63 = vpop.permute.xlu0 %2622  ;;  %v2226_v11 = vadd.f32 %v5936_v5, %v2225_v12  ;;  %4526 = vmatpush3.msra.mxu1 %v4315_v41  ;;  %v4313_v5 = vld [vmem:[%s6942_s1 + $0xa0] sm:$0xff] }
 0x3f2   : > { %2716 = vst.msk [vmem:[#allocation3 + $0x10] sm:$0xff] %vm762_vm7, %v2623_v63  ;;  %4527 = vmatprep.subr.mxu1 %v4314_v20 }
 0x3f3   : > { %v2629_v10 = vpop.permute.xlu1 %2628  ;;  %3004 = vrot.lane.b32.xlu0 %v5950_v53, %s4616_s21  ;;  %v2264_v43 = vmax.f32 %v2226_v11, 0.0  ;;  %4528 = vmatpush3.msra.mxu1 %v4314_v20 }
 0x3f4   : > { %2719 = vst.msk [vmem:[#allocation3 + $0x28] sm:$0xff] %vm762_vm7, %v2629_v10  ;;  %4529 = vmatprep.subr.mxu1 %v4313_v5 }
 0x3f5   : > { %3386 = vrot.lane.b32.xlu1 %v5986_v28, %s4618_s23  ;;  %v2627_v24 = vpop.permute.xlu0 %2626  ;;  %2296 = vst.msk [vmem:[#allocation2 + $0x181] sm:$0xff] %vm171_vm0, %v2264_v43  ;;  %4530 = vmatpush3.msra.mxu1 %v4313_v5  ;;  %v4312_v28 = vld [vmem:[%s6942_s1 + $0x98] sm:$0xff] }
 0x3f6   : > { %2718 = vst.msk [vmem:[#allocation3 + $0x20] sm:$0xff] %vm762_vm7, %v2627_v24  ;;  %4531 = vmatprep.subr.mxu1 %v4312_v28  ;;  %v3522_v5 = vld [vmem:[#allocation2 + $0x91] sm:$0xff] }
 0x3f7   : > { %v2633_v53 = vpop.permute.xlu1 %2632  ;;  %3196 = vrot.lane.b32.xlu0 %v6173_v9, %s4617_s22  ;;  %4532 = vmatpush3.msra.mxu1 %v4312_v28  ;;  %v4311_v9 = vld [vmem:[%s6942_s1 + $0x90] sm:$0xff] }
 0x3f8   : > { %2721 = vst.msk [vmem:[#allocation3 + $0x38] sm:$0xff] %vm762_vm7, %v2633_v53  ;;  %4533 = vmatprep.subr.mxu1 %v4311_v9 }
 0x3f9   : > { %3578 = vrot.lane.b32.xlu1 %v5976_v49, %s4619_s24  ;;  %v2631_v25 = vpop.permute.xlu0 %2630  ;;  %4534 = vmatpush3.msra.mxu1 %v4311_v9 }
 0x3fa   : > { %2720 = vst.msk [vmem:[#allocation3 + $0x30] sm:$0xff] %vm762_vm7, %v2631_v25  ;;  %4535 = vmatprep.subr.mxu1 %v4310_v44 }
 0x3fb   : > { %v2637_v21 = vpop.permute.xlu1 %2636  ;;  %3388 = vrot.lane.b32.xlu0 %v5978_v47, %s4618_s23  ;;  %4536 = vmatpush3.msra.mxu1 %v4310_v44  ;;  %v4309_v47 = vld [vmem:[%s6942_s1 + $0x80] sm:$0xff] }
 0x3fc   : > { %2723 = vst.msk [vmem:[#allocation3 + $0x48] sm:$0xff] %vm762_vm7, %v2637_v21  ;;  %4537 = vmatprep.subr.mxu1 %v4309_v47 }
 0x3fd   : > { %3580 = vrot.lane.b32.xlu1 %v5968_v22, %s4619_s24  ;;  %v2635_v33 = vpop.permute.xlu0 %2634  ;;  %4538 = vmatpush3.msra.mxu1 %v4309_v47  ;;  %v3524_v47 = vld [vmem:[#allocation2 + $0xa9] sm:$0xff] }
 0x3fe   : > { %2722 = vst.msk [vmem:[#allocation3 + $0x40] sm:$0xff] %vm762_vm7, %v2635_v33 }
 0x3ff   : > { %v2641_v30 = vpop.permute.xlu1 %2640  ;;  %3006 = vrot.lane.b32.xlu0 %v5976_v49, %s4616_s21 }
 0x400   : > { %2725 = vst.msk [vmem:[#allocation3 + $0x58] sm:$0xff] %vm762_vm7, %v2641_v30 }
 0x401   : > { %3008 = vrot.lane.b32.xlu1 %v5968_v22, %s4616_s21  ;;  %v2639_v38 = vpop.permute.xlu0 %2638 }
 0x402   : > { %2724 = vst.msk [vmem:[#allocation3 + $0x50] sm:$0xff] %vm762_vm7, %v2639_v38 }
 0x403   : > { %v2645_v48 = vpop.permute.xlu1 %2644  ;;  %3770 = vrot.lane.b32.xlu0 %v6185_v23, %s4620_s16 }
 0x404   : > { %2727 = vst.msk [vmem:[#allocation3 + $0x68] sm:$0xff] %vm762_vm7, %v2645_v48 }
 0x405   : > { %3772 = vrot.lane.b32.xlu1 %v6181_v18, %s4620_s16  ;;  %v2643_v49 = vpop.permute.xlu0 %2642 }
 0x406   : > { %2726 = vst.msk [vmem:[#allocation3 + $0x60] sm:$0xff] %vm762_vm7, %v2643_v49 }
 0x407   : > { %v2649_v57 = vpop.permute.xlu1 %2648  ;;  %3198 = vrot.lane.b32.xlu0 %v6185_v23, %s4617_s22 }
 0x408   : > { %2729 = vst.msk [vmem:[#allocation3 + $0x78] sm:$0xff] %vm762_vm7, %v2649_v57 }
 0x409   : > { %3390 = vrot.lane.b32.xlu1 %v6006_v40, %s4618_s23  ;;  %v2647_v22 = vpop.permute.xlu0 %2646 }
 0x40a   : > { %2728 = vst.msk [vmem:[#allocation3 + $0x70] sm:$0xff] %vm762_vm7, %v2647_v22 }
 0x40b   : > { %v2653_v56 = vpop.permute.xlu1 %2652  ;;  %3200 = vrot.lane.b32.xlu0 %v6181_v18, %s4617_s22 }
 0x40c   : > { %2731 = vst.msk [vmem:[#allocation3 + $0x88] sm:$0xff] %vm762_vm7, %v2653_v56 }
 0x40d   : > { %3582 = vrot.lane.b32.xlu1 %v5996_v35, %s4619_s24  ;;  %v2651_v55 = vpop.permute.xlu0 %2650 }
 0x40e   : > { %2730 = vst.msk [vmem:[#allocation3 + $0x80] sm:$0xff] %vm762_vm7, %v2651_v55  ;;  %v3526_v55 = vld [vmem:[#allocation2 + $0xc1] sm:$0xff] }
 0x40f   : > { %v2657_v23 = vpop.permute.xlu1 %2656  ;;  %3392 = vrot.lane.b32.xlu0 %v5998_v45, %s4618_s23 }
 0x410   : > { %2733 = vst.msk [vmem:[#allocation3 + $0x98] sm:$0xff] %vm762_vm7, %v2657_v23 }
 0x411   : > { %3584 = vrot.lane.b32.xlu1 %v5988_v37, %s4619_s24  ;;  %v2655_v40 = vpop.permute.xlu0 %2654 }
 0x412   : > { %2732 = vst.msk [vmem:[#allocation3 + $0x90] sm:$0xff] %vm762_vm7, %v2655_v40 }
 0x413   : > { %v2661_v18 = vpop.permute.xlu1 %2660  ;;  %3010 = vrot.lane.b32.xlu0 %v5996_v35, %s4616_s21 }
 0x414   : > { %2735 = vst.msk [vmem:[#allocation3 + $0xa8] sm:$0xff] %vm762_vm7, %v2661_v18 }
 0x415   : > { %3012 = vrot.lane.b32.xlu1 %v5988_v37, %s4616_s21  ;;  %v2659_v15 = vpop.permute.xlu0 %2658 }
 0x416   : > { %2734 = vst.msk [vmem:[#allocation3 + $0xa0] sm:$0xff] %vm762_vm7, %v2659_v15  ;;  %v3718_v15 = vld [vmem:[#allocation2 + $0xc2] sm:$0xff] }
 0x417   : > { %v2665_v45 = vpop.permute.xlu1 %2664  ;;  %3774 = vrot.lane.b32.xlu0 %v6193_v27, %s4620_s16 }
 0x418   : > { %2737 = vst.msk [vmem:[#allocation3 + $0xb8] sm:$0xff] %vm762_vm7, %v2665_v45  ;;  %v3719_v45 = vld [vmem:[#allocation2 + $0xca] sm:$0xff] }
 0x419   : > { %3776 = vrot.lane.b32.xlu1 %v6189_v26, %s4620_s16  ;;  %v2663_v14 = vpop.permute.xlu0 %2662 }
 0x41a   : > { %2736 = vst.msk [vmem:[#allocation3 + $0xb0] sm:$0xff] %vm762_vm7, %v2663_v14 }
 0x41b   : > { %v2669_v35 = vpop.permute.xlu1 %2668  ;;  %3202 = vrot.lane.b32.xlu0 %v6193_v27, %s4617_s22 }
 0x41c   : > { %2739 = vst.msk [vmem:[#allocation3 + $0xc8] sm:$0xff] %vm762_vm7, %v2669_v35 }
 0x41d   : > { %3394 = vrot.lane.b32.xlu1 %v6026_v62, %s4618_s23  ;;  %v2667_v37 = vpop.permute.xlu0 %2666 }
 0x41e   : > { %2738 = vst.msk [vmem:[#allocation3 + $0xc0] sm:$0xff] %vm762_vm7, %v2667_v37 }
 0x41f   : > { %v2673_v19 = vpop.permute.xlu1 %2672  ;;  %3204 = vrot.lane.b32.xlu0 %v6189_v26, %s4617_s22 }
 0x420   : > { %2741 = vst.msk [vmem:[#allocation3 + $0xd8] sm:$0xff] %vm762_vm7, %v2673_v19 }
 0x421   : > { %3586 = vrot.lane.b32.xlu1 %v6016_v58, %s4619_s24  ;;  %v2671_v63 = vpop.permute.xlu0 %2670 }
 0x422   : > { %2740 = vst.msk [vmem:[#allocation3 + $0xd0] sm:$0xff] %vm762_vm7, %v2671_v63 }
 0x423   : > { %v2677_v27 = vpop.permute.xlu1 %2676  ;;  %3396 = vrot.lane.b32.xlu0 %v6018_v61, %s4618_s23 }
 0x424   : > { %2743 = vst.msk [vmem:[#allocation3 + $0xe8] sm:$0xff] %vm762_vm7, %v2677_v27 }
 0x425   : > { %3588 = vrot.lane.b32.xlu1 %v6008_v52, %s4619_s24  ;;  %v2675_v62 = vpop.permute.xlu0 %2674 }
 0x426   : > { %2742 = vst.msk [vmem:[#allocation3 + $0xe0] sm:$0xff] %vm762_vm7, %v2675_v62  ;;  %v3528_v62 = vld [vmem:[#allocation2 + $0xd9] sm:$0xff] }
 0x427   : > { %v2681_v26 = vpop.permute.xlu1 %2680  ;;  %3014 = vrot.lane.b32.xlu0 %v6016_v58, %s4616_s21 }
 0x428   : > { %2745 = vst.msk [vmem:[#allocation3 + $0xf8] sm:$0xff] %vm762_vm7, %v2681_v26 }
 0x429   : > { %3016 = vrot.lane.b32.xlu1 %v6008_v52, %s4616_s21  ;;  %v2679_v3 = vpop.permute.xlu0 %2678 }
 0x42a   : > { %2744 = vst.msk [vmem:[#allocation3 + $0xf0] sm:$0xff] %vm762_vm7, %v2679_v3 }
 0x42b   : > { %v2813_v61 = vpop.permute.xlu1 %2812  ;;  %3778 = vrot.lane.b32.xlu0 %v6201_v32, %s4620_s16 }
 0x42c   : > { %2907 = vst.msk [vmem:[#allocation3 + $0x8] sm:$0xff] %vm955_vm8, %v2813_v61 }
 0x42d   : > { %3780 = vrot.lane.b32.xlu1 %v6197_v46, %s4620_s16  ;;  %v2811_v41 = vpop.permute.xlu0 %2810 }
 0x42e   : > { %2906 = vst.msk [vmem:[#allocation3] sm:$0xff] %vm955_vm8, %v2811_v41 }
 0x42f   : > { %v2817_v58 = vpop.permute.xlu1 %2816  ;;  %3206 = vrot.lane.b32.xlu0 %v6201_v32, %s4617_s22 }
 0x430   : > { %2909 = vst.msk [vmem:[#allocation3 + $0x18] sm:$0xff] %vm955_vm8, %v2817_v58 }
 0x431   : > { %3398 = vrot.lane.b32.xlu1 %v6046_v16, %s4618_s23  ;;  %v2815_v52 = vpop.permute.xlu0 %2814 }
 0x432   : > { %2908 = vst.msk [vmem:[#allocation3 + $0x10] sm:$0xff] %vm955_vm8, %v2815_v52  ;;  %v3720_v52 = vld [vmem:[#allocation2 + $0xda] sm:$0xff] }
 0x433   : > { %v2821_v12 = vpop.permute.xlu1 %2820  ;;  %3208 = vrot.lane.b32.xlu0 %v6197_v46, %s4617_s22  ;;  %v2946_v46 = vld [vmem:[#allocation2 + $0x79] sm:$0xff] }
 0x434   : > { %2911 = vst.msk [vmem:[#allocation3 + $0x28] sm:$0xff] %vm955_vm8, %v2821_v12  ;;  %v3721_v12 = vld [vmem:[#allocation2 + $0xe2] sm:$0xff] }
 0x435   : > { %3590 = vrot.lane.b32.xlu1 %v6036_v8, %s4619_s24  ;;  %v2819_v10 = vpop.permute.xlu0 %2818  ;;  %v2947_v8 = vld [vmem:[#allocation2 + $0x81] sm:$0xff] }
 0x436   : > { %2910 = vst.msk [vmem:[#allocation3 + $0x20] sm:$0xff] %vm955_vm8, %v2819_v10 }
 0x437   : > { %v2825_v32 = vpop.permute.xlu1 %2824  ;;  %3400 = vrot.lane.b32.xlu0 %v6038_v7, %s4618_s23 }
 0x438   : > { %2913 = vst.msk [vmem:[#allocation3 + $0x38] sm:$0xff] %vm955_vm8, %v2825_v32 }
 0x439   : > { %3592 = vrot.lane.b32.xlu1 %v6028_v1, %s4619_s24  ;;  %v2823_v16 = vpop.permute.xlu0 %2822 }
 0x43a   : > { %2912 = vst.msk [vmem:[#allocation3 + $0x30] sm:$0xff] %vm955_vm8, %v2823_v16 }
 0x43b   : > { %v2829_v13 = vpop.permute.xlu1 %2828  ;;  %3018 = vrot.lane.b32.xlu0 %v2946_v46, %s4616_s21 }
 0x43c   : > { %2915 = vst.msk [vmem:[#allocation3 + $0x48] sm:$0xff] %vm955_vm8, %v2829_v13 }
 0x43d   : > { %3020 = vrot.lane.b32.xlu1 %v2947_v8, %s4616_s21  ;;  %v2827_v11 = vpop.permute.xlu0 %2826 }
 0x43e   : > { %2914 = vst.msk [vmem:[#allocation3 + $0x40] sm:$0xff] %vm955_vm8, %v2827_v11  ;;  %v3530_v11 = vld [vmem:[#allocation2 + $0xf1] sm:$0xff] }
 0x43f   : > { %v2833_v7 = vpop.permute.xlu1 %2832  ;;  %3782 = vrot.lane.b32.xlu0 %v6209_v50, %s4620_s16 }
 0x440   : > { %2917 = vst.msk [vmem:[#allocation3 + $0x58] sm:$0xff] %vm955_vm8, %v2833_v7 }
 0x441   : > { %3784 = vrot.lane.b32.xlu1 %v6205_v39, %s4620_s16  ;;  %v2831_v1 = vpop.permute.xlu0 %2830 }
 0x442   : > { %2916 = vst.msk [vmem:[#allocation3 + $0x50] sm:$0xff] %vm955_vm8, %v2831_v1 }
 0x443   : > { %v2837_v20 = vpop.permute.xlu1 %2836  ;;  %3210 = vrot.lane.b32.xlu0 %v6209_v50, %s4617_s22 }
 0x444   : > { %2919 = vst.msk [vmem:[#allocation3 + $0x68] sm:$0xff] %vm955_vm8, %v2837_v20 }
 0x445   : > { %3402 = vrot.lane.b32.xlu1 %v6058_v42, %s4618_s23  ;;  %v2835_v24 = vpop.permute.xlu0 %2834  ;;  %v3523_v42 = vld [vmem:[#allocation2 + $0x99] sm:$0xff] }
 0x446   : > { %2918 = vst.msk [vmem:[#allocation3 + $0x60] sm:$0xff] %vm955_vm8, %v2835_v24 }
 0x447   : > { %v2841_v43 = vpop.permute.xlu1 %2840  ;;  %3212 = vrot.lane.b32.xlu0 %v6205_v39, %s4617_s22 }
 0x448   : > { %2921 = vst.msk [vmem:[#allocation3 + $0x78] sm:$0xff] %vm955_vm8, %v2841_v43 }
 0x449   : > { %3594 = vrot.lane.b32.xlu1 %v3522_v5, %s4619_s24  ;;  %v2839_v53 = vpop.permute.xlu0 %2838 }
 0x44a   : > { %2920 = vst.msk [vmem:[#allocation3 + $0x70] sm:$0xff] %vm955_vm8, %v2839_v53  ;;  %v3723_v53 = vld [vmem:[#allocation2 + $0xfa] sm:$0xff] }
 0x44b   : > { %v2845_v50 = vpop.permute.xlu1 %2844  ;;  %3404 = vrot.lane.b32.xlu0 %v6052_v17, %s4618_s23 }
 0x44c   : > { %2923 = vst.msk [vmem:[#allocation3 + $0x88] sm:$0xff] %vm955_vm8, %v2845_v50 }
 0x44d   : > { %3596 = vrot.lane.b32.xlu1 %v3523_v42, %s4619_s24  ;;  %v2843_v28 = vpop.permute.xlu0 %2842 }
 0x44e   : > { %2922 = vst.msk [vmem:[#allocation3 + $0x80] sm:$0xff] %vm955_vm8, %v2843_v28 }
 0x44f   : > { %v2849_v39 = vpop.permute.xlu1 %2848  ;;  %3022 = vrot.lane.b32.xlu0 %v3522_v5, %s4616_s21  ;;  %v3722_v5 = vld [vmem:[#allocation2 + $0xf2] sm:$0xff] }
 0x450   : > { %2925 = vst.msk [vmem:[#allocation3 + $0x98] sm:$0xff] %vm955_vm8, %v2849_v39 }
 0x451   : > { %3024 = vrot.lane.b32.xlu1 %v3523_v42, %s4616_s21  ;;  %v2847_v25 = vpop.permute.xlu0 %2846 }
 0x452   : > { %2924 = vst.msk [vmem:[#allocation3 + $0x90] sm:$0xff] %vm955_vm8, %v2847_v25  ;;  %v3340_v25 = vld [vmem:[#allocation2 + $0x108] sm:$0xff] }
 0x453   : > { %v2853_v9 = vpop.permute.xlu1 %2852  ;;  %3786 = vrot.lane.b32.xlu0 %v6217_v59, %s4620_s16 }
 0x454   : > { %2927 = vst.msk [vmem:[#allocation3 + $0xa8] sm:$0xff] %vm955_vm8, %v2853_v9 }
 0x455   : > { %3788 = vrot.lane.b32.xlu1 %v6213_v54, %s4620_s16  ;;  %v2851_v17 = vpop.permute.xlu0 %2850 }
 0x456   : > { %2926 = vst.msk [vmem:[#allocation3 + $0xa0] sm:$0xff] %vm955_vm8, %v2851_v17 }
 0x457   : > { %v2857_v21 = vpop.permute.xlu1 %2856  ;;  %3214 = vrot.lane.b32.xlu0 %v6217_v59, %s4617_s22 }
 0x458   : > { %2929 = vst.msk [vmem:[#allocation3 + $0xb8] sm:$0xff] %vm955_vm8, %v2857_v21  ;;  %v3532_v21 = vld [vmem:[#allocation2 + $0x109] sm:$0xff] }
 0x459   : > { %3406 = vrot.lane.b32.xlu1 %v6070_v36, %s4618_s23  ;;  %v2855_v44 = vpop.permute.xlu0 %2854  ;;  %v3525_v36 = vld [vmem:[#allocation2 + $0xb1] sm:$0xff] }
 0x45a   : > { %2928 = vst.msk [vmem:[#allocation3 + $0xb0] sm:$0xff] %vm955_vm8, %v2855_v44 }
 0x45b   : > { %v2861_v33 = vpop.permute.xlu1 %2860  ;;  %3216 = vrot.lane.b32.xlu0 %v6213_v54, %s4617_s22 }
 0x45c   : > { %2931 = vst.msk [vmem:[#allocation3 + $0xc8] sm:$0xff] %vm955_vm8, %v2861_v33  ;;  %v3341_v33 = vld [vmem:[#allocation2 + $0x110] sm:$0xff] }
 0x45d   : > { %3598 = vrot.lane.b32.xlu1 %v3524_v47, %s4619_s24  ;;  %v2859_v30 = vpop.permute.xlu0 %2858 }
 0x45e   : > { %2930 = vst.msk [vmem:[#allocation3 + $0xc0] sm:$0xff] %vm955_vm8, %v2859_v30  ;;  %v3533_v30 = vld [vmem:[#allocation2 + $0x111] sm:$0xff] }
 0x45f   : > { %v3003_v59 = vpop.permute.xlu1 %3002  ;;  %3408 = vrot.lane.b32.xlu0 %v6065_v51, %s4618_s23 }
 0x460   : > { %3098 = vst.msk [vmem:[#allocation3] sm:$0xff] %vm1148_vm9, %v3003_v59 }
 0x461   : > { %3600 = vrot.lane.b32.xlu1 %v3525_v36, %s4619_s24  ;;  %v2863_v38 = vpop.permute.xlu0 %2862 }
 0x462   : > { %2932 = vst.msk [vmem:[#allocation3 + $0xd0] sm:$0xff] %vm955_vm8, %v2863_v38 }
 0x463   : > { %v3195_v54 = vpop.permute.xlu1 %3194  ;;  %3026 = vrot.lane.b32.xlu0 %v3524_v47, %s4616_s21 }
 0x464   : > { %3290 = vst.msk [vmem:[#allocation3] sm:$0xff] %vm1341_vm10, %v3195_v54  ;;  %v3724_v54 = vld [vmem:[#allocation2 + $0x10a] sm:$0xff] }
 0x465   : > { %3028 = vrot.lane.b32.xlu1 %v3525_v36, %s4616_s21  ;;  %v3005_v48 = vpop.permute.xlu0 %3004 }
 0x466   : > { %3099 = vst.msk [vmem:[#allocation3 + $0x8] sm:$0xff] %vm1148_vm9, %v3005_v48 }
 0x467   : > { %v3387_v49 = vpop.permute.xlu1 %3386  ;;  %3790 = vrot.lane.b32.xlu0 %v6226_v6, %s4620_s16 }
 0x468   : > { %3482 = vst.msk [vmem:[#allocation3] sm:$0xff] %vm1535_vm11, %v3387_v49  ;;  %v3725_v49 = vld [vmem:[#allocation2 + $0x112] sm:$0xff] }
 0x469   : > { %3792 = vrot.lane.b32.xlu1 %v6221_v60, %s4620_s16  ;;  %v3197_v51 = vpop.permute.xlu0 %3196 }
 0x46a   : > { %3291 = vst.msk [vmem:[#allocation3 + $0x8] sm:$0xff] %vm1341_vm10, %v3197_v51 }
 0x46b   : > { %v3579_v57 = vpop.permute.xlu1 %3578  ;;  %3218 = vrot.lane.b32.xlu0 %v6226_v6, %s4617_s22 }
 0x46c   : > { %3674 = vst.msk [vmem:[#allocation3] sm:$0xff] %vm1728_vm12, %v3579_v57 }
 0x46d   : > { %3410 = vrot.lane.b32.xlu1 %v6082_v29, %s4618_s23  ;;  %v3389_v22 = vpop.permute.xlu0 %3388  ;;  %v3527_v29 = vld [vmem:[#allocation2 + $0xc9] sm:$0xff] }
 0x46e   : > { %3483 = vst.msk [vmem:[#allocation3 + $0x8] sm:$0xff] %vm1535_vm11, %v3389_v22 }
 0x46f   : > { %v3581_v56 = vpop.permute.xlu1 %3580  ;;  %3220 = vrot.lane.b32.xlu0 %v6221_v60, %s4617_s22 }
 0x470   : > { %3675 = vst.msk [vmem:[#allocation3 + $0x8] sm:$0xff] %vm1728_vm12, %v3581_v56 }
 0x471   : > { %3602 = vrot.lane.b32.xlu1 %v3526_v55, %s4619_s24  ;;  %v3007_v23 = vpop.permute.xlu0 %3006 }
 0x472   : > { %3100 = vst.msk [vmem:[#allocation3 + $0x10] sm:$0xff] %vm1148_vm9, %v3007_v23 }
 0x473   : > { %v3009_v6 = vpop.permute.xlu1 %3008  ;;  %3412 = vrot.lane.b32.xlu0 %v6077_v0, %s4618_s23 }
 0x474   : > { %3101 = vst.msk [vmem:[#allocation3 + $0x18] sm:$0xff] %vm1148_vm9, %v3009_v6 }
 0x475   : > { %3604 = vrot.lane.b32.xlu1 %v3527_v29, %s4619_s24  ;;  %v3771_v40 = vpop.permute.xlu0 %3770 }
 0x476   : > { %3866 = vst.msk [vmem:[#allocation3] sm:$0xff] %vm1921_vm13, %v3771_v40 }
 0x477   : > { %v3773_v60 = vpop.permute.xlu1 %3772  ;;  %3030 = vrot.lane.b32.xlu0 %v3526_v55, %s4616_s21  ;;  %v3342_v55 = vld [vmem:[#allocation2 + $0x120] sm:$0xff] }
 0x478   : > { %3867 = vst.msk [vmem:[#allocation3 + $0x8] sm:$0xff] %vm1921_vm13, %v3773_v60  ;;  %v3343_v60 = vld [vmem:[#allocation2 + $0x128] sm:$0xff] }
 0x479   : > { %3032 = vrot.lane.b32.xlu1 %v3527_v29, %s4616_s21  ;;  %v3199_v18 = vpop.permute.xlu0 %3198  ;;  %v3534_v29 = vld [vmem:[#allocation2 + $0x121] sm:$0xff] }
 0x47a   : > { %3292 = vst.msk [vmem:[#allocation3 + $0x10] sm:$0xff] %vm1341_vm10, %v3199_v18 }
 0x47b   : > { %v3391_v0 = vpop.permute.xlu1 %3390  ;;  %3794 = vrot.lane.b32.xlu0 %v3718_v15, %s4620_s16 }
 0x47c   : > { %3484 = vst.msk [vmem:[#allocation3 + $0x10] sm:$0xff] %vm1535_vm11, %v3391_v0 }
 0x47d   : > { %3796 = vrot.lane.b32.xlu1 %v3719_v45, %s4620_s16  ;;  %v3201_v14 = vpop.permute.xlu0 %3200  ;;  %v3898_v35 = vld [vmem:[#allocation3] sm:$0xff] }
 0x47e   : > { %3293 = vst.msk [vmem:[#allocation3 + $0x18] sm:$0xff] %vm1341_vm10, %v3201_v14  ;;  %4539 = vmatprep.mubr.f32.mxu1 %v3898_v35  ;;  %v3726_v35 = vld [vmem:[#allocation2 + $0x122] sm:$0xff] }
 0x47f   : > { %v3583_v37 = vpop.permute.xlu1 %3582  ;;  %3222 = vrot.lane.b32.xlu0 %v3718_v15, %s4617_s22  ;;  %v3899_v19 = vld [vmem:[#allocation3 + $0x8] sm:$0xff]  ;;  %v3535_v15 = vld [vmem:[#allocation2 + $0x129] sm:$0xff] }
 0x480   : > { %3676 = vst.msk [vmem:[#allocation3 + $0x10] sm:$0xff] %vm1728_vm12, %v3583_v37  ;;  %4540 = vmatmul.mubr.f32.vlgmr.msra.gmra.mxu1 %v3899_v19  ;;  %v3727_v19 = vld [vmem:[#allocation2 + $0x12a] sm:$0xff] }
 0x481   : > { %3414 = vrot.lane.b32.xlu1 %v6096_v31, %s4618_s23  ;;  %v3393_v63 = vpop.permute.xlu0 %3392  ;;  %v3529_v31 = vld [vmem:[#allocation2 + $0xe1] sm:$0xff] }
 0x482   : > { %3485 = vst.msk [vmem:[#allocation3 + $0x18] sm:$0xff] %vm1535_vm11, %v3393_v63 }
 0x483   : > { %v3585_v27 = vpop.permute.xlu1 %3584  ;;  %3224 = vrot.lane.b32.xlu0 %v3719_v45, %s4617_s22 }
 0x484   : > { %3677 = vst.msk [vmem:[#allocation3 + $0x18] sm:$0xff] %vm1728_vm12, %v3585_v27 }
 0x485   : > { %3606 = vrot.lane.b32.xlu1 %v3528_v62, %s4619_s24  ;;  %v3011_v26 = vpop.permute.xlu0 %3010 }
 0x486   : > { %3102 = vst.msk [vmem:[#allocation3 + $0x20] sm:$0xff] %vm1148_vm9, %v3011_v26 }
 0x487   : > { %v3013_v3 = vpop.permute.xlu1 %3012  ;;  %3416 = vrot.lane.b32.xlu0 %v6090_v34, %s4618_s23 }
 0x488   : > { %3103 = vst.msk [vmem:[#allocation3 + $0x28] sm:$0xff] %vm1148_vm9, %v3013_v3  ;;  %v3344_v3 = vld [vmem:[#allocation2 + $0x138] sm:$0xff] }
 0x489   : > { %3608 = vrot.lane.b32.xlu1 %v3529_v31, %s4619_s24  ;;  %v3775_v61 = vpop.permute.xlu0 %3774 }
 0x48a   : > { %3868 = vst.msk [vmem:[#allocation3 + $0x10] sm:$0xff] %vm1921_vm13, %v3775_v61 }
 0x48b   : > { %v3777_v41 = vpop.permute.xlu1 %3776  ;;  %3034 = vrot.lane.b32.xlu0 %v3528_v62, %s4616_s21 }
 0x48c   : > { %3869 = vst.msk [vmem:[#allocation3 + $0x18] sm:$0xff] %vm1921_vm13, %v3777_v41  ;;  %v3536_v41 = vld [vmem:[#allocation2 + $0x139] sm:$0xff] }
 0x48d   : > { %3036 = vrot.lane.b32.xlu1 %v3529_v31, %s4616_s21  ;;  %v3203_v58 = vpop.permute.xlu0 %3202 }
 0x48e   : > { %3294 = vst.msk [vmem:[#allocation3 + $0x20] sm:$0xff] %vm1341_vm10, %v3203_v58 }
 0x48f   : > { %v3395_v34 = vpop.permute.xlu1 %3394  ;;  %3798 = vrot.lane.b32.xlu0 %v3720_v52, %s4620_s16 }
 0x490   : > { %3486 = vst.msk [vmem:[#allocation3 + $0x20] sm:$0xff] %vm1535_vm11, %v3395_v34 }
 0x491   : > { %3800 = vrot.lane.b32.xlu1 %v3721_v12, %s4620_s16  ;;  %v3205_v10 = vpop.permute.xlu0 %3204  ;;  %v3900_v32 = vld [vmem:[#allocation3 + $0x10] sm:$0xff] }
 0x492   : > { %3295 = vst.msk [vmem:[#allocation3 + $0x28] sm:$0xff] %vm1341_vm10, %v3205_v10  ;;  %4542 = vmatprep.mubr.f32.mxu1 %v3900_v32 }
 0x493   : > { %v3587_v16 = vpop.permute.xlu1 %3586  ;;  %3226 = vrot.lane.b32.xlu0 %v3720_v52, %s4617_s22  ;;  %v3901_v46 = vld [vmem:[#allocation3 + $0x18] sm:$0xff]  ;;  %v3345_v52 = vld [vmem:[#allocation2 + $0x140] sm:$0xff] }
 0x494   : > { %3678 = vst.msk [vmem:[#allocation3 + $0x20] sm:$0xff] %vm1728_vm12, %v3587_v16  ;;  %4543 = vmatmul.mubr.f32.gmra.mxu1 %v3901_v46  ;;  %v3728_v46 = vld [vmem:[#allocation2 + $0x13a] sm:$0xff] }
 0x495   : > { %3418 = vrot.lane.b32.xlu1 %v6110_v4, %s4618_s23  ;;  %v3397_v13 = vpop.permute.xlu0 %3396  ;;  %v3531_v4 = vld [vmem:[#allocation2 + $0xf9] sm:$0xff] }
 0x496   : > { %3487 = vst.msk [vmem:[#allocation3 + $0x28] sm:$0xff] %vm1535_vm11, %v3397_v13 }
 0x497   : > { %v3589_v8 = vpop.permute.xlu1 %3588  ;;  %3228 = vrot.lane.b32.xlu0 %v3721_v12, %s4617_s22  ;;  %v3537_v12 = vld [vmem:[#allocation2 + $0x141] sm:$0xff] }
 0x498   : > { %3679 = vst.msk [vmem:[#allocation3 + $0x28] sm:$0xff] %vm1728_vm12, %v3589_v8  ;;  %v3729_v8 = vld [vmem:[#allocation2 + $0x142] sm:$0xff] }
 0x499   : > { %3610 = vrot.lane.b32.xlu1 %v3530_v11, %s4619_s24  ;;  %v3015_v7 = vpop.permute.xlu0 %3014 }
 0x49a   : > { %3104 = vst.msk [vmem:[#allocation3 + $0x30] sm:$0xff] %vm1148_vm9, %v3015_v7 }
 0x49b   : > { %v3017_v1 = vpop.permute.xlu1 %3016  ;;  %3420 = vrot.lane.b32.xlu0 %v6104_v2, %s4618_s23 }
 0x49c   : > { %3105 = vst.msk [vmem:[#allocation3 + $0x38] sm:$0xff] %vm1148_vm9, %v3017_v1 }
 0x49d   : > { %3612 = vrot.lane.b32.xlu1 %v3531_v4, %s4619_s24  ;;  %v3779_v20 = vpop.permute.xlu0 %3778 }
 0x49e   : > { %3870 = vst.msk [vmem:[#allocation3 + $0x20] sm:$0xff] %vm1921_vm13, %v3779_v20  ;;  %v3346_v20 = vld [vmem:[#allocation2 + $0x150] sm:$0xff] }
 0x49f   : > { %v3781_v24 = vpop.permute.xlu1 %3780  ;;  %3038 = vrot.lane.b32.xlu0 %v3530_v11, %s4616_s21 }
 0x4a0   : > { %3871 = vst.msk [vmem:[#allocation3 + $0x28] sm:$0xff] %vm1921_vm13, %v3781_v24 }
 0x4a1   : > { %3040 = vrot.lane.b32.xlu1 %v3531_v4, %s4616_s21  ;;  %v3207_v43 = vpop.permute.xlu0 %3206 }
 0x4a2   : > { %3296 = vst.msk [vmem:[#allocation3 + $0x30] sm:$0xff] %vm1341_vm10, %v3207_v43 }
 0x4a3   : > { %v3399_v2 = vpop.permute.xlu1 %3398  ;;  %3802 = vrot.lane.b32.xlu0 %v3722_v5, %s4620_s16 }
 0x4a4   : > { %3488 = vst.msk [vmem:[#allocation3 + $0x30] sm:$0xff] %vm1535_vm11, %v3399_v2 }
 0x4a5   : > { %3804 = vrot.lane.b32.xlu1 %v3723_v53, %s4620_s16  ;;  %v3209_v50 = vpop.permute.xlu0 %3208  ;;  %v3902_v42 = vld [vmem:[#allocation3 + $0x20] sm:$0xff] }
 0x4a6   : > { %3297 = vst.msk [vmem:[#allocation3 + $0x38] sm:$0xff] %vm1341_vm10, %v3209_v50  ;;  %4545 = vmatprep.mubr.f32.mxu1 %v3902_v42 }
 0x4a7   : > { %v3591_v28 = vpop.permute.xlu1 %3590  ;;  %3230 = vrot.lane.b32.xlu0 %v3722_v5, %s4617_s22  ;;  %v3903_v39 = vld [vmem:[#allocation3 + $0x28] sm:$0xff] }
 0x4a8   : > { %3680 = vst.msk [vmem:[#allocation3 + $0x30] sm:$0xff] %vm1728_vm12, %v3591_v28  ;;  %4546 = vmatmul.mubr.f32.gmra.mxu1 %v3903_v39  ;;  %v3538_v5 = vld [vmem:[#allocation2 + $0x151] sm:$0xff] }
 0x4a9   : > { %3422 = vrot.lane.b32.xlu1 %v3340_v25, %s4618_s23  ;;  %v3401_v9 = vpop.permute.xlu0 %3400  ;;  %v3730_v39 = vld [vmem:[#allocation2 + $0x152] sm:$0xff] }
 0x4aa   : > { %3489 = vst.msk [vmem:[#allocation3 + $0x38] sm:$0xff] %vm1535_vm11, %v3401_v9  ;;  %v3539_v9 = vld [vmem:[#allocation2 + $0x159] sm:$0xff] }
 0x4ab   : > { %v3593_v17 = vpop.permute.xlu1 %3592  ;;  %3232 = vrot.lane.b32.xlu0 %v3723_v53, %s4617_s22  ;;  %v3347_v53 = vld [vmem:[#allocation2 + $0x158] sm:$0xff] }
 0x4ac   : > { %3681 = vst.msk [vmem:[#allocation3 + $0x38] sm:$0xff] %vm1728_vm12, %v3593_v17 }
 0x4ad   : > { %3614 = vrot.lane.b32.xlu1 %v3532_v21, %s4619_s24  ;;  %v3019_v44 = vpop.permute.xlu0 %3018 }
 0x4ae   : > { %3106 = vst.msk [vmem:[#allocation3 + $0x40] sm:$0xff] %vm1148_vm9, %v3019_v44 }
 0x4af   : > { %v3021_v47 = vpop.permute.xlu1 %3020  ;;  %3424 = vrot.lane.b32.xlu0 %v3341_v33, %s4618_s23 }
 0x4b0   : > { %3107 = vst.msk [vmem:[#allocation3 + $0x48] sm:$0xff] %vm1148_vm9, %v3021_v47 }
 0x4b1   : > { %3616 = vrot.lane.b32.xlu1 %v3533_v30, %s4619_s24  ;;  %v3783_v59 = vpop.permute.xlu0 %3782 }
 0x4b2   : > { %3872 = vst.msk [vmem:[#allocation3 + $0x30] sm:$0xff] %vm1921_vm13, %v3783_v59 }
 0x4b3   : > { %v3785_v36 = vpop.permute.xlu1 %3784  ;;  %3042 = vrot.lane.b32.xlu0 %v3532_v21, %s4616_s21 }
 0x4b4   : > { %3873 = vst.msk [vmem:[#allocation3 + $0x38] sm:$0xff] %vm1921_vm13, %v3785_v36 }
 0x4b5   : > { %3044 = vrot.lane.b32.xlu1 %v3533_v30, %s4616_s21  ;;  %v3211_v38 = vpop.permute.xlu0 %3210  ;;  %v3157_v30 = vld [vmem:[#allocation2 + $0x15a] sm:$0xff] }
 0x4b6   : > { %3298 = vst.msk [vmem:[#allocation3 + $0x40] sm:$0xff] %vm1341_vm10, %v3211_v38  ;;  %v2774_v38 = vld [vmem:[#allocation2 + $0x168] sm:$0xff] }
 0x4b7   : > { %v3403_v48 = vpop.permute.xlu1 %3402  ;;  %3806 = vrot.lane.b32.xlu0 %v3724_v54, %s4620_s16 }
 0x4b8   : > { %3490 = vst.msk [vmem:[#allocation3 + $0x40] sm:$0xff] %vm1535_vm11, %v3403_v48 }
 0x4b9   : > { %3808 = vrot.lane.b32.xlu1 %v3725_v49, %s4620_s16  ;;  %v3213_v51 = vpop.permute.xlu0 %3212  ;;  %v3904_v57 = vld [vmem:[#allocation3 + $0x30] sm:$0xff] }
 0x4ba   : > { %3299 = vst.msk [vmem:[#allocation3 + $0x48] sm:$0xff] %vm1341_vm10, %v3213_v51  ;;  %4548 = vmatprep.mubr.f32.mxu1 %v3904_v57  ;;  %v3349_v57 = vld [vmem:[#allocation2 + $0x170] sm:$0xff] }
 0x4bb   : > { %v3595_v22 = vpop.permute.xlu1 %3594  ;;  %3234 = vrot.lane.b32.xlu0 %v3724_v54, %s4617_s22  ;;  %v3905_v56 = vld [vmem:[#allocation3 + $0x38] sm:$0xff] }
 0x4bc   : > { %3682 = vst.msk [vmem:[#allocation3 + $0x40] sm:$0xff] %vm1728_vm12, %v3595_v22  ;;  %4549 = vmatmul.mubr.f32.gmra.mxu1 %v3905_v56 }
 0x4bd   : > { %3426 = vrot.lane.b32.xlu1 %v3342_v55, %s4618_s23  ;;  %v3405_v23 = vpop.permute.xlu0 %3404 }
 0x4be   : > { %3491 = vst.msk [vmem:[#allocation3 + $0x48] sm:$0xff] %vm1535_vm11, %v3405_v23  ;;  %v3732_v23 = vld [vmem:[#allocation2 + $0x16a] sm:$0xff] }
 0x4bf   : > { %v3597_v6 = vpop.permute.xlu1 %3596  ;;  %3236 = vrot.lane.b32.xlu0 %v3725_v49, %s4617_s22  ;;  %v3540_v49 = vld [vmem:[#allocation2 + $0x169] sm:$0xff] }
 0x4c0   : > { %3683 = vst.msk [vmem:[#allocation3 + $0x48] sm:$0xff] %vm1728_vm12, %v3597_v6 }
 0x4c1   : > { %3618 = vrot.lane.b32.xlu1 %v3534_v29, %s4619_s24  ;;  %v3023_v40 = vpop.permute.xlu0 %3022 }
 0x4c2   : > { %3108 = vst.msk [vmem:[#allocation3 + $0x50] sm:$0xff] %vm1148_vm9, %v3023_v40  ;;  %v3541_v40 = vld [vmem:[#allocation2 + $0x171] sm:$0xff] }
 0x4c3   : > { %v3025_v18 = vpop.permute.xlu1 %3024  ;;  %3428 = vrot.lane.b32.xlu0 %v3343_v60, %s4618_s23 }
 0x4c4   : > { %3109 = vst.msk [vmem:[#allocation3 + $0x58] sm:$0xff] %vm1148_vm9, %v3025_v18 }
 0x4c5   : > { %3620 = vrot.lane.b32.xlu1 %v3535_v15, %s4619_s24  ;;  %v3787_v0 = vpop.permute.xlu0 %3786 }
 0x4c6   : > { %3874 = vst.msk [vmem:[#allocation3 + $0x40] sm:$0xff] %vm1921_vm13, %v3787_v0 }
 0x4c7   : > { %v3789_v45 = vpop.permute.xlu1 %3788  ;;  %3046 = vrot.lane.b32.xlu0 %v3534_v29, %s4616_s21 }
 0x4c8   : > { %3875 = vst.msk [vmem:[#allocation3 + $0x48] sm:$0xff] %vm1921_vm13, %v3789_v45  ;;  %v3159_v45 = vld [vmem:[#allocation2 + $0x172] sm:$0xff] }
 0x4c9   : > { %3048 = vrot.lane.b32.xlu1 %v3535_v15, %s4616_s21  ;;  %v3215_v14 = vpop.permute.xlu0 %3214 }
 0x4ca   : > { %3300 = vst.msk [vmem:[#allocation3 + $0x50] sm:$0xff] %vm1341_vm10, %v3215_v14 }
 0x4cb   : > { %v3407_v37 = vpop.permute.xlu1 %3406  ;;  %3810 = vrot.lane.b32.xlu0 %v3726_v35, %s4620_s16 }
 0x4cc   : > { %3492 = vst.msk [vmem:[#allocation3 + $0x50] sm:$0xff] %vm1535_vm11, %v3407_v37  ;;  %v2776_v37 = vld [vmem:[#allocation2 + $0x180] sm:$0xff] }
 0x4cd   : > { %3812 = vrot.lane.b32.xlu1 %v3727_v19, %s4620_s16  ;;  %v3217_v63 = vpop.permute.xlu0 %3216  ;;  %v3906_v27 = vld [vmem:[#allocation3 + $0x40] sm:$0xff] }
 0x4ce   : > { %3301 = vst.msk [vmem:[#allocation3 + $0x58] sm:$0xff] %vm1341_vm10, %v3217_v63  ;;  %4551 = vmatprep.mubr.f32.mxu1 %v3906_v27  ;;  %v3542_v27 = vld [vmem:[#allocation2 + $0x181] sm:$0xff] }
 0x4cf   : > { %v3599_v62 = vpop.permute.xlu1 %3598  ;;  %3238 = vrot.lane.b32.xlu0 %v3726_v35, %s4617_s22  ;;  %v3907_v26 = vld [vmem:[#allocation3 + $0x48] sm:$0xff] }
 0x4d0   : > { %3684 = vst.msk [vmem:[#allocation3 + $0x50] sm:$0xff] %vm1728_vm12, %v3599_v62  ;;  %4552 = vmatmul.mubr.f32.gmra.mxu1 %v3907_v26  ;;  %v3351_v26 = vld [vmem:[#allocation2 + $0x188] sm:$0xff] }
 0x4d1   : > { %3430 = vrot.lane.b32.xlu1 %v3344_v3, %s4618_s23  ;;  %v3409_v31 = vpop.permute.xlu0 %3408 }
 0x4d2   : > { %3493 = vst.msk [vmem:[#allocation3 + $0x58] sm:$0xff] %vm1535_vm11, %v3409_v31 }
 0x4d3   : > { %v3601_v61 = vpop.permute.xlu1 %3600  ;;  %3240 = vrot.lane.b32.xlu0 %v3727_v19, %s4617_s22 }
 0x4d4   : > { %3685 = vst.msk [vmem:[#allocation3 + $0x58] sm:$0xff] %vm1728_vm12, %v3601_v61 }
 0x4d5   : > { %3622 = vrot.lane.b32.xlu1 %v3536_v41, %s4619_s24  ;;  %v3027_v58 = vpop.permute.xlu0 %3026 }
 0x4d6   : > { %3110 = vst.msk [vmem:[#allocation3 + $0x60] sm:$0xff] %vm1148_vm9, %v3027_v58 }
 0x4d7   : > { %v3029_v34 = vpop.permute.xlu1 %3028  ;;  %3432 = vrot.lane.b32.xlu0 %v3345_v52, %s4618_s23  ;;  %v3734_v52 = vld [vmem:[#allocation2 + $0x182] sm:$0xff] }
 0x4d8   : > { %3111 = vst.msk [vmem:[#allocation3 + $0x68] sm:$0xff] %vm1148_vm9, %v3029_v34 }
 0x4d9   : > { %3624 = vrot.lane.b32.xlu1 %v3537_v12, %s4619_s24  ;;  %v3791_v10 = vpop.permute.xlu0 %3790 }
 0x4da   : > { %3876 = vst.msk [vmem:[#allocation3 + $0x50] sm:$0xff] %vm1921_vm13, %v3791_v10 }
 0x4db   : > { %v3793_v32 = vpop.permute.xlu1 %3792  ;;  %3050 = vrot.lane.b32.xlu0 %v3536_v41, %s4616_s21 }
 0x4dc   : > { %3877 = vst.msk [vmem:[#allocation3 + $0x58] sm:$0xff] %vm1921_vm13, %v3793_v32 }
 0x4dd   : > { %3052 = vrot.lane.b32.xlu1 %v3537_v12, %s4616_s21  ;;  %v3219_v16 = vpop.permute.xlu0 %3218  ;;  %v3543_v12 = vld [vmem:[#allocation2 + $0x189] sm:$0xff] }
 0x4de   : > { %3302 = vst.msk [vmem:[#allocation3 + $0x60] sm:$0xff] %vm1341_vm10, %v3219_v16 }
 0x4df   : > { %v3411_v13 = vpop.permute.xlu1 %3410  ;;  %3814 = vrot.lane.b32.xlu0 %v3728_v46, %s4620_s16 }
 0x4e0   : > { %3494 = vst.msk [vmem:[#allocation3 + $0x60] sm:$0xff] %vm1535_vm11, %v3411_v13 }
 0x4e1   : > { %3816 = vrot.lane.b32.xlu1 %v3729_v8, %s4620_s16  ;;  %v3221_v11 = vpop.permute.xlu0 %3220  ;;  %v3908_v7 = vld [vmem:[#allocation3 + $0x50] sm:$0xff] }
 0x4e2   : > { %3303 = vst.msk [vmem:[#allocation3 + $0x68] sm:$0xff] %vm1341_vm10, %v3221_v11  ;;  %4554 = vmatprep.mubr.f32.mxu1 %v3908_v7  ;;  %v3352_v7 = vld [vmem:[#allocation2 + $0x198] sm:$0xff] }
 0x4e3   : > { %v3603_v1 = vpop.permute.xlu1 %3602  ;;  %3242 = vrot.lane.b32.xlu0 %v3728_v46, %s4617_s22  ;;  %v3909_v4 = vld [vmem:[#allocation3 + $0x58] sm:$0xff] }
 0x4e4   : > { %3686 = vst.msk [vmem:[#allocation3 + $0x60] sm:$0xff] %vm1728_vm12, %v3603_v1  ;;  %4555 = vmatmul.mubr.f32.gmra.mxu1 %v3909_v4  ;;  %v3161_v46 = vld [vmem:[#allocation2 + $0x18a] sm:$0xff]  ;;  %v3545_v4 = vld [vmem:[#allocation2 + $0x1a1] sm:$0xff] }
 0x4e5   : > { %3434 = vrot.lane.b32.xlu1 %v3346_v20, %s4618_s23  ;;  %v3413_v24 = vpop.permute.xlu0 %3412 }
 0x4e6   : > { %3495 = vst.msk [vmem:[#allocation3 + $0x68] sm:$0xff] %vm1535_vm11, %v3413_v24  ;;  %v3544_v24 = vld [vmem:[#allocation2 + $0x199] sm:$0xff] }
 0x4e7   : > { %v3605_v43 = vpop.permute.xlu1 %3604  ;;  %3244 = vrot.lane.b32.xlu0 %v3729_v8, %s4617_s22  ;;  %v3353_v8 = vld [vmem:[#allocation2 + $0x1a0] sm:$0xff] }
 0x4e8   : > { %3687 = vst.msk [vmem:[#allocation3 + $0x68] sm:$0xff] %vm1728_vm12, %v3605_v43 }
 0x4e9   : > { %3626 = vrot.lane.b32.xlu1 %v3538_v5, %s4619_s24  ;;  %v3031_v2 = vpop.permute.xlu0 %3030 }
 0x4ea   : > { %3112 = vst.msk [vmem:[#allocation3 + $0x70] sm:$0xff] %vm1148_vm9, %v3031_v2  ;;  %v3737_v2 = vld [vmem:[#allocation2 + $0x1a2] sm:$0xff] }
 0x4eb   : > { %v3033_v50 = vpop.permute.xlu1 %3032  ;;  %3436 = vrot.lane.b32.xlu0 %v3347_v53, %s4618_s23 }
 0x4ec   : > { %3113 = vst.msk [vmem:[#allocation3 + $0x78] sm:$0xff] %vm1148_vm9, %v3033_v50 }
 0x4ed   : > { %3054 = vrot.lane.b32.xlu1 %v3538_v5, %s4616_s21  ;;  %v3795_v42 = vpop.permute.xlu0 %3794 }
 0x4ee   : > { %3878 = vst.msk [vmem:[#allocation3 + $0x60] sm:$0xff] %vm1921_vm13, %v3795_v42  ;;  %v3736_v42 = vld [vmem:[#allocation2 + $0x19a] sm:$0xff] }
 0x4ef   : > { %v3797_v28 = vpop.permute.xlu1 %3796  ;;  %2864 = vrot.lane.b32.xlu0 %v3347_v53, %s4615_s20 }
 0x4f0   : > { %3879 = vst.msk [vmem:[#allocation3 + $0x68] sm:$0xff] %vm1921_vm13, %v3797_v28 }
 0x4f1   : > { %3818 = vrot.lane.b32.xlu1 %v3730_v39, %s4620_s16  ;;  %v3223_v25 = vpop.permute.xlu0 %3222 }
 0x4f2   : > { %3304 = vst.msk [vmem:[#allocation3 + $0x70] sm:$0xff] %vm1341_vm10, %v3223_v25 }
 0x4f3   : > { %v3415_v17 = vpop.permute.xlu1 %3414  ;;  %3628 = vrot.lane.b32.xlu0 %v3539_v9, %s4619_s24 }
 0x4f4   : > { %3496 = vst.msk [vmem:[#allocation3 + $0x70] sm:$0xff] %vm1535_vm11, %v3415_v17 }
 0x4f5   : > { %3246 = vrot.lane.b32.xlu1 %v3730_v39, %s4617_s22  ;;  %v3225_v21 = vpop.permute.xlu0 %3224  ;;  %v3910_v44 = vld [vmem:[#allocation3 + $0x60] sm:$0xff] }
 0x4f6   : > { %3305 = vst.msk [vmem:[#allocation3 + $0x78] sm:$0xff] %vm1341_vm10, %v3225_v21  ;;  %4557 = vmatprep.mubr.f32.mxu1 %v3910_v44  ;;  %v6779_v21 = vld [vmem:[%s6943_s2 + $0x1] ss:$0 sm:$0xff] }
 0x4f7   : > { %v3607_v33 = vpop.permute.xlu1 %3606  ;;  %3056 = vrot.lane.b32.xlu0 %v3539_v9, %s4616_s21  ;;  %v3911_v47 = vld [vmem:[#allocation3 + $0x68] sm:$0xff] }
 0x4f8   : > { %3688 = vst.msk [vmem:[#allocation3 + $0x70] sm:$0xff] %vm1728_vm12, %v3607_v33  ;;  %4558 = vmatmul.mubr.f32.gmra.mxu1 %v3911_v47 }
 0x4f9   : > { %3248 = vrot.lane.b32.xlu1 %v3157_v30, %s4617_s22  ;;  %v3417_v59 = vpop.permute.xlu0 %3416 }
 0x4fa   : > { %3497 = vst.msk [vmem:[#allocation3 + $0x78] sm:$0xff] %vm1535_vm11, %v3417_v59 }
 0x4fb   : > { %v3609_v36 = vpop.permute.xlu1 %3608  ;;  %3820 = vrot.lane.b32.xlu0 %v3157_v30, %s4620_s16 }
 0x4fc   : > { %3689 = vst.msk [vmem:[#allocation3 + $0x78] sm:$0xff] %vm1728_vm12, %v3609_v36 }
 0x4fd   : > { %2866 = vrot.lane.b32.xlu1 %v2774_v38, %s4615_s20  ;;  %v3035_v54 = vpop.permute.xlu0 %3034 }
 0x4fe   : > { %3114 = vst.msk [vmem:[#allocation3 + $0x80] sm:$0xff] %vm1148_vm9, %v3035_v54 }
 0x4ff   : > { %v3037_v48 = vpop.permute.xlu1 %3036  ;;  %3438 = vrot.lane.b32.xlu0 %v2774_v38, %s4618_s23 }
 0x500   : > { %3115 = vst.msk [vmem:[#allocation3 + $0x88] sm:$0xff] %vm1148_vm9, %v3037_v48 }
 0x501   : > { %3630 = vrot.lane.b32.xlu1 %v3540_v49, %s4619_s24  ;;  %v3799_v51 = vpop.permute.xlu0 %3798 }
 0x502   : > { %3880 = vst.msk [vmem:[#allocation3 + $0x70] sm:$0xff] %vm1921_vm13, %v3799_v51 }
 0x503   : > { %v3801_v22 = vpop.permute.xlu1 %3800  ;;  %3440 = vrot.lane.b32.xlu0 %v3349_v57, %s4618_s23 }
 0x504   : > { %3881 = vst.msk [vmem:[#allocation3 + $0x78] sm:$0xff] %vm1921_vm13, %v3801_v22 }
 0x505   : > { %3058 = vrot.lane.b32.xlu1 %v3540_v49, %s4616_s21  ;;  %v3227_v56 = vpop.permute.xlu0 %3226 }
 0x506   : > { %3306 = vst.msk [vmem:[#allocation3 + $0x80] sm:$0xff] %vm1341_vm10, %v3227_v56 }
 0x507   : > { %v3419_v55 = vpop.permute.xlu1 %3418  ;;  %2868 = vrot.lane.b32.xlu0 %v3349_v57, %s4615_s20 }
 0x508   : > { %3498 = vst.msk [vmem:[#allocation3 + $0x80] sm:$0xff] %vm1535_vm11, %v3419_v55 }
 0x509   : > { %3822 = vrot.lane.b32.xlu1 %v3732_v23, %s4620_s16  ;;  %v3229_v6 = vpop.permute.xlu0 %3228  ;;  %v3912_v29 = vld [vmem:[#allocation3 + $0x70] sm:$0xff] }
 0x50a   : > { %3307 = vst.msk [vmem:[#allocation3 + $0x88] sm:$0xff] %vm1341_vm10, %v3229_v6  ;;  %4560 = vmatprep.mubr.f32.mxu1 %v3912_v29 }
 0x50b   : > { %v3611_v60 = vpop.permute.xlu1 %3610  ;;  %3632 = vrot.lane.b32.xlu0 %v3541_v40, %s4619_s24  ;;  %v3913_v18 = vld [vmem:[#allocation3 + $0x78] sm:$0xff] }
 0x50c   : > { %3690 = vst.msk [vmem:[#allocation3 + $0x80] sm:$0xff] %vm1728_vm12, %v3611_v60  ;;  %4561 = vmatmul.mubr.f32.gmra.mxu1 %v3913_v18 }
 0x50d   : > { %3250 = vrot.lane.b32.xlu1 %v3732_v23, %s4617_s22  ;;  %v3421_v15 = vpop.permute.xlu0 %3420 }
 0x50e   : > { %3499 = vst.msk [vmem:[#allocation3 + $0x88] sm:$0xff] %vm1535_vm11, %v3421_v15 }
 0x50f   : > { %v3613_v0 = vpop.permute.xlu1 %3612  ;;  %3060 = vrot.lane.b32.xlu0 %v3541_v40, %s4616_s21 }
 0x510   : > { %3691 = vst.msk [vmem:[#allocation3 + $0x88] sm:$0xff] %vm1728_vm12, %v3613_v0 }
 0x511   : > { %3252 = vrot.lane.b32.xlu1 %v3159_v45, %s4617_s22  ;;  %v3039_v14 = vpop.permute.xlu0 %3038 }
 0x512   : > { %3116 = vst.msk [vmem:[#allocation3 + $0x90] sm:$0xff] %vm1148_vm9, %v3039_v14 }
 0x513   : > { %v3041_v35 = vpop.permute.xlu1 %3040  ;;  %3824 = vrot.lane.b32.xlu0 %v3159_v45, %s4620_s16 }
 0x514   : > { %3117 = vst.msk [vmem:[#allocation3 + $0x98] sm:$0xff] %vm1148_vm9, %v3041_v35 }
 0x515   : > { %2870 = vrot.lane.b32.xlu1 %v2776_v37, %s4615_s20  ;;  %v3803_v19 = vpop.permute.xlu0 %3802 }
 0x516   : > { %3882 = vst.msk [vmem:[#allocation3 + $0x80] sm:$0xff] %vm1921_vm13, %v3803_v19 }
 0x517   : > { %v3805_v63 = vpop.permute.xlu1 %3804  ;;  %3442 = vrot.lane.b32.xlu0 %v2776_v37, %s4618_s23 }
 0x518   : > { %3883 = vst.msk [vmem:[#allocation3 + $0x88] sm:$0xff] %vm1921_vm13, %v3805_v63 }
 0x519   : > { %3634 = vrot.lane.b32.xlu1 %v3542_v27, %s4619_s24  ;;  %v3231_v62 = vpop.permute.xlu0 %3230 }
 0x51a   : > { %3308 = vst.msk [vmem:[#allocation3 + $0x90] sm:$0xff] %vm1341_vm10, %v3231_v62 }
 0x51b   : > { %v3423_v3 = vpop.permute.xlu1 %3422  ;;  %3444 = vrot.lane.b32.xlu0 %v3351_v26, %s4618_s23 }
 0x51c   : > { %3500 = vst.msk [vmem:[#allocation3 + $0x90] sm:$0xff] %vm1535_vm11, %v3423_v3 }
 0x51d   : > { %3062 = vrot.lane.b32.xlu1 %v3542_v27, %s4616_s21  ;;  %v3233_v31 = vpop.permute.xlu0 %3232  ;;  %v3914_v61 = vld [vmem:[#allocation3 + $0x80] sm:$0xff] }
 0x51e   : > { %3309 = vst.msk [vmem:[#allocation3 + $0x98] sm:$0xff] %vm1341_vm10, %v3233_v31  ;;  %4563 = vmatprep.mubr.f32.mxu1 %v3914_v61 }
 0x51f   : > { %v3615_v41 = vpop.permute.xlu1 %3614  ;;  %2872 = vrot.lane.b32.xlu0 %v3351_v26, %s4615_s20  ;;  %v3915_v58 = vld [vmem:[#allocation3 + $0x88] sm:$0xff] }
 0x520   : > { %3692 = vst.msk [vmem:[#allocation3 + $0x90] sm:$0xff] %vm1728_vm12, %v3615_v41  ;;  %4564 = vmatmul.mubr.f32.gmra.mxu1 %v3915_v58 }
 0x521   : > { %3826 = vrot.lane.b32.xlu1 %v3734_v52, %s4620_s16  ;;  %v3425_v34 = vpop.permute.xlu0 %3424 }
 0x522   : > { %3501 = vst.msk [vmem:[#allocation3 + $0x98] sm:$0xff] %vm1535_vm11, %v3425_v34 }
 0x523   : > { %v3617_v10 = vpop.permute.xlu1 %3616  ;;  %3636 = vrot.lane.b32.xlu0 %v3543_v12, %s4619_s24 }
 0x524   : > { %3693 = vst.msk [vmem:[#allocation3 + $0x98] sm:$0xff] %vm1728_vm12, %v3617_v10 }
 0x525   : > { %3254 = vrot.lane.b32.xlu1 %v3734_v52, %s4617_s22  ;;  %v3043_v32 = vpop.permute.xlu0 %3042 }
 0x526   : > { %3118 = vst.msk [vmem:[#allocation3 + $0xa0] sm:$0xff] %vm1148_vm9, %v3043_v32 }
 0x527   : > { %v3045_v16 = vpop.permute.xlu1 %3044  ;;  %3064 = vrot.lane.b32.xlu0 %v3543_v12, %s4616_s21 }
 0x528   : > { %3119 = vst.msk [vmem:[#allocation3 + $0xa8] sm:$0xff] %vm1148_vm9, %v3045_v16 }
 0x529   : > { %3256 = vrot.lane.b32.xlu1 %v3161_v46, %s4617_s22  ;;  %v3807_v13 = vpop.permute.xlu0 %3806 }
 0x52a   : > { %3884 = vst.msk [vmem:[#allocation3 + $0x90] sm:$0xff] %vm1921_vm13, %v3807_v13 }
 0x52b   : > { %v3809_v11 = vpop.permute.xlu1 %3808  ;;  %3828 = vrot.lane.b32.xlu0 %v3161_v46, %s4620_s16 }
 0x52c   : > { %3885 = vst.msk [vmem:[#allocation3 + $0x98] sm:$0xff] %vm1921_vm13, %v3809_v11 }
 0x52d   : > { %v3235_v1 = vpop.permute.xlu0 %3234  ;;  %3448 = vrot.lane.b32.xlu1 %v3353_v8, %s4618_s23 }
 0x52e   : > { %3310 = vst.msk [vmem:[#allocation3 + $0xa0] sm:$0xff] %vm1341_vm10, %v3235_v1 }
 0x52f   : > { %v3427_v20 = vpop.permute.xlu1 %3426  ;;  %3446 = vrot.lane.b32.xlu0 %v3352_v7, %s4618_s23 }
 0x530   : > { %3502 = vst.msk [vmem:[#allocation3 + $0xa0] sm:$0xff] %vm1535_vm11, %v3427_v20 }
 0x531   : > { %v3237_v43 = vpop.permute.xlu0 %3236  ;;  %v3916_v5 = vld [vmem:[#allocation3 + $0x90] sm:$0xff]  ;;  %3640 = vrot.lane.b32.xlu1 %v3545_v4, %s4619_s24 }
 0x532   : > { %3311 = vst.msk [vmem:[#allocation3 + $0xa8] sm:$0xff] %vm1341_vm10, %v3237_v43  ;;  %4566 = vmatprep.mubr.f32.mxu1 %v3916_v5 }
 0x533   : > { %v3619_v53 = vpop.permute.xlu1 %3618  ;;  %3638 = vrot.lane.b32.xlu0 %v3544_v24, %s4619_s24  ;;  %v3917_v50 = vld [vmem:[#allocation3 + $0x98] sm:$0xff]  ;;  %s6788_s24 = scalar_lea.vmem %s6944_s3, %s4329_s14 }
 0x534   : > { %3694 = vst.msk [vmem:[#allocation3 + $0xa0] sm:$0xff] %vm1728_vm12, %v3619_v53  ;;  %4567 = vmatmul.mubr.f32.gmra.mxu1 %v3917_v50 }
 0x535   : > { %v3429_v28 = vpop.permute.xlu0 %3428  ;;  %3832 = vrot.lane.b32.xlu1 %v3737_v2, %s4620_s16 }
 0x536   : > { %3503 = vst.msk [vmem:[#allocation3 + $0xa8] sm:$0xff] %vm1535_vm11, %v3429_v28 }
 0x537   : > { %v3621_v39 = vpop.permute.xlu1 %3620  ;;  %3830 = vrot.lane.b32.xlu0 %v3736_v42, %s4620_s16 }
 0x538   : > { %3695 = vst.msk [vmem:[#allocation3 + $0xa8] sm:$0xff] %vm1728_vm12, %v3621_v39 }
 0x539   : > { %v3047_v25 = vpop.permute.xlu0 %3046 }
 0x53a   : > { %3120 = vst.msk [vmem:[#allocation3 + $0xb0] sm:$0xff] %vm1148_vm9, %v3047_v25 }
 0x53b   : > { %v3049_v9 = vpop.permute.xlu1 %3048 }
 0x53c   : > { %3121 = vst.msk [vmem:[#allocation3 + $0xb8] sm:$0xff] %vm1148_vm9, %v3049_v9 }
 0x53d   : > { %v3811_v17 = vpop.permute.xlu0 %3810 }
 0x53e   : > { %3886 = vst.msk [vmem:[#allocation3 + $0xa0] sm:$0xff] %vm1921_vm13, %v3811_v17 }
 0x53f   : > { %v3813_v44 = vpop.permute.xlu1 %3812 }
 0x540   : > { %3887 = vst.msk [vmem:[#allocation3 + $0xa8] sm:$0xff] %vm1921_vm13, %v3813_v44  ;;  %v4541_v33 = vpop.f32.mrf.mxu1 }
 0x541   : > { %v4027_v47 = vadd.f32 %v4541_v33, %v6779_v21  ;;  %v3239_v30 = vpop.permute.xlu0 %3238 }
 0x542   : > { %3312 = vst.msk [vmem:[#allocation3 + $0xb0] sm:$0xff] %vm1341_vm10, %v3239_v30  ;;  %v4021_v59 = vpop.f32.mrf.mxu1 }
 0x543   : > { %v4181_v36 = vmax.f32 %v4027_v47, 0.0  ;;  %v4022_v38 = vadd.f32 %v6779_v21, %v4021_v59  ;;  %v3431_v54 = vpop.permute.xlu1 %3430 }
 0x544   : > { %3504 = vst.msk [vmem:[#allocation3 + $0xb0] sm:$0xff] %vm1535_vm11, %v3431_v54 }
 0x545   : > { %4213 = vst.msk [vmem:[%s6788_s24 + $0x8] sm:$0xff] %vm171_vm0, %v4181_v36  ;;  %v4180_v48 = vmax.f32 %v4022_v38, 0.0  ;;  %v3241_v49 = vpop.permute.xlu0 %3240  ;;  %v3918_v51 = vld [vmem:[#allocation3 + $0xa0] sm:$0xff] }
 0x546   : > { %3313 = vst.msk [vmem:[#allocation3 + $0xb8] sm:$0xff] %vm1341_vm10, %v3241_v49  ;;  %4569 = vmatprep.mubr.f32.mxu1 %v3918_v51 }
 0x547   : > { %4212 = vst.msk [vmem:[%s6788_s24] sm:$0xff] %vm171_vm0, %v4180_v48  ;;  %v3623_v57 = vpop.permute.xlu1 %3622  ;;  %v3919_v22 = vld [vmem:[#allocation3 + $0xa8] sm:$0xff] }
 0x548   : > { %3696 = vst.msk [vmem:[#allocation3 + $0xb0] sm:$0xff] %vm1728_vm12, %v3623_v57  ;;  %4570 = vmatmul.mubr.f32.gmra.mxu1 %v3919_v22 }
 0x549   : > { %v3433_v56 = vpop.permute.xlu0 %3432 }
 0x54a   : > { %3505 = vst.msk [vmem:[#allocation3 + $0xb8] sm:$0xff] %vm1535_vm11, %v3433_v56 }
 0x54b   : > { %v3625_v55 = vpop.permute.xlu1 %3624 }
 0x54c   : > { %3697 = vst.msk [vmem:[#allocation3 + $0xb8] sm:$0xff] %vm1728_vm12, %v3625_v55 }
 0x54d   : > { %v3051_v23 = vpop.permute.xlu0 %3050 }
 0x54e   : > { %3122 = vst.msk [vmem:[#allocation3 + $0xc0] sm:$0xff] %vm1148_vm9, %v3051_v23 }
 0x54f   : > { %v3053_v6 = vpop.permute.xlu1 %3052 }
 0x550   : > { %3123 = vst.msk [vmem:[#allocation3 + $0xc8] sm:$0xff] %vm1148_vm9, %v3053_v6 }
 0x551   : > { %v3815_v29 = vpop.permute.xlu0 %3814 }
 0x552   : > { %3888 = vst.msk [vmem:[#allocation3 + $0xb0] sm:$0xff] %vm1921_vm13, %v3815_v29 }
 0x553   : > { %v3817_v40 = vpop.permute.xlu1 %3816 }
 0x554   : > { %3889 = vst.msk [vmem:[#allocation3 + $0xb8] sm:$0xff] %vm1921_vm13, %v3817_v40  ;;  %v4544_v60 = vpop.f32.mrf.mxu1 }
 0x555   : > { %v4037_v18 = vadd.f32 %v4544_v60, %v6779_v21  ;;  %v3243_v15 = vpop.permute.xlu0 %3242 }
 0x556   : > { %3314 = vst.msk [vmem:[#allocation3 + $0xc0] sm:$0xff] %vm1341_vm10, %v3243_v15  ;;  %v4031_v0 = vpop.f32.mrf.mxu1 }
 0x557   : > { %v4183_v45 = vmax.f32 %v4037_v18, 0.0  ;;  %v4032_v14 = vadd.f32 %v6779_v21, %v4031_v0  ;;  %v3435_v35 = vpop.permute.xlu1 %3434 }
 0x558   : > { %3506 = vst.msk [vmem:[#allocation3 + $0xc0] sm:$0xff] %vm1535_vm11, %v3435_v35 }
 0x559   : > { %4215 = vst.msk [vmem:[%s6788_s24 + $0x18] sm:$0xff] %vm171_vm0, %v4183_v45  ;;  %v4182_v37 = vmax.f32 %v4032_v14, 0.0  ;;  %v3245_v19 = vpop.permute.xlu0 %3244  ;;  %v3920_v63 = vld [vmem:[#allocation3 + $0xb0] sm:$0xff] }
 0x55a   : > { %3315 = vst.msk [vmem:[#allocation3 + $0xc8] sm:$0xff] %vm1341_vm10, %v3245_v19  ;;  %4572 = vmatprep.mubr.f32.mxu1 %v3920_v63 }
 0x55b   : > { %4214 = vst.msk [vmem:[%s6788_s24 + $0x10] sm:$0xff] %vm171_vm0, %v4182_v37  ;;  %v3627_v27 = vpop.permute.xlu1 %3626  ;;  %v3921_v62 = vld [vmem:[#allocation3 + $0xb8] sm:$0xff] }
 0x55c   : > { %3698 = vst.msk [vmem:[#allocation3 + $0xc0] sm:$0xff] %vm1728_vm12, %v3627_v27  ;;  %4573 = vmatmul.mubr.f32.gmra.mxu1 %v3921_v62 }
 0x55d   : > { %v3437_v26 = vpop.permute.xlu0 %3436 }
 0x55e   : > { %3507 = vst.msk [vmem:[#allocation3 + $0xc8] sm:$0xff] %vm1535_vm11, %v3437_v26 }
 0x55f   : > { %v3055_v3 = vpop.permute.xlu1 %3054 }
 0x560   : > { %3124 = vst.msk [vmem:[#allocation3 + $0xd0] sm:$0xff] %vm1148_vm9, %v3055_v3 }
 0x561   : > { %v2865_v31 = vpop.permute.xlu0 %2864 }
 0x562   : > { %2933 = vst.msk [vmem:[#allocation3 + $0xd8] sm:$0xff] %vm955_vm8, %v2865_v31 }
 0x563   : > { %v3819_v61 = vpop.permute.xlu1 %3818 }
 0x564   : > { %3890 = vst.msk [vmem:[#allocation3 + $0xc0] sm:$0xff] %vm1921_vm13, %v3819_v61 }
 0x565   : > { %v3629_v41 = vpop.permute.xlu0 %3628 }
 0x566   : > { %3699 = vst.msk [vmem:[#allocation3 + $0xc8] sm:$0xff] %vm1728_vm12, %v3629_v41 }
 0x567   : > { %v3247_v58 = vpop.permute.xlu1 %3246 }
 0x568   : > { %3316 = vst.msk [vmem:[#allocation3 + $0xd0] sm:$0xff] %vm1341_vm10, %v3247_v58  ;;  %v4547_v52 = vpop.f32.mrf.mxu1 }
 0x569   : > { %v4047_v34 = vadd.f32 %v4547_v52, %v6779_v21  ;;  %v3057_v12 = vpop.permute.xlu0 %3056 }
 0x56a   : > { %3125 = vst.msk [vmem:[#allocation3 + $0xd8] sm:$0xff] %vm1148_vm9, %v3057_v12  ;;  %v4041_v10 = vpop.f32.mrf.mxu1 }
 0x56b   : > { %v4185_v32 = vmax.f32 %v4047_v34, 0.0  ;;  %v4042_v16 = vadd.f32 %v6779_v21, %v4041_v10  ;;  %v3249_v46 = vpop.permute.xlu1 %3248  ;;  %v3922_v13 = vld [vmem:[#allocation3 + $0xc0] sm:$0xff] }
 0x56c   : > { %3317 = vst.msk [vmem:[#allocation3 + $0xd8] sm:$0xff] %vm1341_vm10, %v3249_v46  ;;  %4575 = vmatprep.mubr.f32.mxu1 %v3922_v13 }
 0x56d   : > { %4217 = vst.msk [vmem:[%s6788_s24 + $0x28] sm:$0xff] %vm171_vm0, %v4185_v32  ;;  %v4184_v8 = vmax.f32 %v4042_v16, 0.0  ;;  %v3821_v11 = vpop.permute.xlu0 %3820 }
 0x56e   : > { %3891 = vst.msk [vmem:[#allocation3 + $0xc8] sm:$0xff] %vm1921_vm13, %v3821_v11 }
 0x56f   : > { %4216 = vst.msk [vmem:[%s6788_s24 + $0x20] sm:$0xff] %vm171_vm0, %v4184_v8  ;;  %v2867_v7 = vpop.permute.xlu1 %2866 }
 0x570   : > { %2934 = vst.msk [vmem:[#allocation3 + $0xe0] sm:$0xff] %vm955_vm8, %v2867_v7 }
 0x571   : > { %v3439_v1 = vpop.permute.xlu0 %3438 }
 0x572   : > { %3508 = vst.msk [vmem:[#allocation3 + $0xd0] sm:$0xff] %vm1535_vm11, %v3439_v1 }
 0x573   : > { %v3631_v4 = vpop.permute.xlu1 %3630 }
 0x574   : > { %3700 = vst.msk [vmem:[#allocation3 + $0xd0] sm:$0xff] %vm1728_vm12, %v3631_v4 }
 0x575   : > { %v3441_v20 = vpop.permute.xlu0 %3440  ;;  %v3923_v24 = vld [vmem:[#allocation3 + $0xc8] sm:$0xff] }
 0x576   : > { %3509 = vst.msk [vmem:[#allocation3 + $0xd8] sm:$0xff] %vm1535_vm11, %v3441_v20  ;;  %4576 = vmatmul.mubr.f32.gmra.mxu1 %v3923_v24 }
 0x577   : > { %v3059_v43 = vpop.permute.xlu1 %3058 }
 0x578   : > { %3126 = vst.msk [vmem:[#allocation3 + $0xe0] sm:$0xff] %vm1148_vm9, %v3059_v43 }
 0x579   : > { %v2869_v5 = vpop.permute.xlu0 %2868 }
 0x57a   : > { %2935 = vst.msk [vmem:[#allocation3 + $0xe8] sm:$0xff] %vm955_vm8, %v2869_v5 }
 0x57b   : > { %v3823_v2 = vpop.permute.xlu1 %3822 }
 0x57c   : > { %3892 = vst.msk [vmem:[#allocation3 + $0xd0] sm:$0xff] %vm1921_vm13, %v3823_v2  ;;  %v4550_v53 = vpop.f32.mrf.mxu1 }
 0x57d   : > { %v4057_v50 = vadd.f32 %v4550_v53, %v6779_v21  ;;  %v3633_v42 = vpop.permute.xlu0 %3632 }
 0x57e   : > { %3701 = vst.msk [vmem:[#allocation3 + $0xd8] sm:$0xff] %vm1728_vm12, %v3633_v42  ;;  %v4051_v28 = vpop.f32.mrf.mxu1 }
 0x57f   : > { %v4187_v39 = vmax.f32 %v4057_v50, 0.0  ;;  %v4052_v25 = vadd.f32 %v6779_v21, %v4051_v28  ;;  %v3251_v9 = vpop.permute.xlu1 %3250 }
 0x580   : > { %3318 = vst.msk [vmem:[#allocation3 + $0xe0] sm:$0xff] %vm1341_vm10, %v3251_v9 }
 0x581   : > { %4219 = vst.msk [vmem:[%s6788_s24 + $0x38] sm:$0xff] %vm171_vm0, %v4187_v39  ;;  %v4186_v17 = vmax.f32 %v4052_v25, 0.0  ;;  %v3061_v44 = vpop.permute.xlu0 %3060 }
 0x582   : > { %3127 = vst.msk [vmem:[#allocation3 + $0xe8] sm:$0xff] %vm1148_vm9, %v3061_v44 }
 0x583   : > { %4218 = vst.msk [vmem:[%s6788_s24 + $0x30] sm:$0xff] %vm171_vm0, %v4186_v17  ;;  %v3253_v33 = vpop.permute.xlu1 %3252  ;;  %v3924_v47 = vld [vmem:[#allocation3 + $0xd0] sm:$0xff] }
 0x584   : > { %3319 = vst.msk [vmem:[#allocation3 + $0xe8] sm:$0xff] %vm1341_vm10, %v3253_v33  ;;  %4578 = vmatprep.mubr.f32.mxu1 %v3924_v47 }
 0x585   : > { %v3825_v30 = vpop.permute.xlu0 %3824 }
 0x586   : > { %3893 = vst.msk [vmem:[#allocation3 + $0xd8] sm:$0xff] %vm1921_vm13, %v3825_v30 }
 0x587   : > { %v2871_v59 = vpop.permute.xlu1 %2870 }
 0x588   : > { %2936 = vst.msk [vmem:[#allocation3 + $0xf0] sm:$0xff] %vm955_vm8, %v2871_v59 }
 0x589   : > { %v3443_v36 = vpop.permute.xlu0 %3442 }
 0x58a   : > { %3510 = vst.msk [vmem:[#allocation3 + $0xe0] sm:$0xff] %vm1535_vm11, %v3443_v36 }
 0x58b   : > { %v3635_v38 = vpop.permute.xlu1 %3634 }
 0x58c   : > { %3702 = vst.msk [vmem:[#allocation3 + $0xe0] sm:$0xff] %vm1728_vm12, %v3635_v38 }
 0x58d   : > { %v3445_v54 = vpop.permute.xlu0 %3444  ;;  %v3925_v48 = vld [vmem:[#allocation3 + $0xd8] sm:$0xff] }
 0x58e   : > { %3511 = vst.msk [vmem:[#allocation3 + $0xe8] sm:$0xff] %vm1535_vm11, %v3445_v54  ;;  %4579 = vmatmul.mubr.f32.gmra.mxu1 %v3925_v48 }
 0x58f   : > { %v3063_v49 = vpop.permute.xlu1 %3062 }
 0x590   : > { %3128 = vst.msk [vmem:[#allocation3 + $0xf0] sm:$0xff] %vm1148_vm9, %v3063_v49  ;;  %v4553_v51 = vpop.f32.mrf.mxu1 }
 0x591   : > { %v4067_v57 = vadd.f32 %v4553_v51, %v6779_v21  ;;  %v2873_v22 = vpop.permute.xlu0 %2872 }
 0x592   : > { %2937 = vst.msk [vmem:[#allocation3 + $0xf8] sm:$0xff] %vm955_vm8, %v2873_v22  ;;  %v4061_v56 = vpop.f32.mrf.mxu1 }
 0x593   : > { %v4189_v55 = vmax.f32 %v4067_v57, 0.0  ;;  %v4062_v23 = vadd.f32 %v6779_v21, %v4061_v56  ;;  %v3827_v6 = vpop.permute.xlu1 %3826 }
 0x594   : > { %3894 = vst.msk [vmem:[#allocation3 + $0xe0] sm:$0xff] %vm1921_vm13, %v3827_v6 }
 0x595   : > { %4221 = vst.msk [vmem:[%s6788_s24 + $0x48] sm:$0xff] %vm171_vm0, %v4189_v55  ;;  %v4188_v29 = vmax.f32 %v4062_v23, 0.0  ;;  %v3637_v40 = vpop.permute.xlu0 %3636 }
 0x596   : > { %3703 = vst.msk [vmem:[#allocation3 + $0xe8] sm:$0xff] %vm1728_vm12, %v3637_v40 }
 0x597   : > { %4220 = vst.msk [vmem:[%s6788_s24 + $0x40] sm:$0xff] %vm171_vm0, %v4188_v29  ;;  %v3255_v60 = vpop.permute.xlu1 %3254 }
 0x598   : > { %3320 = vst.msk [vmem:[#allocation3 + $0xf0] sm:$0xff] %vm1341_vm10, %v3255_v60 }
 0x599   : > { %v3065_v18 = vpop.permute.xlu0 %3064 }
 0x59a   : > { %3129 = vst.msk [vmem:[#allocation3 + $0xf8] sm:$0xff] %vm1148_vm9, %v3065_v18 }
 0x59b   : > { %v3257_v15 = vpop.permute.xlu1 %3256  ;;  %v3926_v0 = vld [vmem:[#allocation3 + $0xe0] sm:$0xff] }
 0x59c   : > { %3321 = vst.msk [vmem:[#allocation3 + $0xf8] sm:$0xff] %vm1341_vm10, %v3257_v15  ;;  %4581 = vmatprep.mubr.f32.mxu1 %v3926_v0 }
 0x59d   : > { %v3829_v45 = vpop.permute.xlu0 %3828 }
 0x59e   : > { %3895 = vst.msk [vmem:[#allocation3 + $0xe8] sm:$0xff] %vm1921_vm13, %v3829_v45 }
 0x59f   : > { %v3449_v14 = vpop.permute.xlu1 %3448 }
 0x5a0   : > { %3513 = vst.msk [vmem:[#allocation3 + $0xf8] sm:$0xff] %vm1535_vm11, %v3449_v14 }
 0x5a1   : > { %v3447_v35 = vpop.permute.xlu0 %3446 }
 0x5a2   : > { %3512 = vst.msk [vmem:[#allocation3 + $0xf0] sm:$0xff] %vm1535_vm11, %v3447_v35 }
 0x5a3   : > { %v3641_v37 = vpop.permute.xlu1 %3640 }
 0x5a4   : > { %v4556_v19 = vpop.f32.mrf.mxu1  ;;  %3705 = vst.msk [vmem:[#allocation3 + $0xf8] sm:$0xff] %vm1728_vm12, %v3641_v37 }
 0x5a5   : > { %v4077_v63 = vadd.f32 %v4556_v19, %v6779_v21  ;;  %v3639_v27 = vpop.permute.xlu0 %3638  ;;  %v3927_v62 = vld [vmem:[#allocation3 + $0xe8] sm:$0xff] }
 0x5a6   : > { %3704 = vst.msk [vmem:[#allocation3 + $0xf0] sm:$0xff] %vm1728_vm12, %v3639_v27  ;;  %v4071_v26 = vpop.f32.mrf.mxu1  ;;  %4582 = vmatmul.mubr.f32.gmra.mxu1 %v3927_v62 }
 0x5a7   : > { %v4191_v3 = vmax.f32 %v4077_v63, 0.0  ;;  %v4072_v31 = vadd.f32 %v6779_v21, %v4071_v26  ;;  %v3833_v61 = vpop.permute.xlu1 %3832 }
 0x5a8   : > { %3897 = vst.msk [vmem:[#allocation3 + $0xf8] sm:$0xff] %vm1921_vm13, %v3833_v61 }
 0x5a9   : > { %4223 = vst.msk [vmem:[%s6788_s24 + $0x58] sm:$0xff] %vm171_vm0, %v4191_v3  ;;  %v4190_v41 = vmax.f32 %v4072_v31, 0.0  ;;  %v3831_v58 = vpop.permute.xlu0 %3830 }
 0x5aa   : > { %3896 = vst.msk [vmem:[#allocation3 + $0xf0] sm:$0xff] %vm1921_vm13, %v3831_v58 }
 0x5ab   : > { %4222 = vst.msk [vmem:[%s6788_s24 + $0x50] sm:$0xff] %vm171_vm0, %v4190_v41 }
 0x5af   : > { %v3929_v52 = vld [vmem:[#allocation3 + $0xf8] sm:$0xff] }
 0x5b1   : > { %v3928_v34 = vld [vmem:[#allocation3 + $0xf0] sm:$0xff] }
 0x5b2   : > { %4584 = vmatprep.mubr.f32.mxu1 %v3928_v34 }
 0x5b3   : > { %4585 = vmatmul.mubr.f32.gmra.mxu1 %v3929_v52 }
 0x5b8   : > { %v4559_v12 = vpop.f32.mrf.mxu1 }
 0x5b9   : > { %v4087_v10 = vadd.f32 %v4559_v12, %v6779_v21 }
 0x5ba   : > { %v4081_v32 = vpop.f32.mrf.mxu1 }
 0x5bb   : > { %v4193_v16 = vmax.f32 %v4087_v10, 0.0  ;;  %v4082_v46 = vadd.f32 %v6779_v21, %v4081_v32 }
 0x5bd   : > { %4225 = vst.msk [vmem:[%s6788_s24 + $0x68] sm:$0xff] %vm171_vm0, %v4193_v16  ;;  %v4192_v13 = vmax.f32 %v4082_v46, 0.0 }
 0x5bf   : > { %4224 = vst.msk [vmem:[%s6788_s24 + $0x60] sm:$0xff] %vm171_vm0, %v4192_v13 }
 0x5cc   : > { %v4562_v8 = vpop.f32.mrf.mxu1 }
 0x5cd   : > { %v4097_v11 = vadd.f32 %v4562_v8, %v6779_v21 }
 0x5ce   : > { %v4091_v7 = vpop.f32.mrf.mxu1 }
 0x5cf   : > { %v4195_v1 = vmax.f32 %v4097_v11, 0.0  ;;  %v4092_v4 = vadd.f32 %v6779_v21, %v4091_v7 }
 0x5d1   : > { %4227 = vst.msk [vmem:[%s6788_s24 + $0x78] sm:$0xff] %vm171_vm0, %v4195_v1  ;;  %v4194_v20 = vmax.f32 %v4092_v4, 0.0 }
 0x5d3   : > { %4226 = vst.msk [vmem:[%s6788_s24 + $0x70] sm:$0xff] %vm171_vm0, %v4194_v20 }
 0x5e0   : > { %v4565_v24 = vpop.f32.mrf.mxu1 }
 0x5e1   : > { %v4107_v43 = vadd.f32 %v4565_v24, %v6779_v21 }
 0x5e2   : > { %v4101_v5 = vpop.f32.mrf.mxu1 }
 0x5e3   : > { %v4197_v2 = vmax.f32 %v4107_v43, 0.0  ;;  %v4102_v53 = vadd.f32 %v6779_v21, %v4101_v5 }
 0x5e5   : > { %4229 = vst.msk [vmem:[%s6788_s24 + $0x88] sm:$0xff] %vm171_vm0, %v4197_v2  ;;  %v4196_v50 = vmax.f32 %v4102_v53, 0.0 }
 0x5e7   : > { %4228 = vst.msk [vmem:[%s6788_s24 + $0x80] sm:$0xff] %vm171_vm0, %v4196_v50 }
 0x5f4   : > { %v4568_v42 = vpop.f32.mrf.mxu1 }
 0x5f5   : > { %v4117_v28 = vadd.f32 %v4568_v42, %v6779_v21 }
 0x5f6   : > { %v4111_v39 = vpop.f32.mrf.mxu1 }
 0x5f7   : > { %v4199_v25 = vmax.f32 %v4117_v28, 0.0  ;;  %v4112_v9 = vadd.f32 %v6779_v21, %v4111_v39 }
 0x5f9   : > { %4231 = vst.msk [vmem:[%s6788_s24 + $0x98] sm:$0xff] %vm171_vm0, %v4199_v25  ;;  %v4198_v17 = vmax.f32 %v4112_v9, 0.0 }
 0x5fb   : > { %4230 = vst.msk [vmem:[%s6788_s24 + $0x90] sm:$0xff] %vm171_vm0, %v4198_v17 }
 0x608   : > { %v4571_v44 = vpop.f32.mrf.mxu1 }
 0x609   : > { %v4127_v33 = vadd.f32 %v4571_v44, %v6779_v21 }
 0x60a   : > { %v4121_v47 = vpop.f32.mrf.mxu1 }
 0x60b   : > { %v4201_v30 = vmax.f32 %v4127_v33, 0.0  ;;  %v4122_v59 = vadd.f32 %v6779_v21, %v4121_v47 }
 0x60d   : > { %4233 = vst.msk [vmem:[%s6788_s24 + $0xa8] sm:$0xff] %vm171_vm0, %v4201_v30  ;;  %v4200_v36 = vmax.f32 %v4122_v59, 0.0 }
 0x60f   : > { %4232 = vst.msk [vmem:[%s6788_s24 + $0xa0] sm:$0xff] %vm171_vm0, %v4200_v36 }
 0x61c   : > { %v4574_v38 = vpop.f32.mrf.mxu1 }
 0x61d   : > { %v4137_v54 = vadd.f32 %v4574_v38, %v6779_v21 }
 0x61e   : > { %v4131_v48 = vpop.f32.mrf.mxu1 }
 0x61f   : > { %v4203_v49 = vmax.f32 %v4137_v54, 0.0  ;;  %v4132_v51 = vadd.f32 %v6779_v21, %v4131_v48 }
 0x621   : > { %4235 = vst.msk [vmem:[%s6788_s24 + $0xb8] sm:$0xff] %vm171_vm0, %v4203_v49  ;;  %v4202_v57 = vmax.f32 %v4132_v51, 0.0 }
 0x623   : > { %4234 = vst.msk [vmem:[%s6788_s24 + $0xb0] sm:$0xff] %vm171_vm0, %v4202_v57 }
 0x636   : > { %v4577_v22 = vpop.f32.mrf.mxu1 }
 0x637   : > { %v4147_v56 = vadd.f32 %v4577_v22, %v6779_v21 }
 0x638   : > { %v4141_v55 = vpop.f32.mrf.mxu1 }
 0x639   : > { %v4205_v23 = vmax.f32 %v4147_v56, 0.0  ;;  %v4142_v6 = vadd.f32 %v6779_v21, %v4141_v55 }
 0x63b   : > { %4237 = vst.msk [vmem:[%s6788_s24 + $0xc8] sm:$0xff] %vm171_vm0, %v4205_v23  ;;  %v4204_v29 = vmax.f32 %v4142_v6, 0.0 }
 0x63d   : > { %4236 = vst.msk [vmem:[%s6788_s24 + $0xc0] sm:$0xff] %vm171_vm0, %v4204_v29 }
 0x64e   : > { %v4580_v40 = vpop.f32.mrf.mxu1 }
 0x64f   : > { %v4157_v60 = vadd.f32 %v4580_v40, %v6779_v21 }
 0x650   : > { %v4151_v18 = vpop.f32.mrf.mxu1 }
 0x651   : > { %v4207_v15 = vmax.f32 %v4157_v60, 0.0  ;;  %v4152_v0 = vadd.f32 %v6779_v21, %v4151_v18 }
 0x653   : > { %4239 = vst.msk [vmem:[%s6788_s24 + $0xd8] sm:$0xff] %vm171_vm0, %v4207_v15  ;;  %v4206_v45 = vmax.f32 %v4152_v0, 0.0 }
 0x655   : > { %4238 = vst.msk [vmem:[%s6788_s24 + $0xd0] sm:$0xff] %vm171_vm0, %v4206_v45 }
 0x666   : > { %v4583_v14 = vpop.f32.mrf.mxu1 }
 0x667   : > { %v4167_v35 = vadd.f32 %v4583_v14, %v6779_v21 }
 0x668   : > { %v4161_v37 = vpop.f32.mrf.mxu1 }
 0x669   : > { %v4209_v19 = vmax.f32 %v4167_v35, 0.0  ;;  %v4162_v63 = vadd.f32 %v6779_v21, %v4161_v37 }
 0x66b   : > { %4241 = vst.msk [vmem:[%s6788_s24 + $0xe8] sm:$0xff] %vm171_vm0, %v4209_v19  ;;  %v4208_v27 = vmax.f32 %v4162_v63, 0.0 }
 0x66d   : > { %4240 = vst.msk [vmem:[%s6788_s24 + $0xe0] sm:$0xff] %vm171_vm0, %v4208_v27 }
 0x673   : > { %v4586_v62 = vpop.f32.mrf.mxu1 }
 0x674   : > { %v4177_v26 = vadd.f32 %v4586_v62, %v6779_v21 }
 0x675   : > { %v4171_v3 = vpop.f32.mrf.mxu1 }
 0x676   : > { %v4211_v31 = vmax.f32 %v4177_v26, 0.0  ;;  %v4172_v61 = vadd.f32 %v6779_v21, %v4171_v3 }
 0x678   : > { %4243 = vst.msk [vmem:[%s6788_s24 + $0xf8] sm:$0xff] %vm171_vm0, %v4211_v31  ;;  %v4210_v41 = vmax.f32 %v4172_v61, 0.0 }
 0x67a   : > { %4242 = vst.msk [vmem:[%s6788_s24 + $0xf0] sm:$0xff] %vm171_vm0, %v4210_v41 }
 0x67b PF: > { %s13_s12 = sadd.s32 1, %s4610_s12  }
 0x67c   : > { %p10_p4 = scmp.ge.s32.totalorder %s13_s12, 4  }
 0x67e   :  { %12 = sbr.rel (!%p10_p4) target bundleno = 1 (0x1), region = 67 }

</bundles_post_ra>
